<compile_context>
chip_gen: v5e
topology: v5e:2x2
jax: 0.10.0
libtpu: 0.0.40
codegen_flags: <defaults>
</compile_context>

<pallas_src>
import functools

import jax
import jax.numpy as jnp
import numpy as np
from jax.experimental import pallas as pl
from jax.experimental.pallas import tpu as pltpu

EPS = 1e-5  # nn.LayerNorm default eps


def _layer_norm(v, g, b):
    mu = jnp.mean(v, axis=-1, keepdims=True)
    var = jnp.mean(jnp.square(v - mu), axis=-1, keepdims=True)
    return (v - mu) * jax.lax.rsqrt(var + EPS) * g + b


def genblock_kernel(sln_ref,                      # SMEM (4,): g1, b1, g2, b2
                    x_ref, w_ref,                 # (Bt, N, D), (Bt, 1, D)
                    ln1w_ref, ln1b_ref,           # (1, D) each
                    wq_ref, wk_ref, wv_ref,       # (H, D, hd) bf16 (scale folded in wq)
                    projw_ref, projb_ref,         # (H, hd, D) bf16, (1, D) f32
                    ln2w_ref, ln2b_ref,           # (1, D) each
                    fc1w_ref, fc1b_ref,           # (D, Hm) bf16, (1, Hm) f32
                    fc2w_ref, fc2b_ref,           # (Hm, D) bf16, (1, D) f32
                    out_ref,                      # (Bt, N, D)
                    *, num_heads):
    f32 = jnp.float32
    bf16 = jnp.bfloat16

    Bt, N, D = x_ref.shape
    H = num_heads
    hd = D // H
    R = Bt * N

    x = x_ref[...].astype(f32).reshape(R, D)
    # Style vector, broadcast over the token axis of each sample, then flattened.
    wsty = jnp.broadcast_to(w_ref[...].astype(f32), (Bt, N, D)).reshape(R, D)

    g1 = sln_ref[0]
    b1 = sln_ref[1]
    g2 = sln_ref[2]
    b2 = sln_ref[3]

    # ---- SLN #1 (f32) ----
    h = g1 * wsty * _layer_norm(x, ln1w_ref[...], ln1b_ref[...]) + b1 * wsty

    # ---- Multi-head self-attention: head-major batched contractions ----
    # (no per-head Python unroll, no kh.T, no lane-direction concat)
    hb = jnp.broadcast_to(h.astype(bf16)[None], (H, R, D))                 # (H, R, D)
    q = jnp.einsum('hrd,hdf->hrf', hb, wq_ref[...], preferred_element_type=f32)
    k = jnp.einsum('hrd,hdf->hrf', hb, wk_ref[...], preferred_element_type=f32)
    v = jnp.einsum('hrd,hdf->hrf', hb, wv_ref[...], preferred_element_type=f32)

    # (H, Bt*N, hd) -> (H*Bt, N, hd): batch = (head, sample); tile-aligned reshape.
    qa = q.astype(bf16).reshape(H * Bt, N, hd)
    ka = k.astype(bf16).reshape(H * Bt, N, hd)
    va = v.astype(bf16).reshape(H * Bt, N, hd)

    s = jnp.einsum('bnd,bmd->bnm', qa, ka, preferred_element_type=f32)     # scale in wq
    s = s - jnp.max(s, axis=-1, keepdims=True)
    p = jnp.exp(s)
    p = p * pl.reciprocal(jnp.sum(p, axis=-1, keepdims=True), approx=True)

    o = jnp.einsum('bnm,bmd->bnd', p.astype(bf16), va, preferred_element_type=f32)

    # Output projection folded per head and summed (replaces concat + big dot).
    o_hm = o.astype(bf16).reshape(H, R, hd)
    proj = jnp.einsum('hrd,hdf->hrf', o_hm, projw_ref[...],
                      preferred_element_type=f32)                          # (H, R, D)
    attn = jnp.sum(proj, axis=0) + projb_ref[...]                          # (R, D)

    x1 = x + attn                                  # first residual (f32)

    # ---- SLN #2 + MLP ----
    h2 = g2 * wsty * _layer_norm(x1, ln2w_ref[...], ln2b_ref[...]) + b2 * wsty
    m = jnp.dot(h2.astype(bf16), fc1w_ref[...],
                preferred_element_type=f32) + fc1b_ref[...]
    m = jax.nn.gelu(m, approximate=True)           # tanh GELU -> EUP
    m = jnp.dot(m.astype(bf16), fc2w_ref[...],
                preferred_element_type=f32) + fc2b_ref[...]

    out_ref[...] = (x1 + m).reshape(Bt, N, D).astype(out_ref.dtype)  # second residual


def _pick_block_b(B, N, max_rows=256):
    """Largest sample tile that keeps >=2 parallel grid steps (v7x megacore)."""
    divisors = [d for d in range(1, B + 1) if B % d == 0 and d * N <= max_rows]
    if not divisors:
        return 1
    multi_step = [d for d in divisors if B // d >= 2]
    return max(multi_step) if multi_step else max(divisors)


def gen_block(x, w, params, *, num_heads=8, block_b=None):
    B, N, D = x.shape
    H = num_heads
    hd = D // H
    Hm = params["fc1_wT"].shape[1]
    bt = block_b if block_b is not None else _pick_block_b(B, N)
    assert B % bt == 0

    f32, bf16 = jnp.float32, jnp.bfloat16
    scale = float(hd) ** -0.5

    # Wrapper-side (XLA) parameter prep: split fused qkv into head-major weights,
    # fold the softmax scale into q, reshape the output projection per head,
    # and cast matmul weights to bf16.
    qkv_wT = params["qkv_wT"].astype(f32)                      # (D, 3D)

    def head_major(wcols, s=1.0):                              # (D, D) -> (H, D, hd)
        return (wcols * s).reshape(D, H, hd).transpose(1, 0, 2).astype(bf16)

    wq = head_major(qkv_wT[:, 0 * D:1 * D], scale)
    wk = head_major(qkv_wT[:, 1 * D:2 * D])
    wv = head_major(qkv_wT[:, 2 * D:3 * D])
    wproj = params["proj_wT"].astype(f32).reshape(H, hd, D).astype(bf16)

    args = (
        params["sln"].astype(f32),
        x, w,
        params["ln1_w"].astype(f32), params["ln1_b"].astype(f32),
        wq, wk, wv,
        wproj, params["proj_b"].astype(f32),
        params["ln2_w"].astype(f32), params["ln2_b"].astype(f32),
        params["fc1_wT"].astype(bf16), params["fc1_b"].astype(f32),
        params["fc2_wT"].astype(bf16), params["fc2_b"].astype(f32),
    )

    def const_spec(shape):
        zeros = (0,) * len(shape)
        return pl.BlockSpec(shape, lambda i, _z=zeros: _z)

    in_specs = [
        pl.BlockSpec(memory_space=pltpu.MemorySpace.SMEM),     # SLN scalars
        pl.BlockSpec((bt, N, D), lambda i: (i, 0, 0)),         # x
        pl.BlockSpec((bt, 1, D), lambda i: (i, 0, 0)),         # w (mapped latent)
        const_spec((1, D)), const_spec((1, D)),                # ln1 weight / bias
        const_spec((H, D, hd)), const_spec((H, D, hd)), const_spec((H, D, hd)),
        const_spec((H, hd, D)), const_spec((1, D)),            # proj weight / bias
        const_spec((1, D)), const_spec((1, D)),                # ln2 weight / bias
        const_spec((D, Hm)), const_spec((1, Hm)),              # fc1 weight / bias
        const_spec((Hm, D)), const_spec((1, D)),               # fc2 weight / bias
    ]
    out_spec = pl.BlockSpec((bt, N, D), lambda i: (i, 0, 0))

    kernel = functools.partial(genblock_kernel, num_heads=num_heads)

    # NOTE: at production ViT sizes (D>=768, Hm=4D, long N) set
    # vmem_limit_bytes and tile the MLP along Hm; at these sizes the default
    # scoped VMEM is ample on v5e/v6e/v7x.
    return pl.pallas_call(
        kernel,
        out_shape=jax.ShapeDtypeStruct((B, N, D), x.dtype),
        grid=(B // bt,),
        in_specs=in_specs,
        out_specs=out_spec,
        compiler_params=pltpu.CompilerParams(
            dimension_semantics=("parallel",)),
    )(*args)


def gen_block_ref(x, w, params, *, num_heads=8):
    """Pure-JAX f32 reference mirroring the PyTorch forward (exact erf GELU)."""
    g1, b1, g2, b2 = (params["sln"][i] for i in range(4))

    def ln(v, gg, bb):
        mu = v.mean(-1, keepdims=True)
        var = ((v - mu) ** 2).mean(-1, keepdims=True)
        return (v - mu) / jnp.sqrt(var + EPS) * gg + bb

    B, N, D = x.shape
    hd = D // num_heads

    h = g1 * w * ln(x, params["ln1_w"][0], params["ln1_b"][0]) + b1 * w
    qkv = h @ params["qkv_wT"]
    qkv = qkv.reshape(B, N, 3, num_heads, hd).transpose(2, 0, 3, 1, 4)
    q, k, v = qkv[0], qkv[1], qkv[2]                      # (B, H, N, hd)
    s = (q @ jnp.swapaxes(k, -1, -2)) * (hd ** -0.5)
    p = jax.nn.softmax(s, axis=-1)
    attn = (p @ v).transpose(0, 2, 1, 3).reshape(B, N, D)
    attn = attn @ params["proj_wT"] + params["proj_b"][0]
    x1 = x + attn

    h2 = g2 * w * ln(x1, params["ln2_w"][0], params["ln2_b"][0]) + b2 * w
    m = jax.nn.gelu(h2 @ params["fc1_wT"] + params["fc1_b"][0], approximate=False)
    m = m @ params["fc2_wT"] + params["fc2_b"][0]
    return x1 + m


if __name__ == "__main__":
    # Small shapes consistent with the module: emb_dim divisible by num_heads.
    B, N, D = 4, 16, 64
    num_heads = 8
    mlp_ratio = 4.0
    Hm = int(D * mlp_ratio)

    key = jax.random.PRNGKey(0)
    ks = jax.random.split(key, 10)

    x = jax.random.normal(ks[0], (B, N, D), jnp.float32)
    w = jax.random.normal(ks[1], (B, 1, D), jnp.float32)   # mapped latent (SLN input)

    init = lambda k, shape, s=0.02: s * jax.random.normal(k, shape, jnp.float32)
    params = {
        # SLN scalars (torch.randn(1,1,1) each): [gamma1, beta1, gamma2, beta2]
        "sln": jax.random.normal(ks[2], (4,), jnp.float32),
        # LayerNorm affine params (PyTorch defaults: ones / zeros)
        "ln1_w": jnp.ones((1, D), jnp.float32),
        "ln1_b": jnp.zeros((1, D), jnp.float32),
        "ln2_w": jnp.ones((1, D), jnp.float32),
        "ln2_b": jnp.zeros((1, D), jnp.float32),
        # Attention: qkv (no bias, qkv_bias=False), out proj (with bias)
        "qkv_wT": init(ks[3], (D, 3 * D)),
        "proj_wT": init(ks[4], (D, D)),
        "proj_b": init(ks[5], (1, D)),
        # MLP
        "fc1_wT": init(ks[6], (D, Hm)),
        "fc1_b": init(ks[7], (1, Hm)),
        "fc2_wT": init(ks[8], (Hm, D)),
        "fc2_b": init(ks[9], (1, D)),
    }

    out = gen_block(x, w, params, num_heads=num_heads)
    out = jax.block_until_ready(out)

    ref = jax.block_until_ready(gen_block_ref(x, w, params, num_heads=num_heads))
    # bf16 matmul inputs + tanh GELU + approx reciprocal give ~1e-3 abs deviation
    # from the exact-f32/erf reference; well within the tolerance below.
    np.testing.assert_allclose(np.asarray(out), np.asarray(ref), rtol=2e-2, atol=2e-2)

    print("KERNEL_OK")
</pallas_src>

<mosaic_0001>
module attributes {stable_mosaic.version = 11 : i64} {
  func.func @genblock_kernel(%arg0: i32, %arg1: memref<4xf32, #tpu.memory_space<smem>>, %arg2: memref<2x16x64xf32, #tpu.memory_space<vmem>>, %arg3: memref<2x1x64xf32, #tpu.memory_space<vmem>>, %arg4: memref<1x64xf32, #tpu.memory_space<vmem>>, %arg5: memref<1x64xf32, #tpu.memory_space<vmem>>, %arg6: memref<8x64x8xbf16, #tpu.memory_space<vmem>>, %arg7: memref<8x64x8xbf16, #tpu.memory_space<vmem>>, %arg8: memref<8x64x8xbf16, #tpu.memory_space<vmem>>, %arg9: memref<8x8x64xbf16, #tpu.memory_space<vmem>>, %arg10: memref<1x64xf32, #tpu.memory_space<vmem>>, %arg11: memref<1x64xf32, #tpu.memory_space<vmem>>, %arg12: memref<1x64xf32, #tpu.memory_space<vmem>>, %arg13: memref<64x256xbf16, #tpu.memory_space<vmem>>, %arg14: memref<1x256xf32, #tpu.memory_space<vmem>>, %arg15: memref<256x64xbf16, #tpu.memory_space<vmem>>, %arg16: memref<1x64xf32, #tpu.memory_space<vmem>>, %arg17: memref<2x16x64xf32, #tpu.memory_space<vmem>>) attributes {dimension_semantics = [#tpu.dimension_semantics<parallel>], iteration_bounds = array<i64: 2>, scalar_prefetch = 0 : i64, scratch_operands = 0 : i64, tpu.core_type = #tpu.core_type<tc>, window_params = [{transform_indices = @transform_0, window_bounds = array<i64: 4>}, {transform_indices = @transform_1, window_bounds = array<i64: 2, 16, 64>}, {transform_indices = @transform_2, window_bounds = array<i64: 2, 1, 64>}, {pipeline_mode = #tpu.pipeline_mode<synchronous>, transform_indices = @transform_3, window_bounds = array<i64: 1, 64>}, {pipeline_mode = #tpu.pipeline_mode<synchronous>, transform_indices = @transform_4, window_bounds = array<i64: 1, 64>}, {pipeline_mode = #tpu.pipeline_mode<synchronous>, transform_indices = @transform_5, window_bounds = array<i64: 8, 64, 8>}, {pipeline_mode = #tpu.pipeline_mode<synchronous>, transform_indices = @transform_6, window_bounds = array<i64: 8, 64, 8>}, {pipeline_mode = #tpu.pipeline_mode<synchronous>, transform_indices = @transform_7, window_bounds = array<i64: 8, 64, 8>}, {pipeline_mode = #tpu.pipeline_mode<synchronous>, transform_indices = @transform_8, window_bounds = array<i64: 8, 8, 64>}, {pipeline_mode = #tpu.pipeline_mode<synchronous>, transform_indices = @transform_9, window_bounds = array<i64: 1, 64>}, {pipeline_mode = #tpu.pipeline_mode<synchronous>, transform_indices = @transform_10, window_bounds = array<i64: 1, 64>}, {pipeline_mode = #tpu.pipeline_mode<synchronous>, transform_indices = @transform_11, window_bounds = array<i64: 1, 64>}, {pipeline_mode = #tpu.pipeline_mode<synchronous>, transform_indices = @transform_12, window_bounds = array<i64: 64, 256>}, {pipeline_mode = #tpu.pipeline_mode<synchronous>, transform_indices = @transform_13, window_bounds = array<i64: 1, 256>}, {pipeline_mode = #tpu.pipeline_mode<synchronous>, transform_indices = @transform_14, window_bounds = array<i64: 256, 64>}, {pipeline_mode = #tpu.pipeline_mode<synchronous>, transform_indices = @transform_15, window_bounds = array<i64: 1, 64>}, {transform_indices = @transform_16, window_bounds = array<i64: 2, 16, 64>}]} {
    %c0 = arith.constant 0 : index
    %c0_0 = arith.constant 0 : index
    %c0_1 = arith.constant 0 : index
    %0 = vector.load %arg2[%c0, %c0_0, %c0_1] : memref<2x16x64xf32, #tpu.memory_space<vmem>>, vector<2x16x64xf32>
    %1 = vector.shape_cast %0 : vector<2x16x64xf32> to vector<32x64xf32>
    %c0_2 = arith.constant 0 : index
    %c0_3 = arith.constant 0 : index
    %c0_4 = arith.constant 0 : index
    %2 = vector.load %arg3[%c0_2, %c0_3, %c0_4] : memref<2x1x64xf32, #tpu.memory_space<vmem>>, vector<2x1x64xf32>
    %3 = vector.shape_cast %2 : vector<2x1x64xf32> to vector<2x1x64xf32>
    %4 = vector.broadcast %3 : vector<2x1x64xf32> to vector<2x16x64xf32>
    %5 = vector.shape_cast %4 : vector<2x16x64xf32> to vector<32x64xf32>
    %c0_5 = arith.constant 0 : index
    %6 = memref.load %arg1[%c0_5] : memref<4xf32, #tpu.memory_space<smem>>
    %c1 = arith.constant 1 : index
    %7 = memref.load %arg1[%c1] : memref<4xf32, #tpu.memory_space<smem>>
    %c2 = arith.constant 2 : index
    %8 = memref.load %arg1[%c2] : memref<4xf32, #tpu.memory_space<smem>>
    %c3 = arith.constant 3 : index
    %9 = memref.load %arg1[%c3] : memref<4xf32, #tpu.memory_space<smem>>
    %10 = vector.broadcast %6 : f32 to vector<32x64xf32>
    %11 = arith.mulf %10, %5 : vector<32x64xf32>
    %c0_6 = arith.constant 0 : index
    %c0_7 = arith.constant 0 : index
    %12 = vector.load %arg4[%c0_6, %c0_7] : memref<1x64xf32, #tpu.memory_space<vmem>>, vector<1x64xf32>
    %c0_8 = arith.constant 0 : index
    %c0_9 = arith.constant 0 : index
    %13 = vector.load %arg5[%c0_8, %c0_9] : memref<1x64xf32, #tpu.memory_space<vmem>>, vector<1x64xf32>
    %cst = arith.constant dense<0.000000e+00> : vector<32xf32>
    %14 = vector.multi_reduction <add>, %1, %cst [1] : vector<32x64xf32> to vector<32xf32>
    %15 = vector.shape_cast %14 : vector<32xf32> to vector<32x1xf32>
    %cst_10 = arith.constant 6.400000e+01 : f32
    %16 = vector.broadcast %cst_10 : f32 to vector<32x1xf32>
    %17 = arith.divf %15, %16 : vector<32x1xf32>
    %18 = vector.broadcast %17 : vector<32x1xf32> to vector<32x64xf32>
    %19 = arith.subf %1, %18 : vector<32x64xf32>
    %20 = arith.mulf %19, %19 : vector<32x64xf32>
    %cst_11 = arith.constant dense<0.000000e+00> : vector<32xf32>
    %21 = vector.multi_reduction <add>, %20, %cst_11 [1] : vector<32x64xf32> to vector<32xf32>
    %22 = vector.shape_cast %21 : vector<32xf32> to vector<32x1xf32>
    %cst_12 = arith.constant 6.400000e+01 : f32
    %23 = vector.broadcast %cst_12 : f32 to vector<32x1xf32>
    %24 = arith.divf %22, %23 : vector<32x1xf32>
    %25 = vector.broadcast %17 : vector<32x1xf32> to vector<32x64xf32>
    %26 = arith.subf %1, %25 : vector<32x64xf32>
    %cst_13 = arith.constant 9.99999974E-6 : f32
    %27 = vector.broadcast %cst_13 : f32 to vector<32x1xf32>
    %28 = arith.addf %24, %27 : vector<32x1xf32>
    %29 = math.rsqrt %28 : vector<32x1xf32>
    %30 = vector.broadcast %29 : vector<32x1xf32> to vector<32x64xf32>
    %31 = arith.mulf %26, %30 : vector<32x64xf32>
    %32 = vector.broadcast %12 : vector<1x64xf32> to vector<32x64xf32>
    %33 = arith.mulf %31, %32 : vector<32x64xf32>
    %34 = vector.broadcast %13 : vector<1x64xf32> to vector<32x64xf32>
    %35 = arith.addf %33, %34 : vector<32x64xf32>
    %36 = arith.mulf %11, %35 : vector<32x64xf32>
    %37 = vector.broadcast %7 : f32 to vector<32x64xf32>
    %38 = arith.mulf %37, %5 : vector<32x64xf32>
    %39 = arith.addf %36, %38 : vector<32x64xf32>
    %40 = arith.truncf %39 : vector<32x64xf32> to vector<32x64xbf16>
    %41 = vector.shape_cast %40 : vector<32x64xbf16> to vector<1x32x64xbf16>
    %42 = vector.shape_cast %41 : vector<1x32x64xbf16> to vector<1x32x64xbf16>
    %43 = vector.broadcast %42 : vector<1x32x64xbf16> to vector<8x32x64xbf16>
    %c0_14 = arith.constant 0 : index
    %c0_15 = arith.constant 0 : index
    %c0_16 = arith.constant 0 : index
    %44 = vector.load %arg6[%c0_14, %c0_15, %c0_16] : memref<8x64x8xbf16, #tpu.memory_space<vmem>>, vector<8x64x8xbf16>
    "tpu.trace_start"() <{level = 10 : i32, message = "hrd,hdf->hrf"}> : () -> ()
    %cst_17 = arith.constant dense<0.000000e+00> : vector<8x32x8xf32>
    %45 = tpu.matmul %43, %44, %cst_17 {dimension_numbers = #tpu.dot_dimension_numbers<[2], [1], [1], [2], [0, 0, 0, 1, 1, 2], [0], [0]>} : vector<8x32x64xbf16>, vector<8x64x8xbf16>, vector<8x32x8xf32> -> vector<8x32x8xf32>
    "tpu.trace_stop"() : () -> ()
    %c0_18 = arith.constant 0 : index
    %c0_19 = arith.constant 0 : index
    %c0_20 = arith.constant 0 : index
    %46 = vector.load %arg7[%c0_18, %c0_19, %c0_20] : memref<8x64x8xbf16, #tpu.memory_space<vmem>>, vector<8x64x8xbf16>
    "tpu.trace_start"() <{level = 10 : i32, message = "hrd,hdf->hrf"}> : () -> ()
    %cst_21 = arith.constant dense<0.000000e+00> : vector<8x32x8xf32>
    %47 = tpu.matmul %43, %46, %cst_21 {dimension_numbers = #tpu.dot_dimension_numbers<[2], [1], [1], [2], [0, 0, 0, 1, 1, 2], [0], [0]>} : vector<8x32x64xbf16>, vector<8x64x8xbf16>, vector<8x32x8xf32> -> vector<8x32x8xf32>
    "tpu.trace_stop"() : () -> ()
    %c0_22 = arith.constant 0 : index
    %c0_23 = arith.constant 0 : index
    %c0_24 = arith.constant 0 : index
    %48 = vector.load %arg8[%c0_22, %c0_23, %c0_24] : memref<8x64x8xbf16, #tpu.memory_space<vmem>>, vector<8x64x8xbf16>
    "tpu.trace_start"() <{level = 10 : i32, message = "hrd,hdf->hrf"}> : () -> ()
    %cst_25 = arith.constant dense<0.000000e+00> : vector<8x32x8xf32>
    %49 = tpu.matmul %43, %48, %cst_25 {dimension_numbers = #tpu.dot_dimension_numbers<[2], [1], [1], [2], [0, 0, 0, 1, 1, 2], [0], [0]>} : vector<8x32x64xbf16>, vector<8x64x8xbf16>, vector<8x32x8xf32> -> vector<8x32x8xf32>
    "tpu.trace_stop"() : () -> ()
    %50 = arith.truncf %45 : vector<8x32x8xf32> to vector<8x32x8xbf16>
    %51 = vector.shape_cast %50 : vector<8x32x8xbf16> to vector<16x16x8xbf16>
    %52 = arith.truncf %47 : vector<8x32x8xf32> to vector<8x32x8xbf16>
    %53 = vector.shape_cast %52 : vector<8x32x8xbf16> to vector<16x16x8xbf16>
    %54 = arith.truncf %49 : vector<8x32x8xf32> to vector<8x32x8xbf16>
    %55 = vector.shape_cast %54 : vector<8x32x8xbf16> to vector<16x16x8xbf16>
    "tpu.trace_start"() <{level = 10 : i32, message = "bnd,bmd->bnm"}> : () -> ()
    %cst_26 = arith.constant dense<0.000000e+00> : vector<16x16x16xf32>
    %56 = tpu.matmul %51, %53, %cst_26 {dimension_numbers = #tpu.dot_dimension_numbers<[2], [2], [1], [1], [0, 0, 0, 1, 1, 1], [0], [0]>} : vector<16x16x8xbf16>, vector<16x16x8xbf16>, vector<16x16x16xf32> -> vector<16x16x16xf32>
    "tpu.trace_stop"() : () -> ()
    %cst_27 = arith.constant dense<0xFF800000> : vector<16x16xf32>
    %57 = vector.multi_reduction <maximumf>, %56, %cst_27 [2] : vector<16x16x16xf32> to vector<16x16xf32>
    %58 = vector.shape_cast %57 : vector<16x16xf32> to vector<16x16x1xf32>
    %59 = vector.broadcast %58 : vector<16x16x1xf32> to vector<16x16x16xf32>
    %60 = arith.subf %56, %59 : vector<16x16x16xf32>
    %61 = math.exp %60 : vector<16x16x16xf32>
    %cst_28 = arith.constant dense<0.000000e+00> : vector<16x16xf32>
    %62 = vector.multi_reduction <add>, %61, %cst_28 [2] : vector<16x16x16xf32> to vector<16x16xf32>
    %63 = vector.shape_cast %62 : vector<16x16xf32> to vector<16x16x1xf32>
    %64 = tpu.reciprocal %63 {approx = true} : vector<16x16x1xf32> -> vector<16x16x1xf32>
    %65 = vector.broadcast %64 : vector<16x16x1xf32> to vector<16x16x16xf32>
    %66 = arith.mulf %61, %65 : vector<16x16x16xf32>
    %67 = arith.truncf %66 : vector<16x16x16xf32> to vector<16x16x16xbf16>
    "tpu.trace_start"() <{level = 10 : i32, message = "bnm,bmd->bnd"}> : () -> ()
    %cst_29 = arith.constant dense<0.000000e+00> : vector<16x16x8xf32>
    %68 = tpu.matmul %67, %55, %cst_29 {dimension_numbers = #tpu.dot_dimension_numbers<[2], [1], [1], [2], [0, 0, 0, 1, 1, 2], [0], [0]>} : vector<16x16x16xbf16>, vector<16x16x8xbf16>, vector<16x16x8xf32> -> vector<16x16x8xf32>
    "tpu.trace_stop"() : () -> ()
    %69 = arith.truncf %68 : vector<16x16x8xf32> to vector<16x16x8xbf16>
    %70 = vector.shape_cast %69 : vector<16x16x8xbf16> to vector<8x32x8xbf16>
    %c0_30 = arith.constant 0 : index
    %c0_31 = arith.constant 0 : index
    %c0_32 = arith.constant 0 : index
    %71 = vector.load %arg9[%c0_30, %c0_31, %c0_32] : memref<8x8x64xbf16, #tpu.memory_space<vmem>>, vector<8x8x64xbf16>
    "tpu.trace_start"() <{level = 10 : i32, message = "hrd,hdf->hrf"}> : () -> ()
    %cst_33 = arith.constant dense<0.000000e+00> : vector<8x32x64xf32>
    %72 = tpu.matmul %70, %71, %cst_33 {dimension_numbers = #tpu.dot_dimension_numbers<[2], [1], [1], [2], [0, 0, 0, 1, 1, 2], [0], [0]>} : vector<8x32x8xbf16>, vector<8x8x64xbf16>, vector<8x32x64xf32> -> vector<8x32x64xf32>
    "tpu.trace_stop"() : () -> ()
    %cst_34 = arith.constant dense<0.000000e+00> : vector<32x64xf32>
    %73 = vector.multi_reduction <add>, %72, %cst_34 [0] : vector<8x32x64xf32> to vector<32x64xf32>
    %c0_35 = arith.constant 0 : index
    %c0_36 = arith.constant 0 : index
    %74 = vector.load %arg10[%c0_35, %c0_36] : memref<1x64xf32, #tpu.memory_space<vmem>>, vector<1x64xf32>
    %75 = vector.broadcast %74 : vector<1x64xf32> to vector<32x64xf32>
    %76 = arith.addf %73, %75 : vector<32x64xf32>
    %77 = arith.addf %1, %76 : vector<32x64xf32>
    %78 = vector.broadcast %8 : f32 to vector<32x64xf32>
    %79 = arith.mulf %78, %5 : vector<32x64xf32>
    %c0_37 = arith.constant 0 : index
    %c0_38 = arith.constant 0 : index
    %80 = vector.load %arg11[%c0_37, %c0_38] : memref<1x64xf32, #tpu.memory_space<vmem>>, vector<1x64xf32>
    %c0_39 = arith.constant 0 : index
    %c0_40 = arith.constant 0 : index
    %81 = vector.load %arg12[%c0_39, %c0_40] : memref<1x64xf32, #tpu.memory_space<vmem>>, vector<1x64xf32>
    %cst_41 = arith.constant dense<0.000000e+00> : vector<32xf32>
    %82 = vector.multi_reduction <add>, %77, %cst_41 [1] : vector<32x64xf32> to vector<32xf32>
    %83 = vector.shape_cast %82 : vector<32xf32> to vector<32x1xf32>
    %cst_42 = arith.constant 6.400000e+01 : f32
    %84 = vector.broadcast %cst_42 : f32 to vector<32x1xf32>
    %85 = arith.divf %83, %84 : vector<32x1xf32>
    %86 = vector.broadcast %85 : vector<32x1xf32> to vector<32x64xf32>
    %87 = arith.subf %77, %86 : vector<32x64xf32>
    %88 = arith.mulf %87, %87 : vector<32x64xf32>
    %cst_43 = arith.constant dense<0.000000e+00> : vector<32xf32>
    %89 = vector.multi_reduction <add>, %88, %cst_43 [1] : vector<32x64xf32> to vector<32xf32>
    %90 = vector.shape_cast %89 : vector<32xf32> to vector<32x1xf32>
    %cst_44 = arith.constant 6.400000e+01 : f32
    %91 = vector.broadcast %cst_44 : f32 to vector<32x1xf32>
    %92 = arith.divf %90, %91 : vector<32x1xf32>
    %93 = vector.broadcast %85 : vector<32x1xf32> to vector<32x64xf32>
    %94 = arith.subf %77, %93 : vector<32x64xf32>
    %cst_45 = arith.constant 9.99999974E-6 : f32
    %95 = vector.broadcast %cst_45 : f32 to vector<32x1xf32>
    %96 = arith.addf %92, %95 : vector<32x1xf32>
    %97 = math.rsqrt %96 : vector<32x1xf32>
    %98 = vector.broadcast %97 : vector<32x1xf32> to vector<32x64xf32>
    %99 = arith.mulf %94, %98 : vector<32x64xf32>
    %100 = vector.broadcast %80 : vector<1x64xf32> to vector<32x64xf32>
    %101 = arith.mulf %99, %100 : vector<32x64xf32>
    %102 = vector.broadcast %81 : vector<1x64xf32> to vector<32x64xf32>
    %103 = arith.addf %101, %102 : vector<32x64xf32>
    %104 = arith.mulf %79, %103 : vector<32x64xf32>
    %105 = vector.broadcast %9 : f32 to vector<32x64xf32>
    %106 = arith.mulf %105, %5 : vector<32x64xf32>
    %107 = arith.addf %104, %106 : vector<32x64xf32>
    %108 = arith.truncf %107 : vector<32x64xf32> to vector<32x64xbf16>
    %c0_46 = arith.constant 0 : index
    %c0_47 = arith.constant 0 : index
    %109 = vector.load %arg13[%c0_46, %c0_47] : memref<64x256xbf16, #tpu.memory_space<vmem>>, vector<64x256xbf16>
    %cst_48 = arith.constant dense<0.000000e+00> : vector<32x256xf32>
    %110 = tpu.matmul %108, %109, %cst_48 {dimension_numbers = #tpu.dot_dimension_numbers<[1], [0], [0], [1], [0, 0, 1, 1], [], []>} : vector<32x64xbf16>, vector<64x256xbf16>, vector<32x256xf32> -> vector<32x256xf32>
    %c0_49 = arith.constant 0 : index
    %c0_50 = arith.constant 0 : index
    %111 = vector.load %arg14[%c0_49, %c0_50] : memref<1x256xf32, #tpu.memory_space<vmem>>, vector<1x256xf32>
    %112 = vector.broadcast %111 : vector<1x256xf32> to vector<32x256xf32>
    %113 = arith.addf %110, %112 : vector<32x256xf32>
    %114 = arith.mulf %113, %113 : vector<32x256xf32>
    %115 = arith.mulf %113, %114 : vector<32x256xf32>
    %cst_51 = arith.constant 4.471500e-02 : f32
    %116 = vector.broadcast %cst_51 : f32 to vector<32x256xf32>
    %117 = arith.mulf %116, %115 : vector<32x256xf32>
    %118 = arith.addf %113, %117 : vector<32x256xf32>
    %cst_52 = arith.constant 0.797884583 : f32
    %119 = vector.broadcast %cst_52 : f32 to vector<32x256xf32>
    %120 = arith.mulf %119, %118 : vector<32x256xf32>
    %121 = math.tanh %120 : vector<32x256xf32>
    %cst_53 = arith.constant 1.000000e+00 : f32
    %122 = vector.broadcast %cst_53 : f32 to vector<32x256xf32>
    %123 = arith.addf %122, %121 : vector<32x256xf32>
    %cst_54 = arith.constant 5.000000e-01 : f32
    %124 = vector.broadcast %cst_54 : f32 to vector<32x256xf32>
    %125 = arith.mulf %124, %123 : vector<32x256xf32>
    %126 = arith.mulf %113, %125 : vector<32x256xf32>
    %127 = arith.truncf %126 : vector<32x256xf32> to vector<32x256xbf16>
    %c0_55 = arith.constant 0 : index
    %c0_56 = arith.constant 0 : index
    %128 = vector.load %arg15[%c0_55, %c0_56] : memref<256x64xbf16, #tpu.memory_space<vmem>>, vector<256x64xbf16>
    %cst_57 = arith.constant dense<0.000000e+00> : vector<32x64xf32>
    %129 = tpu.matmul %127, %128, %cst_57 {dimension_numbers = #tpu.dot_dimension_numbers<[1], [0], [0], [1], [0, 0, 1, 1], [], []>} : vector<32x256xbf16>, vector<256x64xbf16>, vector<32x64xf32> -> vector<32x64xf32>
    %c0_58 = arith.constant 0 : index
    %c0_59 = arith.constant 0 : index
    %130 = vector.load %arg16[%c0_58, %c0_59] : memref<1x64xf32, #tpu.memory_space<vmem>>, vector<1x64xf32>
    %131 = vector.broadcast %130 : vector<1x64xf32> to vector<32x64xf32>
    %132 = arith.addf %129, %131 : vector<32x64xf32>
    %133 = arith.addf %77, %132 : vector<32x64xf32>
    %134 = vector.shape_cast %133 : vector<32x64xf32> to vector<2x16x64xf32>
    %c0_60 = arith.constant 0 : index
    %c0_61 = arith.constant 0 : index
    %c0_62 = arith.constant 0 : index
    %135 = vector.load %arg17[%c0_60, %c0_61, %c0_62] : memref<2x16x64xf32, #tpu.memory_space<vmem>>, vector<2x16x64xf32>
    tpu.vector_store %arg17[%c0_60, %c0_61, %c0_62], %134 {strides = array<i32>} : memref<2x16x64xf32, #tpu.memory_space<vmem>>, vector<2x16x64xf32>,
    return
  }
  func.func @transform_0(%arg0: i32) -> i32 {
    %c0_i32 = arith.constant 0 : i32
    %c0_i32_0 = arith.constant 0 : i32
    return %c0_i32 : i32
  }
  func.func @transform_1(%arg0: i32) -> (i32, i32, i32) {
    %c0_i32 = arith.constant 0 : i32
    %c0_i32_0 = arith.constant 0 : i32
    %c0_i32_1 = arith.constant 0 : i32
    return %arg0, %c0_i32, %c0_i32_0 : i32, i32, i32
  }
  func.func @transform_2(%arg0: i32) -> (i32, i32, i32) {
    %c0_i32 = arith.constant 0 : i32
    %c0_i32_0 = arith.constant 0 : i32
    %c0_i32_1 = arith.constant 0 : i32
    return %arg0, %c0_i32, %c0_i32_0 : i32, i32, i32
  }
  func.func @transform_3(%arg0: i32) -> (i32, i32) {
    %c0_i32 = arith.constant 0 : i32
    %c0_i32_0 = arith.constant 0 : i32
    %c0_i32_1 = arith.constant 0 : i32
    return %c0_i32, %c0_i32_0 : i32, i32
  }
  func.func @transform_4(%arg0: i32) -> (i32, i32) {
    %c0_i32 = arith.constant 0 : i32
    %c0_i32_0 = arith.constant 0 : i32
    %c0_i32_1 = arith.constant 0 : i32
    return %c0_i32, %c0_i32_0 : i32, i32
  }
  func.func @transform_5(%arg0: i32) -> (i32, i32, i32) {
    %c0_i32 = arith.constant 0 : i32
    %c0_i32_0 = arith.constant 0 : i32
    %c0_i32_1 = arith.constant 0 : i32
    %c0_i32_2 = arith.constant 0 : i32
    return %c0_i32, %c0_i32_0, %c0_i32_1 : i32, i32, i32
  }
  func.func @transform_6(%arg0: i32) -> (i32, i32, i32) {
    %c0_i32 = arith.constant 0 : i32
    %c0_i32_0 = arith.constant 0 : i32
    %c0_i32_1 = arith.constant 0 : i32
    %c0_i32_2 = arith.constant 0 : i32
    return %c0_i32, %c0_i32_0, %c0_i32_1 : i32, i32, i32
  }
  func.func @transform_7(%arg0: i32) -> (i32, i32, i32) {
    %c0_i32 = arith.constant 0 : i32
    %c0_i32_0 = arith.constant 0 : i32
    %c0_i32_1 = arith.constant 0 : i32
    %c0_i32_2 = arith.constant 0 : i32
    return %c0_i32, %c0_i32_0, %c0_i32_1 : i32, i32, i32
  }
  func.func @transform_8(%arg0: i32) -> (i32, i32, i32) {
    %c0_i32 = arith.constant 0 : i32
    %c0_i32_0 = arith.constant 0 : i32
    %c0_i32_1 = arith.constant 0 : i32
    %c0_i32_2 = arith.constant 0 : i32
    return %c0_i32, %c0_i32_0, %c0_i32_1 : i32, i32, i32
  }
  func.func @transform_9(%arg0: i32) -> (i32, i32) {
    %c0_i32 = arith.constant 0 : i32
    %c0_i32_0 = arith.constant 0 : i32
    %c0_i32_1 = arith.constant 0 : i32
    return %c0_i32, %c0_i32_0 : i32, i32
  }
  func.func @transform_10(%arg0: i32) -> (i32, i32) {
    %c0_i32 = arith.constant 0 : i32
    %c0_i32_0 = arith.constant 0 : i32
    %c0_i32_1 = arith.constant 0 : i32
    return %c0_i32, %c0_i32_0 : i32, i32
  }
  func.func @transform_11(%arg0: i32) -> (i32, i32) {
    %c0_i32 = arith.constant 0 : i32
    %c0_i32_0 = arith.constant 0 : i32
    %c0_i32_1 = arith.constant 0 : i32
    return %c0_i32, %c0_i32_0 : i32, i32
  }
  func.func @transform_12(%arg0: i32) -> (i32, i32) {
    %c0_i32 = arith.constant 0 : i32
    %c0_i32_0 = arith.constant 0 : i32
    %c0_i32_1 = arith.constant 0 : i32
    return %c0_i32, %c0_i32_0 : i32, i32
  }
  func.func @transform_13(%arg0: i32) -> (i32, i32) {
    %c0_i32 = arith.constant 0 : i32
    %c0_i32_0 = arith.constant 0 : i32
    %c0_i32_1 = arith.constant 0 : i32
    return %c0_i32, %c0_i32_0 : i32, i32
  }
  func.func @transform_14(%arg0: i32) -> (i32, i32) {
    %c0_i32 = arith.constant 0 : i32
    %c0_i32_0 = arith.constant 0 : i32
    %c0_i32_1 = arith.constant 0 : i32
    return %c0_i32, %c0_i32_0 : i32, i32
  }
  func.func @transform_15(%arg0: i32) -> (i32, i32) {
    %c0_i32 = arith.constant 0 : i32
    %c0_i32_0 = arith.constant 0 : i32
    %c0_i32_1 = arith.constant 0 : i32
    return %c0_i32, %c0_i32_0 : i32, i32
  }
  func.func @transform_16(%arg0: i32) -> (i32, i32, i32) {
    %c0_i32 = arith.constant 0 : i32
    %c0_i32_0 = arith.constant 0 : i32
    %c0_i32_1 = arith.constant 0 : i32
    return %arg0, %c0_i32, %c0_i32_0 : i32, i32, i32
  }
}

</mosaic_0001>

<bundles_post_ra>
// kernel: tpu_custom_call.1
= control target key start
LH: loop header
LB: loop body
LE: loop exit
PB: predicated region body
PF: predicated region fallthrough
CT: control target
= control target key end

     0   :  { %s6920_s0 = inlined_call_operand.vmem [shape: f32[4], index: 0, kind: input, shape index: {}]   ;;  %s6921_s1 = inlined_call_operand.vmem [shape: f32[4,16,64], index: 1, kind: input, shape index: {}]   ;;  %s6922_s2 = inlined_call_operand.vmem [shape: f32[4,1,64], index: 2, kind: input, shape index: {}]   ;;  %s6923_s3 = inlined_call_operand.vmem [shape: f32[1,64], index: 3, kind: input, shape index: {}]   ;;  %s6924_s4 = inlined_call_operand.vmem [shape: f32[1,64], index: 4, kind: input, shape index: {}]   ;;  %s6925_s5 = inlined_call_operand.vmem [shape: bf16[8,64,8], index: 5, kind: input, shape index: {}]   ;;  %s6926_s6 = inlined_call_operand.vmem [shape: bf16[8,64,8], index: 6, kind: input, shape index: {}]   ;;  %s6927_s7 = inlined_call_operand.vmem [shape: bf16[8,64,8], index: 7, kind: input, shape index: {}]   ;;  %s6928_s8 = inlined_call_operand.vmem [shape: bf16[8,8,64], index: 8, kind: input, shape index: {}]   ;;  %s6929_s9 = inlined_call_operand.vmem [shape: f32[1,64], index: 9, kind: input, shape index: {}]   ;;  %s6930_s10 = inlined_call_operand.vmem [shape: f32[1,64], index: 10, kind: input, shape index: {}]   ;;  %s6931_s11 = inlined_call_operand.vmem [shape: f32[1,64], index: 11, kind: input, shape index: {}]   ;;  %s6932_s12 = inlined_call_operand.vmem [shape: bf16[64,256], index: 12, kind: input, shape index: {}]   ;;  %s6933_s13 = inlined_call_operand.vmem [shape: f32[1,256], index: 13, kind: input, shape index: {}]   ;;  %s6934_s14 = inlined_call_operand.vmem [shape: bf16[256,64], index: 14, kind: input, shape index: {}]   ;;  %s6935_s15 = inlined_call_operand.vmem [shape: f32[1,64], index: 15, kind: input, shape index: {}]   ;;  %s6936_s16 = inlined_call_operand.hbm [shape: f32[4,16,64], index: 16, kind: output, shape index: {}]  }
   0x1   :  { %6946 = sst [smem:[#allocation16_spill]] %s6920_s0 }
   0x2   :  { %6947 = sst [smem:[#allocation17_spill]] %s6921_s1 }
   0x3   :  { %6948 = sst [smem:[#allocation18_spill]] %s6922_s2 }
   0x4   :  { %21 = vsyncpa [#allocation4], 0 }
   0x5   :  { %22 = vsyncpa [#allocation3], 0 }
   0x6   :  { %24 = vsyncpa [#allocation3 + $0x1], 0  ;;  %s5469_s21 = smov 0   ;;  %s5471_s22 = smov 0  }
   0x7   :  { %s5473_s23 = smov 0   ;;  %s5475_s24 = smov 0  }
   0x8 LB: > { %6949 = sst [smem:[#allocation8_spill]] %s5374_s23  ;;  %s5490_s25 = sadd.s32 4294967295, %s5378_s24   ;;  %s5378_s24 = sphi %s5475_s24, %s6971_s24   ;;  %s5374_s23 = sphi %s5473_s23, %s6973_s23   ;;  %s5370_s22 = sphi %s5471_s22, %s6975_s22   ;;  %s5366_s21 = sphi %s5469_s21, %s6974_s21  }
   0x9   : > { %s4345_s26 = sadd.s32 4294967294, %s5378_s24   ;;  %s5494_s27 = sadd.s32 1, %s5378_s24  }
   0xa   : > { %6950 = sst [smem:[#allocation9_spill]] %s5494_s27  ;;  %s383_s28 = sadd.s32 1, %s5374_s23 }
   0xb   : > { %s380_s29 = ssub.s32 %s5378_s24, %s5494_s27  ;;  %p393_p0 = scmp.ne.s32.totalorder %s5374_s23, %s5370_s22 }
   0xc   : > { %p381_p1 = scmp.eq.s32.totalorder %s380_s29, 0  ;;  %p394_p2 = scmp.eq.s32.totalorder %s5490_s25, 1 }
   0xd   : > { %p399_p3 = scmp.ne.s32.totalorder %s5370_s22, %s5366_s21  ;;  %p400_p4 = scmp.eq.s32.totalorder %s4345_s26, 1 }
   0xe   : > { %s5505_s30 = scalar_select %p381_p1, %s5374_s23, %s383_s28  }
   0xf   : > { %p5507_p5 = por %p394_p2, %p393_p0  ;;  %p5511_p6 = por %p400_p4, %p399_p3 }
  0x10   : > { %6951 = sst [smem:[#allocation10_spill]] %s5505_s30  ;;  %p4346_p7 = scmp.ge.s32.totalorder %s5378_s24, 1 }
  0x11   : > { %s6953_s17 = scalar_select %p5511_p6, 1, 0 }
  0x12   : > { %p407_p8 = scmp.lt.s32.totalorder %s5378_s24, 3  ;;  %p5082_p9 = scmp.eq.s32.totalorder %s5490_s25, 0 }
  0x13   : > { %6954 = sst [smem:[#allocation11_spill]] %s6953_s17  ;;  %s5380_s26 = smov [#allocation2]  }
  0x14   : > { %p408_p10 = pnand %p4346_p7, %p407_p8  ;;  %s6955_s20 = sld [smem:[#allocation16_spill]] }
  0x16   : > { %p5074_p11 = pneg %p408_p10 }
  0x17   : > { %489 = sbr.rel (%p408_p10) target bundleno = 1903 (0x76f), region = 84 }
  0x18   : > { %p5075_p12 = pnand %p5082_p9, %p5074_p11 }
  0x1a   : > { %s419_s29 = sshll.u32 %s6955_s20, 4  ;;  %s420_s29 = int_to_ptr.vmem [resolvable:$true] %s419_s29 }
  0x1b   : > { %5077 = dma.vmem_to_smem (!%p5075_p12), %s420_s29, 16, %s5380_s26, [#allocation4]  }
  0x1c   : > { %5357 = dma.done.wait (%p5082_p9), [#allocation4], 16  }
  0x1d   : > { %5359 = vsyncadd (%p5082_p9), [#allocation4], 4294967280 }
  0x1e   : > { %496 = sfence }
  0x1f   : > { %s4352_s28 = sshll.u32 %s5490_s25, 1  ;;  %s6956_s2 = sld [smem:[#allocation18_spill]]  ;;  %vm581_vm0 = vcmask 523264   ;;  %v5381_v8 = vmov 64.0   ;;  %v4949_v35 = vld [vmem:[%s6925_s5 + $0x18] sm:$0xff]  ;;  %v4948_v45 = vld [vmem:[%s6925_s5 + $0x10] sm:$0xff] }
  0x20   : > { %p547_p13 = scmp.lt.s32.totalorder %s4352_s28, 3  ;;  %s6957_s1 = sld [smem:[#allocation17_spill]]  ;;  %5129 = vrcp.f32 %v5381_v8  ;;  %v4953_v36 = vld [vmem:[%s6925_s5 + $0x38] sm:$0xff]  ;;  %814 = vmatpush.bf16.msra.mxu0 %v4949_v35  ;;  %v4952_v46 = vld [vmem:[%s6925_s5 + $0x30] sm:$0xff]  ;;  %v4947_v49 = vld [vmem:[%s6925_s5 + $0x8] sm:$0xff]  ;;  %vm2052_vm14 = vcmask 64512  }
  0x21   : > { %v4957_v37 = vld [vmem:[%s6925_s5 + $0x58] sm:$0xff]  ;;  %857 = vmatpush.bf16.msra.mxu1 %v4953_v36  ;;  %v4956_v47 = vld [vmem:[%s6925_s5 + $0x50] sm:$0xff]  ;;  %v4951_v50 = vld [vmem:[%s6925_s5 + $0x28] sm:$0xff]  ;;  %s5625_s23 = sld [smem:[#allocation2]]  ;;  %vm2523_vm15 = vcmask 130048  }
  0x22   : > { %s6977_s28 = smov (!%p547_p13, %s4352_s28), 3  ;;  %v4961_v40 = vld [vmem:[%s6925_s5 + $0x78] sm:$0xff]  ;;  %900 = vmatpush.bf16.msra.mxu2 %v4957_v37  ;;  %v4960_v48 = vld [vmem:[%s6925_s5 + $0x70] sm:$0xff]  ;;  %v4955_v51 = vld [vmem:[%s6925_s5 + $0x48] sm:$0xff]  ;;  %s5628_s27 = sld [smem:[#allocation2 + $0x1]] }
  0x23   : > { %s4945_s30 = sshll.u32 %s6977_s28, 4  ;;  %943 = vmatpush.bf16.msra.mxu3 %v4961_v40  ;;  %v4959_v54 = vld [vmem:[%s6925_s5 + $0x68] sm:$0xff]  ;;  %v4946_v60 = vld [vmem:[%s6925_s5] sm:$0xff]  ;;  %s6771_s29 = sld [smem:[#allocation2 + $0x2]] }
  0x24   : > { %815 = vmatpush.bf16.msra.mxu0 %v4948_v45  ;;  %v4950_v61 = vld [vmem:[%s6925_s5 + $0x20] sm:$0xff]  ;;  %v4969_v45 = vld [vmem:[%s6925_s5 + $0xb8] sm:$0xff]  ;;  %v4991_v37 = vld [vmem:[%s6926_s6 + $0x68] sm:$0xff] }
  0x25   : > { %s5525_s17 = scalar_lea.vmem %s6956_s2, %s6977_s28  ;;  %858 = vmatpush.bf16.msra.mxu1 %v4952_v46  ;;  %v4973_v46 = vld [vmem:[%s6925_s5 + $0xd8] sm:$0xff]  ;;  %s6777_s28 = sld [smem:[#allocation2 + $0x3]] }
  0x26   : > { %s5530_s20 = scalar_lea.vmem %s6957_s1, %s4945_s30  ;;  %v5130_v9 = vpop.eup %5129  ;;  %901 = vmatpush.bf16.msra.mxu2 %v4956_v47 }
  0x27   : > { %v562_v0 = vld [vmem:[%s5530_s20 + $0x10] sm:$0xff]  ;;  %v560_v1 = vld [vmem:[%s5530_s20] sm:$0xff]  ;;  %v563_v4 = vld [vmem:[%s5530_s20 + $0x18] sm:$0xff]  ;;  %v595_v10 = vmul.f32 64.0, %v5130_v9  ;;  %vm599_vm1 = vweird.f32 %v5130_v9  ;;  %944 = vmatpush.bf16.msra.mxu3 %v4960_v48 }
  0x28   : > { %v588_v2 = vsel %vm581_vm0, %v562_v0, 0.0  ;;  %v582_v3 = vsel %vm581_vm0, %v560_v1, 0.0  ;;  %v561_v5 = vld [vmem:[%s5530_s20 + $0x8] sm:$0xff]  ;;  %v591_v6 = vsel %vm581_vm0, %v563_v4, 0.0  ;;  %816 = vmatpush.bf16.msra.mxu0 %v4947_v49  ;;  %v695_v35 = vstv %s5628_s27 }
  0x29   : > { %589 = vadd.xlane.f32.xlu1 %v588_v2  ;;  %583 = vadd.xlane.f32.xlu0 %v582_v3  ;;  %v585_v7 = vsel %vm581_vm0, %v561_v5, 0.0  ;;  %v596_v11 = vsub.f32 1.0, %v595_v10 }
  0x2a   : > { %859 = vmatpush.bf16.msra.mxu1 %v4951_v50  ;;  %902 = vmatpush.bf16.msra.mxu2 %v4955_v51  ;;  %v4964_v50 = vld [vmem:[%s6925_s5 + $0x90] sm:$0xff] }
  0x2b   : > { %v597_v12 = vmul.f32 %v5130_v9, %v596_v11  ;;  %945 = vmatpush.bf16.msra.mxu3 %v4959_v54  ;;  %v5633_v11 = vld [vmem:[%s6923_s3] ss:$0 sm:$0xff]  ;;  %v4968_v51 = vld [vmem:[%s6925_s5 + $0xb0] sm:$0xff] }
  0x2c   : > { %817 = vmatpush.bf16.msra.mxu0 %v4946_v60  ;;  %v4975_v60 = vld [vmem:[%s6925_s5 + $0xe8] sm:$0xff] }
  0x2d   : > { %v598_v13 = vadd.f32 %v5130_v9, %v597_v12 }
  0x2e   : > { %860 = vmatpush.bf16.msra.mxu1 %v4950_v61  ;;  %v5122_v61 = vld [vmem:[%s5525_s17 + $0x1] ss:$0 sm:$0xff] }
  0x2f   : > { %v5540_v14 = vsel %vm599_vm1, %v5130_v9, %v598_v13  ;;  %vm3412_vm1 = vcmask 1043456  }
  0x30   : > { %6958 = vst [vmem:[#allocation12_spill] sm:$0xff] %v5540_v14 }
  0x31   : > { %592 = vadd.xlane.f32.xlu1 %v591_v6  ;;  %586 = vadd.xlane.f32.xlu0 %v585_v7 }
  0x32   : > { %1029 = vmatpush.bf16.msrb.mxu1 %v4969_v45  ;;  %v5009_v45 = vld [vmem:[%s6926_s6 + $0xf8] sm:$0xff] }
  0x36   : > { %1030 = vmatpush.bf16.msrb.mxu1 %v4968_v51  ;;  %v5003_v51 = vld [vmem:[%s6926_s6 + $0xc8] sm:$0xff] }
  0x9c   : > { %v590_v15 = vpop.xlane.xlu1 %589  ;;  %v584_v16 = vpop.xlane.xlu0 %583 }
  0x9d   : > { %v603_v17 = vmul.f32 %v5540_v14, %v590_v15  ;;  %v601_v18 = vmul.f32 %v5540_v14, %v584_v16 }
  0x9f   : > { %v5544_v19 = vsub.f32 %v562_v0, %v603_v17  ;;  %v5546_v20 = vsub.f32 %v560_v1, %v601_v18  ;;  %v4954_v0 = vld [vmem:[%s6925_s5 + $0x40] sm:$0xff] }
  0xa0   : > { %v4958_v1 = vld [vmem:[%s6925_s5 + $0x60] sm:$0xff]  ;;  %903 = vmatpush.bf16.msra.mxu2 %v4954_v0 }
  0xa1   : > { %v611_v21 = vmul.f32 %v5544_v19, %v5544_v19  ;;  %v609_v22 = vmul.f32 %v5546_v20, %v5546_v20  ;;  %946 = vmatpush.bf16.msra.mxu3 %v4958_v1 }
  0xa3   : > { %v619_v23 = vsel %vm581_vm0, %v611_v21, 0.0  ;;  %v613_v24 = vsel %vm581_vm0, %v609_v22, 0.0  ;;  %v5121_v21 = vld [vmem:[%s5525_s17] ss:$0 sm:$0xff]  ;;  %v576_v22 = vstv %s5625_s23  ;;  %s543_s23 = sand.u32 1, %s5370_s22  }
  0xa4   : > { %v593_v25 = vpop.xlane.xlu1 %592  ;;  %620 = vadd.xlane.f32.xlu0 %v619_v23  ;;  %614 = vadd.xlane.f32.xlu2 %v613_v24  ;;  %v587_v26 = vpop.xlane.xlu0 %586  ;;  %v5641_v23 = vld [vmem:[%s6924_s4] ss:$0 sm:$0xff]  ;;  %s4351_s27 = sshll.u32 %s543_s23, 5 }
  0xa5   : > { %v604_v27 = vmul.f32 %v5540_v14, %v593_v25  ;;  %v602_v28 = vmul.f32 %v5540_v14, %v587_v26  ;;  %1072 = vmatpush.bf16.msrb.mxu2 %v4973_v46  ;;  %v4996_v46 = vld [vmem:[%s6926_s6 + $0x90] sm:$0xff]  ;;  %s545_s18 = scalar_lea.vmem [#allocation5], %s4351_s27 }
  0xa7   : > { %v5556_v29 = vsub.f32 %v563_v4, %v604_v27  ;;  %v5558_v30 = vsub.f32 %v561_v5, %v602_v28 }
  0xa9   : > { %v612_v31 = vmul.f32 %v5556_v29, %v5556_v29  ;;  %v610_v32 = vmul.f32 %v5558_v30, %v5558_v30 }
  0xab   : > { %v622_v33 = vsel %vm581_vm0, %v612_v31, 0.0  ;;  %v616_v34 = vsel %vm581_vm0, %v610_v32, 0.0  ;;  %v577_v31 = vmul.f32 %v5121_v21, %v576_v22 }
  0xac   : > { %623 = vadd.xlane.f32.xlu1 %v622_v33  ;;  %617 = vadd.xlane.f32.xlu2 %v616_v34  ;;  %v4979_v34 = vld [vmem:[%s6926_s6 + $0x8] sm:$0xff] }
 0x117   : > { %v615_v38 = vpop.xlane.xlu2 %614  ;;  %v621_v39 = vpop.xlane.xlu0 %620 }
 0x118   : > { %v625_v41 = vmul.f32 %v615_v38, %v5540_v14  ;;  %v627_v42 = vmul.f32 %v621_v39, %v5540_v14 }
 0x11a   : > { %v629_v43 = vadd.f32 1e-05, %v625_v41  ;;  %v5580_v44 = vadd.f32 1e-05, %v627_v42  ;;  %v696_v41 = vmul.f32 %v5121_v21, %v695_v35 }
 0x11c   : > { %5131 = vrsqrt.f32 %v629_v43  ;;  %vm639_vm3 = vweird.f32 %v629_v43  ;;  %vm659_vm7 = vweird.f32 %v5580_v44 }
 0x11d   : > { %5133 = vrsqrt.f32 %v5580_v44 }
 0x11f   : > { %v624_v52 = vpop.xlane.xlu1 %623  ;;  %v618_v53 = vpop.xlane.xlu2 %617 }
 0x120   : > { %v628_v55 = vmul.f32 %v624_v52, %v5540_v14  ;;  %v626_v56 = vmul.f32 %v618_v53, %v5540_v14  ;;  %v4972_v52 = vld [vmem:[%s6925_s5 + $0xd0] sm:$0xff] }
 0x121   : > { %1073 = vmatpush.bf16.msrb.mxu2 %v4972_v52  ;;  %v5007_v52 = vld [vmem:[%s6926_s6 + $0xe8] sm:$0xff] }
 0x122   : > { %v5132_v57 = vpop.eup %5131  ;;  %v632_v58 = vadd.f32 1e-05, %v628_v55  ;;  %v630_v59 = vadd.f32 1e-05, %v626_v56 }
 0x123   : > { %v5615_v62 = vpop.eup %5133  ;;  %v634_v63 = vmul.f32 %v5132_v57, %v629_v43  ;;  %vm640_vm2 = vweird.f32 %v5132_v57 }
 0x124   : > { %v654_v2 = vmul.f32 %v5615_v62, %v5580_v44  ;;  %5135 = vrsqrt.f32 %v632_v58  ;;  %vm641_vm4 = vmor %vm639_vm3, %vm640_vm2  ;;  %vm669_vm5 = vweird.f32 %v632_v58  ;;  %vm660_vm8 = vweird.f32 %v5615_v62  ;;  %v4965_v44 = vld [vmem:[%s6925_s5 + $0x98] sm:$0xff] }
 0x125   : > { %v635_v3 = vmul.f32 %v5132_v57, %v634_v63  ;;  %5137 = vrsqrt.f32 %v630_v59  ;;  %vm5655_vm11 = vmor %vm659_vm7, %vm660_vm8  ;;  %vm649_vm12 = vweird.f32 %v630_v59  ;;  %986 = vmatpush.bf16.msrb.mxu0 %v4965_v44  ;;  %v5005_v44 = vld [vmem:[%s6926_s6 + $0xd8] sm:$0xff] }
 0x126   : > { %v655_v5 = vmul.f32 %v5615_v62, %v654_v2 }
 0x127   : > { %v636_v4 = vmul.f32 0.5, %v635_v3  ;;  %v4962_v3 = vld [vmem:[%s6925_s5 + $0x80] sm:$0xff] }
 0x128   : > { %v656_v12 = vmul.f32 0.5, %v655_v5  ;;  %v4970_v5 = vld [vmem:[%s6925_s5 + $0xc0] sm:$0xff] }
 0x129   : > { %v637_v6 = vsub.f32 1.5, %v636_v4  ;;  %987 = vmatpush.bf16.msrb.mxu0 %v4964_v50  ;;  %v4966_v4 = vld [vmem:[%s6925_s5 + $0xa0] sm:$0xff]  ;;  %v4999_v50 = vld [vmem:[%s6926_s6 + $0xa8] sm:$0xff] }
 0x12a   : > { %v5136_v7 = vpop.eup %5135  ;;  %v657_v26 = vsub.f32 1.5, %v656_v12 }
 0x12b   : > { %v5138_v8 = vpop.eup %5137  ;;  %v638_v9 = vmul.f32 %v5132_v57, %v637_v6  ;;  %v664_v10 = vmul.f32 %v5136_v7, %v632_v58  ;;  %vm670_vm6 = vweird.f32 %v5136_v7  ;;  %v4963_v58 = vld [vmem:[%s6925_s5 + $0x88] sm:$0xff]  ;;  %v4974_v6 = vld [vmem:[%s6925_s5 + $0xe0] sm:$0xff] }
 0x12c   : > { %v644_v13 = vmul.f32 %v5138_v8, %v630_v59  ;;  %vm650_vm9 = vweird.f32 %v5138_v8  ;;  %vm5649_vm10 = vmor %vm669_vm5, %vm670_vm6  ;;  %v658_v36 = vmul.f32 %v5615_v62, %v657_v26  ;;  %v4967_v59 = vld [vmem:[%s6925_s5 + $0xa8] sm:$0xff]  ;;  %v4985_v26 = vld [vmem:[%s6926_s6 + $0x38] sm:$0xff] }
 0x12d   : > { %v642_v15 = vsel %vm641_vm4, %v5132_v57, %v638_v9  ;;  %v665_v16 = vmul.f32 %v5136_v7, %v664_v10  ;;  %vm651_vm13 = vmor %vm649_vm12, %vm650_vm9  ;;  %988 = vmatpush.bf16.msrb.mxu0 %v4963_v58  ;;  %1031 = vmatpush.bf16.msrb.mxu1 %v4967_v59  ;;  %v5021_v58 = vld [vmem:[%s6927_s7 + $0x58] sm:$0xff] }
 0x12e   : > { %v673_v17 = vmul.f32 %v642_v15, %v5546_v20  ;;  %v645_v18 = vmul.f32 %v5138_v8, %v644_v13  ;;  %v662_v47 = vsel %vm5655_vm11, %v5615_v62, %v658_v36  ;;  %v697_v13 = vmul.f32 %v5122_v61, %v695_v35  ;;  %v4983_v35 = vld [vmem:[%s6926_s6 + $0x28] sm:$0xff]  ;;  %v5025_v59 = vld [vmem:[%s6927_s7 + $0x78] sm:$0xff] }
 0x12f   : > { %v666_v24 = vmul.f32 0.5, %v665_v16  ;;  %v675_v54 = vmul.f32 %v662_v47, %v5544_v19  ;;  %v4971_v19 = vld [vmem:[%s6925_s5 + $0xc8] sm:$0xff]  ;;  %v5000_v47 = vld [vmem:[%s6926_s6 + $0xb0] sm:$0xff] }
 0x130   : > { %v680_v25 = vmul.f32 %v5633_v11, %v673_v17  ;;  %v646_v27 = vmul.f32 0.5, %v645_v18  ;;  %1074 = vmatpush.bf16.msrb.mxu2 %v4971_v19  ;;  %v4987_v36 = vld [vmem:[%s6926_s6 + $0x48] sm:$0xff]  ;;  %v5012_v19 = vld [vmem:[%s6927_s7 + $0x10] sm:$0xff] }
 0x131   : > { %v667_v20 = vsub.f32 1.5, %v666_v24  ;;  %v682_v63 = vmul.f32 %v5633_v11, %v675_v54  ;;  %989 = vmatpush.bf16.msrb.mxu0 %v4962_v3  ;;  %1032 = vmatpush.bf16.msrb.mxu1 %v4966_v4  ;;  %v5002_v54 = vld [vmem:[%s6926_s6 + $0xc0] sm:$0xff] }
 0x132   : > { %v647_v28 = vsub.f32 1.5, %v646_v27  ;;  %v687_v32 = vadd.f32 %v5641_v23, %v680_v25  ;;  %v4981_v25 = vld [vmem:[%s6926_s6 + $0x18] sm:$0xff]  ;;  %v5010_v3 = vld [vmem:[%s6927_s7] sm:$0xff] }
 0x133   : > { %v668_v33 = vmul.f32 %v5136_v7, %v667_v20  ;;  %v689_v9 = vadd.f32 %v5641_v23, %v682_v63  ;;  %v4989_v27 = vld [vmem:[%s6926_s6 + $0x58] sm:$0xff]  ;;  %v5011_v63 = vld [vmem:[%s6927_s7 + $0x8] sm:$0xff]  ;;  %v5014_v4 = vld [vmem:[%s6927_s7 + $0x20] sm:$0xff] }
 0x134   : > { %v648_v38 = vmul.f32 %v5138_v8, %v647_v28  ;;  %v691_v42 = vmul.f32 %v687_v32, %v577_v31  ;;  %1075 = vmatpush.bf16.msrb.mxu2 %v4970_v5  ;;  %v4993_v20 = vld [vmem:[%s6926_s6 + $0x78] sm:$0xff]  ;;  %v4980_v28 = vld [vmem:[%s6926_s6 + $0x10] sm:$0xff]  ;;  %v5018_v5 = vld [vmem:[%s6927_s7 + $0x40] sm:$0xff] }
 0x135   : > { %v672_v39 = vsel %vm5649_vm10, %v5136_v7, %v668_v33  ;;  %v4988_v32 = vld [vmem:[%s6926_s6 + $0x50] sm:$0xff] }
 0x136   : > { %v652_v40 = vsel %vm651_vm13, %v5138_v8, %v648_v38  ;;  %v676_v48 = vmul.f32 %v672_v39, %v5556_v29  ;;  %v4976_v29 = vld [vmem:[%s6925_s5 + $0xf0] sm:$0xff]  ;;  %v698_v53 = vadd.f32 %v696_v41, %v691_v42  ;;  %v578_v8 = vmul.f32 %v5122_v61, %v576_v22  ;;  %v4978_v38 = vld [vmem:[%s6926_s6] sm:$0xff]  ;;  %v4997_v42 = vld [vmem:[%s6926_s6 + $0x98] sm:$0xff] }
 0x137   : > { %v674_v43 = vmul.f32 %v652_v40, %v5558_v30  ;;  %v4977_v30 = vld [vmem:[%s6925_s5 + $0xf8] sm:$0xff]  ;;  %v4992_v33 = vld [vmem:[%s6926_s6 + $0x70] sm:$0xff]  ;;  %v4982_v39 = vld [vmem:[%s6926_s6 + $0x20] sm:$0xff] }
 0x138   : > { %1115 = vmatpush.bf16.msrb.mxu3 %v4977_v30  ;;  %v683_v56 = vmul.f32 %v5633_v11, %v676_v48  ;;  %v702_v62 = vpack.c.bf16 %v698_v53, %v698_v53  ;;  %v693_v15 = vmul.f32 %v689_v9, %v578_v8  ;;  %v4986_v40 = vld [vmem:[%s6926_s6 + $0x40] sm:$0xff]  ;;  %v5004_v30 = vld [vmem:[%s6926_s6 + $0xd0] sm:$0xff]  ;;  %v5037_v9 = vld [vmem:[%s6927_s7 + $0xd8] sm:$0xff] }
 0x139   : > { %v681_v49 = vmul.f32 %v5633_v11, %v674_v43  ;;  %v5001_v43 = vld [vmem:[%s6926_s6 + $0xb8] sm:$0xff]  ;;  %v5008_v48 = vld [vmem:[%s6926_s6 + $0xf0] sm:$0xff]  ;;  %v4998_v53 = vld [vmem:[%s6926_s6 + $0xa0] sm:$0xff] }
 0x13a   : > { %v690_v1 = vadd.f32 %v5641_v23, %v683_v56  ;;  %v774_v7 = vunpack.c.l.b16 %v702_v62  ;;  %v700_v17 = vadd.f32 %v697_v13, %v693_v15  ;;  %v5013_v56 = vld [vmem:[%s6927_s7 + $0x18] sm:$0xff]  ;;  %v5020_v61 = vld [vmem:[%s6927_s7 + $0x50] sm:$0xff] }
 0x13b   : > { %v688_v55 = vadd.f32 %v5641_v23, %v681_v49  ;;  %v4995_v49 = vld [vmem:[%s6926_s6 + $0x88] sm:$0xff]  ;;  %v5024_v62 = vld [vmem:[%s6927_s7 + $0x70] sm:$0xff] }
 0x13c   : > { %1116 = vmatpush.bf16.msrb.mxu3 %v4976_v29  ;;  %v694_v11 = vmul.f32 %v690_v1, %v578_v8  ;;  %v704_v21 = vpack.c.bf16 %v700_v17, %v700_v17  ;;  %v4994_v29 = vld [vmem:[%s6926_s6 + $0x80] sm:$0xff]  ;;  %v5019_v1 = vld [vmem:[%s6927_s7 + $0x48] sm:$0xff]  ;;  %v5033_v8 = vld [vmem:[%s6927_s7 + $0xb8] sm:$0xff] }
 0x13d   : > { %v692_v57 = vmul.f32 %v688_v55, %v577_v31  ;;  %v4984_v31 = vld [vmem:[%s6926_s6 + $0x30] sm:$0xff]  ;;  %v5006_v55 = vld [vmem:[%s6926_s6 + $0xe0] sm:$0xff]  ;;  %v5027_v17 = vld [vmem:[%s6927_s7 + $0x88] sm:$0xff] }
 0x13e   : > { %v701_v16 = vadd.f32 %v697_v13, %v694_v11  ;;  %v776_v23 = vunpack.c.l.b16 %v704_v21  ;;  %v5028_v11 = vld [vmem:[%s6927_s7 + $0x90] sm:$0xff]  ;;  %v5035_v21 = vld [vmem:[%s6927_s7 + $0xc8] sm:$0xff] }
 0x13f   : > { %v699_v0 = vadd.f32 %v696_v41, %v692_v57  ;;  %v4990_v41 = vld [vmem:[%s6926_s6 + $0x60] sm:$0xff]  ;;  %v5017_v57 = vld [vmem:[%s6927_s7 + $0x38] sm:$0xff]  ;;  %v5032_v13 = vld [vmem:[%s6927_s7 + $0xb0] sm:$0xff] }
 0x140   : > { %1117 = vmatpush.bf16.msrb.mxu3 %v4975_v60  ;;  %v705_v18 = vpack.c.bf16 %v701_v16, %v701_v16  ;;  %v5016_v60 = vld [vmem:[%s6927_s7 + $0x30] sm:$0xff] }
 0x141   : > { %v703_v2 = vpack.c.bf16 %v699_v0, %v699_v0  ;;  %v5015_v0 = vld [vmem:[%s6927_s7 + $0x28] sm:$0xff]  ;;  %v5036_v15 = vld [vmem:[%s6927_s7 + $0xd0] sm:$0xff] }
 0x142   : > { %v777_v22 = vunpack.c.l.b16 %v705_v18  ;;  %v5040_v16 = vld [vmem:[%s6927_s7 + $0xf0] sm:$0xff]  ;;  %v5031_v18 = vld [vmem:[%s6927_s7 + $0xa8] sm:$0xff] }
 0x143   : > { %v775_v10 = vunpack.c.l.b16 %v703_v2  ;;  %v5023_v2 = vld [vmem:[%s6927_s7 + $0x68] sm:$0xff] }
 0x144   : > { %1118 = vmatpush.bf16.msrb.mxu3 %v4974_v6  ;;  %v5738_v24 = vpack.c.b16 %v777_v22, %v776_v23  ;;  %v5022_v6 = vld [vmem:[%s6927_s7 + $0x60] sm:$0xff]  ;;  %v5039_v22 = vld [vmem:[%s6927_s7 + $0xe8] sm:$0xff] }
 0x145   : > { %v5726_v12 = vpack.c.b16 %v775_v10, %v774_v7  ;;  %v5029_v7 = vld [vmem:[%s6927_s7 + $0x98] sm:$0xff]  ;;  %v5026_v23 = vld [vmem:[%s6927_s7 + $0x80] sm:$0xff] }
 0x146   : > { %v5041_v10 = vld [vmem:[%s6927_s7 + $0xf8] sm:$0xff] }
 0x147   : > { %4375 = vmatmul.msk.bf16.vlgmr.msra.gmra.mxu0 %vm581_vm0, %v5726_v12  ;;  %4393 = vmatmul.msk.bf16.vlgmr.msra.gmra.mxu1 %vm581_vm0, %v5726_v12 }
 0x148   : > { %4411 = vmatmul.msk.bf16.vlgmr.msra.gmra.mxu2 %vm581_vm0, %v5726_v12  ;;  %4429 = vmatmul.msk.bf16.vlgmr.msra.gmra.mxu3 %vm581_vm0, %v5726_v12 }
 0x149   : > { %1222 = vmatpush.bf16.msra.mxu0 %v4981_v25  ;;  %1265 = vmatpush.bf16.msra.mxu1 %v4985_v26  ;;  %v5030_v25 = vld [vmem:[%s6927_s7 + $0xa0] sm:$0xff] }
 0x14a   : > { %1308 = vmatpush.bf16.msra.mxu2 %v4989_v27  ;;  %1351 = vmatpush.bf16.msra.mxu3 %v4993_v20  ;;  %v5034_v26 = vld [vmem:[%s6927_s7 + $0xc0] sm:$0xff] }
 0x14d   : > { %1223 = vmatpush.bf16.msra.mxu0 %v4980_v28  ;;  %1266 = vmatpush.bf16.msra.mxu1 %v4984_v31  ;;  %v5038_v28 = vld [vmem:[%s6927_s7 + $0xe0] sm:$0xff] }
 0x14e   : > { %1309 = vmatpush.bf16.msra.mxu2 %v4988_v32  ;;  %1352 = vmatpush.bf16.msra.mxu3 %v4992_v33 }
 0x151   : > { %1224 = vmatpush.bf16.msra.mxu0 %v4979_v34  ;;  %1267 = vmatpush.bf16.msra.mxu1 %v4983_v35 }
 0x152   : > { %1310 = vmatpush.bf16.msra.mxu2 %v4987_v36  ;;  %1353 = vmatpush.bf16.msra.mxu3 %v4991_v37 }
 0x155   : > { %1225 = vmatpush.bf16.msra.mxu0 %v4978_v38  ;;  %1268 = vmatpush.bf16.msra.mxu1 %v4982_v39 }
 0x156   : > { %1311 = vmatpush.bf16.msra.mxu2 %v4986_v40  ;;  %1354 = vmatpush.bf16.msra.mxu3 %v4990_v41 }
 0x157   : > { %4376 = vmatmul.msk.bf16.gmra.mxu0 %vm581_vm0, %v5738_v24  ;;  %4394 = vmatmul.msk.bf16.gmra.mxu1 %vm581_vm0, %v5738_v24 }
 0x158   : > { %4412 = vmatmul.msk.bf16.gmra.mxu2 %vm581_vm0, %v5738_v24  ;;  %4430 = vmatmul.msk.bf16.gmra.mxu3 %vm581_vm0, %v5738_v24 }
 0x167   : > { %4447 = vmatmul.msk.bf16.vlgmr.msrb.gmra.mxu0 %vm581_vm0, %v5726_v12  ;;  %4465 = vmatmul.msk.bf16.vlgmr.msrb.gmra.mxu1 %vm581_vm0, %v5726_v12 }
 0x168   : > { %4483 = vmatmul.msk.bf16.vlgmr.msrb.gmra.mxu2 %vm581_vm0, %v5726_v12  ;;  %4501 = vmatmul.msk.bf16.vlgmr.msrb.gmra.mxu3 %vm581_vm0, %v5726_v12 }
 0x169   : > { %1394 = vmatpush.bf16.msrb.mxu0 %v4997_v42  ;;  %1437 = vmatpush.bf16.msrb.mxu1 %v5001_v43 }
 0x16a   : > { %1480 = vmatpush.bf16.msrb.mxu2 %v5005_v44  ;;  %1523 = vmatpush.bf16.msrb.mxu3 %v5009_v45 }
 0x16d   : > { %1395 = vmatpush.bf16.msrb.mxu0 %v4996_v46  ;;  %1438 = vmatpush.bf16.msrb.mxu1 %v5000_v47 }
 0x16e   : > { %1481 = vmatpush.bf16.msrb.mxu2 %v5004_v30  ;;  %1524 = vmatpush.bf16.msrb.mxu3 %v5008_v48 }
 0x171   : > { %1396 = vmatpush.bf16.msrb.mxu0 %v4995_v49  ;;  %1439 = vmatpush.bf16.msrb.mxu1 %v4999_v50 }
 0x172   : > { %1482 = vmatpush.bf16.msrb.mxu2 %v5003_v51  ;;  %1525 = vmatpush.bf16.msrb.mxu3 %v5007_v52 }
 0x175   : > { %1397 = vmatpush.bf16.msrb.mxu0 %v4994_v29  ;;  %1440 = vmatpush.bf16.msrb.mxu1 %v4998_v53 }
 0x176   : > { %1483 = vmatpush.bf16.msrb.mxu2 %v5002_v54  ;;  %1526 = vmatpush.bf16.msrb.mxu3 %v5006_v55 }
 0x177   : > { %4448 = vmatmul.msk.bf16.gmra.mxu0 %vm581_vm0, %v5738_v24  ;;  %4466 = vmatmul.msk.bf16.gmra.mxu1 %vm581_vm0, %v5738_v24 }
 0x178   : > { %4484 = vmatmul.msk.bf16.gmra.mxu2 %vm581_vm0, %v5738_v24  ;;  %4502 = vmatmul.msk.bf16.gmra.mxu3 %vm581_vm0, %v5738_v24 }
 0x187   : > { %4519 = vmatmul.msk.bf16.vlgmr.msra.gmra.mxu0 %vm581_vm0, %v5726_v12  ;;  %4537 = vmatmul.msk.bf16.vlgmr.msra.gmra.mxu1 %vm581_vm0, %v5726_v12 }
 0x188   : > { %4555 = vmatmul.msk.bf16.vlgmr.msra.gmra.mxu2 %vm581_vm0, %v5726_v12  ;;  %4573 = vmatmul.msk.bf16.vlgmr.msra.gmra.mxu3 %vm581_vm0, %v5726_v12 }
 0x189   : > { %1630 = vmatpush.bf16.msra.mxu0 %v5013_v56  ;;  %1673 = vmatpush.bf16.msra.mxu1 %v5017_v57 }
 0x18a   : > { %1716 = vmatpush.bf16.msra.mxu2 %v5021_v58  ;;  %1759 = vmatpush.bf16.msra.mxu3 %v5025_v59 }
 0x18d   : > { %1631 = vmatpush.bf16.msra.mxu0 %v5012_v19  ;;  %1674 = vmatpush.bf16.msra.mxu1 %v5016_v60 }
 0x18e   : > { %1717 = vmatpush.bf16.msra.mxu2 %v5020_v61  ;;  %1760 = vmatpush.bf16.msra.mxu3 %v5024_v62 }
 0x191   : > { %1632 = vmatpush.bf16.msra.mxu0 %v5011_v63  ;;  %1675 = vmatpush.bf16.msra.mxu1 %v5015_v0 }
 0x192   : > { %1718 = vmatpush.bf16.msra.mxu2 %v5019_v1  ;;  %1761 = vmatpush.bf16.msra.mxu3 %v5023_v2 }
 0x195   : > { %1633 = vmatpush.bf16.msra.mxu0 %v5010_v3  ;;  %1676 = vmatpush.bf16.msra.mxu1 %v5014_v4 }
 0x196   : > { %1719 = vmatpush.bf16.msra.mxu2 %v5018_v5  ;;  %1762 = vmatpush.bf16.msra.mxu3 %v5022_v6 }
 0x197   : > { %4520 = vmatmul.msk.bf16.gmra.mxu0 %vm581_vm0, %v5738_v24  ;;  %4538 = vmatmul.msk.bf16.gmra.mxu1 %vm581_vm0, %v5738_v24 }
 0x198   : > { %4556 = vmatmul.msk.bf16.gmra.mxu2 %vm581_vm0, %v5738_v24  ;;  %4574 = vmatmul.msk.bf16.gmra.mxu3 %vm581_vm0, %v5738_v24 }
 0x1a7   : > { %4591 = vmatmul.msk.bf16.vlgmr.msrb.gmra.mxu0 %vm581_vm0, %v5726_v12  ;;  %4609 = vmatmul.msk.bf16.vlgmr.msrb.gmra.mxu1 %vm581_vm0, %v5726_v12 }
 0x1a8   : > { %4627 = vmatmul.msk.bf16.vlgmr.msrb.gmra.mxu2 %vm581_vm0, %v5726_v12  ;;  %4645 = vmatmul.msk.bf16.vlgmr.msrb.gmra.mxu3 %vm581_vm0, %v5726_v12 }
 0x1a9   : > { %1802 = vmatpush.bf16.msrb.mxu0 %v5029_v7  ;;  %1845 = vmatpush.bf16.msrb.mxu1 %v5033_v8 }
 0x1aa   : > { %1888 = vmatpush.bf16.msrb.mxu2 %v5037_v9  ;;  %1931 = vmatpush.bf16.msrb.mxu3 %v5041_v10 }
 0x1ad   : > { %1803 = vmatpush.bf16.msrb.mxu0 %v5028_v11  ;;  %1846 = vmatpush.bf16.msrb.mxu1 %v5032_v13 }
 0x1ae   : > { %1889 = vmatpush.bf16.msrb.mxu2 %v5036_v15  ;;  %1932 = vmatpush.bf16.msrb.mxu3 %v5040_v16 }
 0x1b1   : > { %1804 = vmatpush.bf16.msrb.mxu0 %v5027_v17  ;;  %1847 = vmatpush.bf16.msrb.mxu1 %v5031_v18 }
 0x1b2   : > { %1890 = vmatpush.bf16.msrb.mxu2 %v5035_v21  ;;  %1933 = vmatpush.bf16.msrb.mxu3 %v5039_v22 }
 0x1b5   : > { %1805 = vmatpush.bf16.msrb.mxu0 %v5026_v23  ;;  %1848 = vmatpush.bf16.msrb.mxu1 %v5030_v25 }
 0x1b6   : > { %1891 = vmatpush.bf16.msrb.mxu2 %v5034_v26  ;;  %1934 = vmatpush.bf16.msrb.mxu3 %v5038_v28 }
 0x1b7   : > { %4592 = vmatmul.msk.bf16.gmra.mxu0 %vm581_vm0, %v5738_v24  ;;  %4610 = vmatmul.msk.bf16.gmra.mxu1 %vm581_vm0, %v5738_v24 }
 0x1b8   : > { %4628 = vmatmul.msk.bf16.gmra.mxu2 %vm581_vm0, %v5738_v24  ;;  %4646 = vmatmul.msk.bf16.gmra.mxu3 %vm581_vm0, %v5738_v24 }
 0x1c4   : > { %v5985_v27 = vpop.f32.mrf.mxu0  ;;  %v5987_v20 = vpop.f32.mrf.mxu1 }
 0x1c5   : > { %v1946_v13 = vpack.c.bf16 %v5985_v27, %v5985_v27  ;;  %v1950_v21 = vpack.c.bf16 %v5987_v20, %v5987_v20 }
 0x1c7   : > { %4663 = vmatmul.msk.bf16.vlgmr.msra.gmra.mxu0 %vm581_vm0, %v5726_v12  ;;  %4681 = vmatmul.msk.bf16.vlgmr.msra.gmra.mxu1 %vm581_vm0, %v5726_v12 }
 0x1c8   : > { %4699 = vmatmul.msk.bf16.vlgmr.msra.gmra.mxu2 %vm581_vm0, %v5726_v12  ;;  %4717 = vmatmul.msk.bf16.vlgmr.msra.gmra.mxu3 %vm581_vm0, %v5726_v12 }
 0x1cb   : > { %v6000_v31 = vpop.f32.mrf.mxu2  ;;  %v6002_v32 = vpop.f32.mrf.mxu3 }
 0x1cc   : > { %v6004_v33 = vpop.f32.mrf.mxu0  ;;  %v6006_v34 = vpop.f32.mrf.mxu1 }
 0x1cd   : > { %v1947_v6 = vpack.c.bf16 %v6004_v33, %v6004_v33  ;;  %v1951_v7 = vpack.c.bf16 %v6006_v34, %v6006_v34 }
 0x1cf   : > { %v2045_v28 = vunpack.c.l.b16 %v1947_v6  ;;  %v2106_v33 = vunpack.c.l.b16 %v1951_v7 }
 0x1d3   : > { %v6008_v35 = vpop.f32.mrf.mxu2  ;;  %v6010_v36 = vpop.f32.mrf.mxu3 }
 0x1d4   : > { %v6012_v37 = vpop.f32.mrf.mxu0  ;;  %v6014_v38 = vpop.f32.mrf.mxu1 }
 0x1d7   : > { %4664 = vmatmul.msk.bf16.gmra.mxu0 %vm581_vm0, %v5738_v24  ;;  %4682 = vmatmul.msk.bf16.gmra.mxu1 %vm581_vm0, %v5738_v24 }
 0x1d8   : > { %4700 = vmatmul.msk.bf16.gmra.mxu2 %vm581_vm0, %v5738_v24  ;;  %4718 = vmatmul.msk.bf16.gmra.mxu3 %vm581_vm0, %v5738_v24 }
 0x1db   : > { %v6024_v39 = vpop.f32.mrf.mxu2  ;;  %v6026_v40 = vpop.f32.mrf.mxu3 }
 0x1dc   : > { %v6028_v41 = vpop.f32.mrf.mxu0  ;;  %v6030_v42 = vpop.f32.mrf.mxu1 }
 0x1e3   : > { %v6032_v43 = vpop.f32.mrf.mxu2  ;;  %v6034_v44 = vpop.f32.mrf.mxu3 }
 0x1e4   : > { %v6036_v45 = vpop.f32.mrf.mxu0  ;;  %v6038_v46 = vpop.f32.mrf.mxu1 }
 0x1e7   : > { %4735 = vmatmul.msk.bf16.vlgmr.msrb.gmra.mxu0 %vm581_vm0, %v5726_v12  ;;  %4753 = vmatmul.msk.bf16.vlgmr.msrb.gmra.mxu1 %vm581_vm0, %v5726_v12 }
 0x1e8   : > { %4771 = vmatmul.msk.bf16.vlgmr.msrb.gmra.mxu2 %vm581_vm0, %v5726_v12  ;;  %4789 = vmatmul.msk.bf16.vlgmr.msrb.gmra.mxu3 %vm581_vm0, %v5726_v12 }
 0x1eb   : > { %v6048_v47 = vpop.f32.mrf.mxu2  ;;  %v6050_v30 = vpop.f32.mrf.mxu3 }
 0x1ec   : > { %v6052_v48 = vpop.f32.mrf.mxu0  ;;  %v6054_v49 = vpop.f32.mrf.mxu1 }
 0x1f3   : > { %v6056_v50 = vpop.f32.mrf.mxu2  ;;  %v6058_v51 = vpop.f32.mrf.mxu3 }
 0x1f4   : > { %v6060_v52 = vpop.f32.mrf.mxu0  ;;  %v6062_v29 = vpop.f32.mrf.mxu1 }
 0x1f7   : > { %4736 = vmatmul.msk.bf16.gmra.mxu0 %vm581_vm0, %v5738_v24  ;;  %4754 = vmatmul.msk.bf16.gmra.mxu1 %vm581_vm0, %v5738_v24 }
 0x1f8   : > { %4772 = vmatmul.msk.bf16.gmra.mxu2 %vm581_vm0, %v5738_v24  ;;  %4790 = vmatmul.msk.bf16.gmra.mxu3 %vm581_vm0, %v5738_v24 }
 0x1fb   : > { %v6072_v12 = vpop.f32.mrf.mxu2  ;;  %v6074_v53 = vpop.f32.mrf.mxu3 }
 0x1fc   : > { %v6076_v54 = vpop.f32.mrf.mxu0  ;;  %v6078_v55 = vpop.f32.mrf.mxu1 }
 0x203   : > { %v6080_v56 = vpop.f32.mrf.mxu2  ;;  %v6082_v57 = vpop.f32.mrf.mxu3 }
 0x204   : > { %v1227_v58 = vpop.f32.mrf.mxu0  ;;  %v1270_v59 = vpop.f32.mrf.mxu1 }
 0x205   : > { %v1978_v19 = vpack.c.bf16 %v1227_v58, %v1227_v58  ;;  %v1982_v60 = vpack.c.bf16 %v1270_v59, %v1270_v59 }
 0x207   : > { %v2049_v2 = vunpack.c.l.b16 %v1978_v19  ;;  %v2110_v3 = vunpack.c.l.b16 %v1982_v60  ;;  %v2044_v19 = vunpack.c.l.b16 %v1946_v13  ;;  %v2105_v60 = vunpack.c.l.b16 %v1950_v21 }
 0x20b   : > { %v1313_v61 = vpop.f32.mrf.mxu2  ;;  %v1356_v62 = vpop.f32.mrf.mxu3 }
 0x20c   : > { %v1229_v63 = vpop.f32.mrf.mxu0  ;;  %v1272_v24 = vpop.f32.mrf.mxu1  ;;  %v1986_v10 = vpack.c.bf16 %v1313_v61, %v1313_v61  ;;  %v1990_v11 = vpack.c.bf16 %v1356_v62, %v1356_v62 }
 0x20d   : > { %v1979_v0 = vpack.c.bf16 %v1229_v63, %v1229_v63  ;;  %v1983_v1 = vpack.c.bf16 %v1272_v24, %v1272_v24  ;;  %v2046_v63 = vpack.c.b16 %v2045_v28, %v2044_v19  ;;  %v2107_v24 = vpack.c.b16 %v2106_v33, %v2105_v60 }
 0x20e   : > { %v2170_v34 = vunpack.c.l.b16 %v1986_v10  ;;  %v2230_v58 = vunpack.c.l.b16 %v1990_v11  ;;  %v1948_v28 = vpack.c.bf16 %v6012_v37, %v6012_v37 }
 0x20f   : > { %v2050_v4 = vunpack.c.l.b16 %v1979_v0  ;;  %v2111_v5 = vunpack.c.l.b16 %v1983_v1 }
 0x211   : > { %v2051_v8 = vpack.c.b16 %v2050_v4, %v2049_v2  ;;  %v2112_v9 = vpack.c.b16 %v2111_v5, %v2110_v3 }
 0x213   : > { %v1315_v15 = vpop.f32.mrf.mxu2  ;;  %v1358_v16 = vpop.f32.mrf.mxu3  ;;  %v2057_v17 = vsel %vm2052_vm14, %v2051_v8, 0  ;;  %v2117_v18 = vsel %vm2052_vm14, %v2112_v9, 0 }
 0x214   : > { %v1987_v22 = vpack.c.bf16 %v1315_v15, %v1315_v15  ;;  %v1991_v23 = vpack.c.bf16 %v1358_v16, %v1358_v16  ;;  %v1232_v25 = vpop.f32.mrf.mxu0  ;;  %v1275_v26 = vpop.f32.mrf.mxu1  ;;  %2066 = vmatpush.bf16.xpose.msra.mxu0 %v2057_v17  ;;  %2126 = vmatpush.bf16.xpose.msra.mxu2 %v2117_v18  ;;  %v1955_v15 = vpack.c.bf16 %v6008_v35, %v6008_v35 }
 0x215   : > { %v1980_v1 = vpack.c.bf16 %v1232_v25, %v1232_v25  ;;  %v1984_v2 = vpack.c.bf16 %v1275_v26, %v1275_v26  ;;  %v1949_v16 = vpack.c.bf16 %v6028_v41, %v6028_v41  ;;  %v1953_v17 = vpack.c.bf16 %v6030_v42, %v6030_v42 }
 0x216   : > { %v2171_v27 = vunpack.c.l.b16 %v1987_v22  ;;  %v2231_v59 = vunpack.c.l.b16 %v1991_v23  ;;  %v1954_v22 = vpack.c.bf16 %v6000_v31, %v6000_v31  ;;  %v1959_v26 = vpack.c.bf16 %v6010_v36, %v6010_v36 }
 0x217   : > { %v2080_v9 = vunpack.c.l.b16 %v1980_v1  ;;  %v2140_v10 = vunpack.c.l.b16 %v1984_v2  ;;  %v1952_v42 = vpack.c.bf16 %v6014_v38, %v6014_v38  ;;  %v1958_v36 = vpack.c.bf16 %v6002_v32, %v6002_v32 }
 0x218   : > { %v2172_v61 = vpack.c.b16 %v2171_v27, %v2170_v34  ;;  %v2232_v62 = vpack.c.b16 %v2231_v59, %v2230_v58  ;;  %v2166_v19 = vunpack.c.l.b16 %v1955_v15  ;;  %v2076_v37 = vunpack.c.l.b16 %v1949_v16 }
 0x219   : > { %v2136_v60 = vunpack.c.l.b16 %v1953_v17  ;;  %v2075_v1 = vunpack.c.l.b16 %v1948_v28  ;;  %v2135_v38 = vunpack.c.l.b16 %v1952_v42  ;;  %v1957_v28 = vpack.c.bf16 %v6032_v43, %v6032_v43 }
 0x21a   : > { %v2177_v20 = vsel %vm2052_vm14, %v2172_v61, 0  ;;  %v2237_v0 = vsel %vm2052_vm14, %v2232_v62, 0  ;;  %v1956_v42 = vpack.c.bf16 %v6024_v39, %v6024_v39 }
 0x21b   : > { %v1318_v3 = vpop.f32.mrf.mxu2  ;;  %v1361_v4 = vpop.f32.mrf.mxu3  ;;  %4791 = vmatmul.msk.bf16.vlgmr.msra.gmra.mxu0 %vm2052_vm14, %v2046_v63  ;;  %4793 = vmatmul.msk.bf16.vlgmr.msra.gmra.mxu2 %vm2052_vm14, %v2107_v24 }
 0x21c   : > { %2186 = vmatpush.bf16.xpose.msrb.mxu0 %v2177_v20  ;;  %2246 = vmatpush.bf16.xpose.msrb.mxu2 %v2237_v0  ;;  %v1234_v5 = vpop.f32.mrf.mxu0  ;;  %v1277_v6 = vpop.f32.mrf.mxu1  ;;  %v1988_v23 = vpack.c.bf16 %v1318_v3, %v1318_v3  ;;  %v1992_v25 = vpack.c.bf16 %v1361_v4, %v1361_v4  ;;  %v2165_v20 = vunpack.c.l.b16 %v1954_v22  ;;  %v2226_v0 = vunpack.c.l.b16 %v1959_v26 }
 0x21d   : > { %v1981_v7 = vpack.c.bf16 %v1234_v5, %v1234_v5  ;;  %v1985_v8 = vpack.c.bf16 %v1277_v6, %v1277_v6  ;;  %v2225_v4 = vunpack.c.l.b16 %v1958_v36  ;;  %v2077_v6 = vpack.c.b16 %v2076_v37, %v2075_v1 }
 0x21e   : > { %v2200_v61 = vunpack.c.l.b16 %v1988_v23  ;;  %v2260_v62 = vunpack.c.l.b16 %v1992_v25  ;;  %v2167_v5 = vpack.c.b16 %v2166_v19, %v2165_v20 }
 0x21f   : > { %v2081_v11 = vunpack.c.l.b16 %v1981_v7  ;;  %v2141_v13 = vunpack.c.l.b16 %v1985_v8  ;;  %v2137_v7 = vpack.c.b16 %v2136_v60, %v2135_v38  ;;  %v2195_v38 = vunpack.c.l.b16 %v1956_v42 }
 0x221   : > { %v2082_v18 = vpack.c.b16 %v2081_v11, %v2080_v9  ;;  %v2142_v21 = vpack.c.b16 %v2141_v13, %v2140_v10  ;;  %v2227_v9 = vpack.c.b16 %v2226_v0, %v2225_v4 }
 0x223   : > { %v1320_v35 = vpop.f32.mrf.mxu2  ;;  %v1363_v33 = vpop.f32.mrf.mxu3  ;;  %v2087_v41 = vsel %vm2052_vm14, %v2082_v18, 0  ;;  %v2147_v34 = vsel %vm2052_vm14, %v2142_v21, 0 }
 0x224   : > { %v1989_v58 = vpack.c.bf16 %v1320_v35, %v1320_v35  ;;  %v1993_v27 = vpack.c.bf16 %v1363_v33, %v1363_v33  ;;  %v1399_v31 = vpop.f32.mrf.mxu0  ;;  %v1442_v59 = vpop.f32.mrf.mxu1  ;;  %2096 = vmatpush.bf16.xpose.msra.mxu1 %v2087_v41  ;;  %2156 = vmatpush.bf16.xpose.msra.mxu3 %v2147_v34  ;;  %v1961_v35 = vpack.c.bf16 %v6034_v44, %v6034_v44 }
 0x225   : > { %v1994_v10 = vpack.c.bf16 %v1399_v31, %v1399_v31  ;;  %v1998_v11 = vpack.c.bf16 %v1442_v59, %v1442_v59  ;;  %v1963_v33 = vpack.c.bf16 %v6052_v48, %v6052_v48  ;;  %v1960_v31 = vpack.c.bf16 %v6026_v40, %v6026_v40 }
 0x226   : > { %v2201_v63 = vunpack.c.l.b16 %v1989_v58  ;;  %v2261_v24 = vunpack.c.l.b16 %v1993_v27  ;;  %v1967_v59 = vpack.c.bf16 %v6054_v49, %v6054_v49  ;;  %v1962_v48 = vpack.c.bf16 %v6036_v45, %v6036_v45 }
 0x227   : > { %v2290_v22 = vunpack.c.l.b16 %v1994_v10  ;;  %v2350_v23 = vunpack.c.l.b16 %v1998_v11  ;;  %v2256_v40 = vunpack.c.l.b16 %v1961_v35  ;;  %v1966_v49 = vpack.c.bf16 %v6038_v46, %v6038_v46 }
 0x228   : > { %v2202_v2 = vpack.c.b16 %v2201_v63, %v2200_v61  ;;  %v2262_v3 = vpack.c.b16 %v2261_v24, %v2260_v62  ;;  %v2196_v62 = vunpack.c.l.b16 %v1957_v28  ;;  %v2286_v63 = vunpack.c.l.b16 %v1963_v33 }
 0x229   : > { %v2285_v45 = vunpack.c.l.b16 %v1962_v48  ;;  %v1971_v35 = vpack.c.bf16 %v6056_v50, %v6056_v50  ;;  %v1965_v33 = vpack.c.bf16 %v6076_v54, %v6076_v54 }
 0x22a   : > { %v2207_v8 = vsel %vm2052_vm14, %v2202_v2, 0  ;;  %v2267_v32 = vsel %vm2052_vm14, %v2262_v3, 0  ;;  %v2346_v2 = vunpack.c.l.b16 %v1967_v59  ;;  %v2255_v3 = vunpack.c.l.b16 %v1960_v31 }
 0x22b   : > { %v1485_v13 = vpop.f32.mrf.mxu2  ;;  %v1528_v15 = vpop.f32.mrf.mxu3  ;;  %4792 = vmatmul.msk.bf16.vlgmr.msra.gmra.mxu1 %vm2052_vm14, %v2077_v6  ;;  %4794 = vmatmul.msk.bf16.vlgmr.msra.gmra.mxu3 %vm2052_vm14, %v2137_v7  ;;  %v2197_v6 = vpack.c.b16 %v2196_v62, %v2195_v38  ;;  %v2345_v7 = vunpack.c.l.b16 %v1966_v49  ;;  %v1975_v59 = vpack.c.bf16 %v6058_v51, %v6058_v51  ;;  %v1974_v51 = vpack.c.bf16 %v6050_v30, %v6050_v30 }
 0x22c   : > { %2216 = vmatpush.bf16.xpose.msrb.mxu1 %v2207_v8  ;;  %2276 = vmatpush.bf16.xpose.msrb.mxu3 %v2267_v32  ;;  %v1401_v16 = vpop.f32.mrf.mxu0  ;;  %v1444_v17 = vpop.f32.mrf.mxu1  ;;  %v2002_v58 = vpack.c.bf16 %v1485_v13, %v1485_v13  ;;  %v2006_v27 = vpack.c.bf16 %v1528_v15, %v1528_v15  ;;  %v2257_v8 = vpack.c.b16 %v2256_v40, %v2255_v3 }
 0x22d   : > { %4795 = vmatmul.msk.bf16.vlgmr.msrb.gmra.mxu0 %vm2052_vm14, %v2167_v5  ;;  %4797 = vmatmul.msk.bf16.vlgmr.msrb.gmra.mxu2 %vm2052_vm14, %v2227_v9  ;;  %v1995_v18 = vpack.c.bf16 %v1401_v16, %v1401_v16  ;;  %v1999_v21 = vpack.c.bf16 %v1444_v17, %v1444_v17  ;;  %v2287_v32 = vpack.c.b16 %v2286_v63, %v2285_v45  ;;  %v2465_v38 = vunpack.c.l.b16 %v1974_v51 }
 0x22e   : > { %v2410_v24 = vunpack.c.l.b16 %v2002_v58  ;;  %v2470_v20 = vunpack.c.l.b16 %v2006_v27  ;;  %v2347_v46 = vpack.c.b16 %v2346_v2, %v2345_v7  ;;  %v1970_v58 = vpack.c.bf16 %v6048_v47, %v6048_v47 }
 0x22f   : > { %v2291_v25 = vunpack.c.l.b16 %v1995_v18  ;;  %v2351_v26 = vunpack.c.l.b16 %v1999_v21 }
 0x230   : > { %v2405_v63 = vunpack.c.l.b16 %v1970_v58 }
 0x231   : > { %v2292_v41 = vpack.c.b16 %v2291_v25, %v2290_v22  ;;  %v2352_v34 = vpack.c.b16 %v2351_v26, %v2350_v23 }
 0x233   : > { %v1487_v43 = vpop.f32.mrf.mxu2  ;;  %v1530_v36 = vpop.f32.mrf.mxu3  ;;  %v2297_v44 = vsel %vm2052_vm14, %v2292_v41, 0  ;;  %v2357_v19 = vsel %vm2052_vm14, %v2352_v34, 0  ;;  %v1969_v41 = vpack.c.bf16 %v6078_v55, %v6078_v55  ;;  %v1968_v55 = vpack.c.bf16 %v6062_v29, %v6062_v29 }
 0x234   : > { %v2003_v37 = vpack.c.bf16 %v1487_v43, %v1487_v43  ;;  %v2007_v60 = vpack.c.bf16 %v1530_v36, %v1530_v36  ;;  %v1404_v39 = vpop.f32.mrf.mxu0  ;;  %v1447_v61 = vpop.f32.mrf.mxu1  ;;  %2306 = vmatpush.bf16.xpose.msra.mxu0 %v2297_v44  ;;  %2366 = vmatpush.bf16.xpose.msra.mxu2 %v2357_v19  ;;  %v1964_v43 = vpack.c.bf16 %v6060_v52, %v6060_v52  ;;  %v2316_v52 = vunpack.c.l.b16 %v1965_v33 }
 0x235   : > { %v1996_v11 = vpack.c.bf16 %v1404_v39, %v1404_v39  ;;  %v2000_v13 = vpack.c.bf16 %v1447_v61, %v1447_v61  ;;  %v2376_v39 = vunpack.c.l.b16 %v1969_v41  ;;  %v2375_v29 = vunpack.c.l.b16 %v1968_v55 }
 0x236   : > { %v2411_v0 = vunpack.c.l.b16 %v2003_v37  ;;  %v2471_v1 = vunpack.c.l.b16 %v2007_v60  ;;  %v2406_v60 = vunpack.c.l.b16 %v1971_v35  ;;  %v1972_v33 = vpack.c.bf16 %v6072_v12, %v6072_v12 }
 0x237   : > { %v2320_v23 = vunpack.c.l.b16 %v1996_v11  ;;  %v2380_v25 = vunpack.c.l.b16 %v2000_v13  ;;  %v2377_v45 = vpack.c.b16 %v2376_v39, %v2375_v29  ;;  %v1976_v41 = vpack.c.bf16 %v6074_v53, %v6074_v53 }
 0x238   : > { %v2412_v4 = vpack.c.b16 %v2411_v0, %v2410_v24  ;;  %v2472_v5 = vpack.c.b16 %v2471_v1, %v2470_v20  ;;  %v2466_v24 = vunpack.c.l.b16 %v1975_v59  ;;  %v2315_v20 = vunpack.c.l.b16 %v1964_v43 }
 0x239   : > { %v2407_v2 = vpack.c.b16 %v2406_v60, %v2405_v63 }
 0x23a   : > { %v2417_v9 = vsel %vm2052_vm14, %v2412_v4, 0  ;;  %v2477_v10 = vsel %vm2052_vm14, %v2472_v5, 0  ;;  %v2317_v3 = vpack.c.b16 %v2316_v52, %v2315_v20  ;;  %v2467_v5 = vpack.c.b16 %v2466_v24, %v2465_v38 }
 0x23b   : > { %v1490_v15 = vpop.f32.mrf.mxu2  ;;  %v1533_v16 = vpop.f32.mrf.mxu3  ;;  %4796 = vmatmul.msk.bf16.vlgmr.msrb.gmra.mxu1 %vm2052_vm14, %v2197_v6  ;;  %4798 = vmatmul.msk.bf16.vlgmr.msrb.gmra.mxu3 %vm2052_vm14, %v2257_v8 }
 0x23c   : > { %2426 = vmatpush.bf16.xpose.msrb.mxu0 %v2417_v9  ;;  %2486 = vmatpush.bf16.xpose.msrb.mxu2 %v2477_v10  ;;  %v1406_v17 = vpop.f32.mrf.mxu0  ;;  %v1449_v18 = vpop.f32.mrf.mxu1  ;;  %v2004_v27 = vpack.c.bf16 %v1490_v15, %v1490_v15  ;;  %v2008_v31 = vpack.c.bf16 %v1533_v16, %v1533_v16 }
 0x23d   : > { %4799 = vmatmul.msk.bf16.vlgmr.msra.gmra.mxu0 %vm2052_vm14, %v2287_v32  ;;  %4801 = vmatmul.msk.bf16.vlgmr.msra.gmra.mxu2 %vm2052_vm14, %v2347_v46  ;;  %v1997_v21 = vpack.c.bf16 %v1406_v17, %v1406_v17  ;;  %v2001_v22 = vpack.c.bf16 %v1449_v18, %v1449_v18  ;;  %v1973_v18 = vpack.c.bf16 %v6080_v56, %v6080_v56 }
 0x23e   : > { %v2440_v61 = vunpack.c.l.b16 %v2004_v27  ;;  %v2500_v62 = vunpack.c.l.b16 %v2008_v31 }
 0x23f   : > { %v2321_v26 = vunpack.c.l.b16 %v1997_v21  ;;  %v2381_v28 = vunpack.c.l.b16 %v2001_v22  ;;  %v1977_v21 = vpack.c.bf16 %v6082_v57, %v6082_v57  ;;  %v2436_v27 = vunpack.c.l.b16 %v1973_v18 }
 0x241   : > { %v2322_v34 = vpack.c.b16 %v2321_v26, %v2320_v23  ;;  %v2382_v42 = vpack.c.b16 %v2381_v28, %v2380_v25  ;;  %v2496_v57 = vunpack.c.l.b16 %v1977_v21 }
 0x243   : > { %v1492_v50 = vpop.f32.mrf.mxu2  ;;  %v1535_v36 = vpop.f32.mrf.mxu3  ;;  %v2327_v54 = vsel %vm2052_vm14, %v2322_v34, 0  ;;  %v2387_v44 = vsel %vm2052_vm14, %v2382_v42, 0 }
 0x244   : > { %v2005_v19 = vpack.c.bf16 %v1492_v50, %v1492_v50  ;;  %v2009_v48 = vpack.c.bf16 %v1535_v36, %v1535_v36  ;;  %v1635_v47 = vpop.f32.mrf.mxu0  ;;  %v1678_v37 = vpop.f32.mrf.mxu1  ;;  %2336 = vmatpush.bf16.xpose.msra.mxu1 %v2327_v54  ;;  %2396 = vmatpush.bf16.xpose.msra.mxu3 %v2387_v44  ;;  %v2435_v36 = vunpack.c.l.b16 %v1972_v33  ;;  %v2495_v54 = vunpack.c.l.b16 %v1976_v41 }
 0x245   : > { %v2010_v6 = vpack.c.bf16 %v1635_v47, %v1635_v47  ;;  %v2014_v7 = vpack.c.bf16 %v1678_v37, %v1678_v37 }
 0x246   : > { %v2441_v40 = vunpack.c.l.b16 %v2005_v19  ;;  %v2501_v49 = vunpack.c.l.b16 %v2009_v48  ;;  %v2437_v19 = vpack.c.b16 %v2436_v27, %v2435_v36  ;;  %v2497_v48 = vpack.c.b16 %v2496_v57, %v2495_v54 }
 0x247   : > { %v2915_v13 = vunpack.c.l.b16 %v2010_v6  ;;  %v2971_v15 = vunpack.c.l.b16 %v2014_v7 }
 0x248   : > { %v2442_v0 = vpack.c.b16 %v2441_v40, %v2440_v61  ;;  %v2502_v1 = vpack.c.b16 %v2501_v49, %v2500_v62 }
 0x24a   : > { %v2447_v4 = vsel %vm2052_vm14, %v2442_v0, 0  ;;  %v2507_v30 = vsel %vm2052_vm14, %v2502_v1, 0 }
 0x24b   : > { %v1721_v8 = vpop.f32.mrf.mxu2  ;;  %v1764_v32 = vpop.f32.mrf.mxu3  ;;  %4800 = vmatmul.msk.bf16.vlgmr.msra.gmra.mxu1 %vm2052_vm14, %v2317_v3  ;;  %4802 = vmatmul.msk.bf16.vlgmr.msra.gmra.mxu3 %vm2052_vm14, %v2377_v45 }
 0x24c   : > { %2456 = vmatpush.bf16.xpose.msrb.mxu1 %v2447_v4  ;;  %2516 = vmatpush.bf16.xpose.msrb.mxu3 %v2507_v30  ;;  %v1637_v9 = vpop.f32.mrf.mxu0  ;;  %v1680_v10 = vpop.f32.mrf.mxu1  ;;  %v2018_v25 = vpack.c.bf16 %v1721_v8, %v1721_v8  ;;  %v2022_v26 = vpack.c.bf16 %v1764_v32, %v1764_v32 }
 0x24d   : > { %4803 = vmatmul.msk.bf16.vlgmr.msrb.gmra.mxu0 %vm2052_vm14, %v2407_v2  ;;  %4805 = vmatmul.msk.bf16.vlgmr.msrb.gmra.mxu2 %vm2052_vm14, %v2467_v5  ;;  %v2011_v46 = vpack.c.bf16 %v1637_v9, %v1637_v9  ;;  %v2015_v11 = vpack.c.bf16 %v1680_v10, %v1680_v10 }
 0x24e   : > { %v3027_v31 = vunpack.c.l.b16 %v2018_v25  ;;  %v3083_v59 = vunpack.c.l.b16 %v2022_v26 }
 0x24f   : > { %v2916_v16 = vunpack.c.l.b16 %v2011_v46  ;;  %v2972_v17 = vunpack.c.l.b16 %v2015_v11 }
 0x251   : > { %v2917_v22 = vpack.c.b16 %v2916_v16, %v2915_v13  ;;  %v2973_v23 = vpack.c.b16 %v2972_v17, %v2971_v15 }
 0x253   : > { %v1723_v28 = vpop.f32.mrf.mxu2  ;;  %v1766_v35 = vpop.f32.mrf.mxu3  ;;  %2929 = vmatpush.bf16.msra.mxu0 %v2917_v22  ;;  %2985 = vmatpush.bf16.msra.mxu2 %v2973_v23 }
 0x254   : > { %v2019_v34 = vpack.c.bf16 %v1723_v28, %v1723_v28  ;;  %v2023_v42 = vpack.c.bf16 %v1766_v35, %v1766_v35  ;;  %v1640_v56 = vpop.f32.mrf.mxu0  ;;  %v1683_v58 = vpop.f32.mrf.mxu1 }
 0x255   : > { %v2012_v12 = vpack.c.bf16 %v1640_v56, %v1640_v56  ;;  %v2016_v53 = vpack.c.bf16 %v1683_v58, %v1683_v58 }
 0x256   : > { %v3028_v43 = vunpack.c.l.b16 %v2019_v34  ;;  %v3084_v50 = vunpack.c.l.b16 %v2023_v42 }
 0x257   : > { %v2943_v61 = vunpack.c.l.b16 %v2012_v12  ;;  %v2999_v62 = vunpack.c.l.b16 %v2016_v53 }
 0x258   : > { %v3029_v44 = vpack.c.b16 %v3028_v43, %v3027_v31  ;;  %v3085_v55 = vpack.c.b16 %v3084_v50, %v3083_v59 }
 0x25a   : > { %3041 = vmatpush.bf16.msrb.mxu0 %v3029_v44  ;;  %3097 = vmatpush.bf16.msrb.mxu2 %v3085_v55 }
 0x25b   : > { %v1726_v47 = vpop.f32.mrf.mxu2  ;;  %v1769_v37 = vpop.f32.mrf.mxu3  ;;  %4804 = vmatmul.msk.bf16.vlgmr.msrb.gmra.mxu1 %vm2052_vm14, %v2437_v19  ;;  %4806 = vmatmul.msk.bf16.vlgmr.msrb.gmra.mxu3 %vm2052_vm14, %v2497_v48 }
 0x25c   : > { %v1642_v51 = vpop.f32.mrf.mxu0  ;;  %v1685_v60 = vpop.f32.mrf.mxu1  ;;  %v2020_v20 = vpack.c.bf16 %v1726_v47, %v1726_v47  ;;  %v2024_v29 = vpack.c.bf16 %v1769_v37, %v1769_v37 }
 0x25d   : > { %v2013_v52 = vpack.c.bf16 %v1642_v51, %v1642_v51  ;;  %v2017_v39 = vpack.c.bf16 %v1685_v60, %v1685_v60 }
 0x25e   : > { %v3055_v3 = vunpack.c.l.b16 %v2020_v20  ;;  %v3111_v45 = vunpack.c.l.b16 %v2024_v29 }
 0x25f   : > { %v2944_v40 = vunpack.c.l.b16 %v2013_v52  ;;  %v3000_v49 = vunpack.c.l.b16 %v2017_v39 }
 0x261   : > { %v2945_v63 = vpack.c.b16 %v2944_v40, %v2943_v61  ;;  %v3001_v24 = vpack.c.b16 %v3000_v49, %v2999_v62 }
 0x263   : > { %v1728_v0 = vpop.f32.mrf.mxu2  ;;  %v1771_v1 = vpop.f32.mrf.mxu3  ;;  %2957 = vmatpush.bf16.msra.mxu1 %v2945_v63  ;;  %3013 = vmatpush.bf16.msra.mxu3 %v3001_v24 }
 0x264   : > { %v2021_v38 = vpack.c.bf16 %v1728_v0, %v1728_v0  ;;  %v2025_v2 = vpack.c.bf16 %v1771_v1, %v1771_v1  ;;  %v6180_v7 = vpop.f32.mrf.mxu0  ;;  %v6186_v9 = vpop.f32.mrf.mxu1 }
 0x266   : > { %v3056_v4 = vunpack.c.l.b16 %v2021_v38  ;;  %v3112_v30 = vunpack.c.l.b16 %v2025_v2 }
 0x268   : > { %v3057_v5 = vpack.c.b16 %v3056_v4, %v3055_v3  ;;  %v3113_v6 = vpack.c.b16 %v3112_v30, %v3111_v45 }
 0x26a   : > { %3069 = vmatpush.bf16.msrb.mxu1 %v3057_v5  ;;  %3125 = vmatpush.bf16.msrb.mxu3 %v3113_v6 }
 0x26b   : > { %v6182_v8 = vpop.f32.mrf.mxu2  ;;  %v6192_v11 = vpop.f32.mrf.mxu3 }
 0x26c   : > { %v6184_v32 = vpop.f32.mrf.mxu0  ;;  %v6194_v13 = vpop.f32.mrf.mxu1 }
 0x273   : > { %v6188_v10 = vpop.f32.mrf.mxu2  ;;  %v6200_v17 = vpop.f32.mrf.mxu3 }
 0x274   : > { %v6190_v46 = vpop.f32.mrf.mxu0  ;;  %v6202_v18 = vpop.f32.mrf.mxu1 }
 0x27b   : > { %v6196_v15 = vpop.f32.mrf.mxu2  ;;  %v6210_v25 = vpop.f32.mrf.mxu3 }
 0x27c   : > { %v6198_v16 = vpop.f32.mrf.mxu0  ;;  %v6216_v35 = vpop.f32.mrf.mxu1 }
 0x283   : > { %v6204_v21 = vpop.f32.mrf.mxu2  ;;  %v6220_v41 = vpop.f32.mrf.mxu3 }
 0x298   : > { %v6206_v22 = vpop.f32.mrf.mxu0 }
 0x299   : > { %v2524_v23 = vsel %vm2523_vm15, %v6206_v22, -inf }
 0x29a   : > { %2525 = vmax.xlane.f32.xlu1 %v2524_v23 }
 0x29e   : > { %v6212_v26 = vpop.f32.mrf.mxu2 }
 0x29f   : > { %v2536_v28 = vsel %vm2523_vm15, %v6212_v26, -inf }
 0x2a0   : > { %2537 = vmax.xlane.f32.xlu2 %v2536_v28  ;;  %v6218_v33 = vpop.f32.mrf.mxu0 }
 0x2a1   : > { %v2527_v56 = vsel %vm2523_vm15, %v6218_v33, -inf }
 0x2a6   : > { %v6222_v34 = vpop.f32.mrf.mxu2 }
 0x2a7   : > { %v2539_v42 = vsel %vm2523_vm15, %v6222_v34, -inf }
 0x2a8   : > { %2540 = vmax.xlane.f32.xlu0 %v2539_v42  ;;  %v6228_v58 = vpop.f32.mrf.mxu1  ;;  %2528 = vmax.xlane.f32.xlu2 %v2527_v56 }
 0x2a9   : > { %v2530_v57 = vsel %vm2523_vm15, %v6228_v58, -inf }
 0x2aa   : > { %v6230_v27 = vpop.f32.mrf.mxu0  ;;  %2531 = vmax.xlane.f32.xlu1 %v2530_v57 }
 0x2ab   : > { %v2548_v43 = vsel %vm2523_vm15, %v6230_v27, -inf }
 0x2ae   : > { %v6234_v31 = vpop.f32.mrf.mxu3 }
 0x2af   : > { %v2542_v48 = vsel %vm2523_vm15, %v6234_v31, -inf }
 0x2b0   : > { %v6236_v59 = vpop.f32.mrf.mxu2  ;;  %2549 = vmax.xlane.f32.xlu0 %v2548_v43  ;;  %v6246_v44 = vpop.f32.mrf.mxu1 }
 0x2b1   : > { %v2560_v50 = vsel %vm2523_vm15, %v6236_v59, -inf  ;;  %v2533_v12 = vsel %vm2523_vm15, %v6246_v44, -inf }
 0x2b2   : > { %2561 = vmax.xlane.f32.xlu2 %v2560_v50  ;;  %v6242_v36 = vpop.f32.mrf.mxu0 }
 0x2b3   : > { %v2551_v54 = vsel %vm2523_vm15, %v6242_v36, -inf }
 0x2b4   : > { %2552 = vmax.xlane.f32.xlu1 %v2551_v54 }
 0x2b6   : > { %v6248_v55 = vpop.f32.mrf.mxu3 }
 0x2b7   : > { %v2545_v53 = vsel %vm2523_vm15, %v6248_v55, -inf }
 0x2b8   : > { %v6250_v19 = vpop.f32.mrf.mxu2  ;;  %2543 = vmax.xlane.f32.xlu0 %v2542_v48  ;;  %v6260_v37 = vpop.f32.mrf.mxu1 }
 0x2b9   : > { %v2563_v52 = vsel %vm2523_vm15, %v6250_v19, -inf  ;;  %v2554_v63 = vsel %vm2523_vm15, %v6260_v37, -inf }
 0x2ba   : > { %2534 = vmax.xlane.f32.xlu2 %v2533_v12  ;;  %v6258_v47 = vpop.f32.mrf.mxu0 }
 0x2bb   : > { %v2572_v39 = vsel %vm2523_vm15, %v6258_v47, -inf }
 0x2bc   : > { %2546 = vmax.xlane.f32.xlu1 %v2545_v53 }
 0x2be   : > { %v6262_v51 = vpop.f32.mrf.mxu3 }
 0x2bf   : > { %v2566_v24 = vsel %vm2523_vm15, %v6262_v51, -inf }
 0x2c0   : > { %v6264_v60 = vpop.f32.mrf.mxu2  ;;  %2564 = vmax.xlane.f32.xlu0 %v2563_v52  ;;  %v6276_v49 = vpop.f32.mrf.mxu1 }
 0x2c1   : > { %v2584_v61 = vsel %vm2523_vm15, %v6264_v60, -inf  ;;  %v2557_v20 = vsel %vm2523_vm15, %v6276_v49, -inf }
 0x2c2   : > { %2573 = vmax.xlane.f32.xlu2 %v2572_v39  ;;  %v6272_v62 = vpop.f32.mrf.mxu0 }
 0x2c3   : > { %v2575_v38 = vsel %vm2523_vm15, %v6272_v62, -inf }
 0x2c4   : > { %2585 = vmax.xlane.f32.xlu1 %v2584_v61 }
 0x2c6   : > { %v6274_v40 = vpop.f32.mrf.mxu3 }
 0x2c7   : > { %v2569_v30 = vsel %vm2523_vm15, %v6274_v40, -inf }
 0x2c8   : > { %2555 = vmax.xlane.f32.xlu0 %v2554_v63  ;;  %v6284_v29 = vpop.f32.mrf.mxu2  ;;  %v6294_v3 = vpop.f32.mrf.mxu1 }
 0x2c9   : > { %v2587_v2 = vsel %vm2523_vm15, %v6284_v29, -inf  ;;  %v2578_v5 = vsel %vm2523_vm15, %v6294_v3, -inf }
 0x2ca   : > { %2567 = vmax.xlane.f32.xlu2 %v2566_v24  ;;  %v6286_v0 = vpop.f32.mrf.mxu0 }
 0x2cb   : > { %v2596_v45 = vsel %vm2523_vm15, %v6286_v0, -inf }
 0x2cc   : > { %2558 = vmax.xlane.f32.xlu1 %v2557_v20 }
 0x2ce   : > { %v6288_v1 = vpop.f32.mrf.mxu3 }
 0x2cf   : > { %v2590_v23 = vsel %vm2523_vm15, %v6288_v1, -inf }
 0x2d0   : > { %2576 = vmax.xlane.f32.xlu0 %v2575_v38  ;;  %v6298_v4 = vpop.f32.mrf.mxu2  ;;  %v6308_v28 = vpop.f32.mrf.mxu1 }
 0x2d1   : > { %v2608_v57 = vsel %vm2523_vm15, %v6298_v4, -inf  ;;  %v2581_v12 = vsel %vm2523_vm15, %v6308_v28, -inf }
 0x2d2   : > { %2588 = vmax.xlane.f32.xlu2 %v2587_v2  ;;  %v6310_v42 = vpop.f32.mrf.mxu0 }
 0x2d3   : > { %v2599_v43 = vsel %vm2523_vm15, %v6310_v42, -inf }
 0x2d4   : > { %2597 = vmax.xlane.f32.xlu1 %v2596_v45 }
 0x2d6   : > { %v6304_v6 = vpop.f32.mrf.mxu3 }
 0x2d7   : > { %v2593_v53 = vsel %vm2523_vm15, %v6304_v6, -inf }
 0x2d8   : > { %2570 = vmax.xlane.f32.xlu0 %v2569_v30  ;;  %v6312_v56 = vpop.f32.mrf.mxu2  ;;  %v6322_v48 = vpop.f32.mrf.mxu1 }
 0x2d9   : > { %v2611_v50 = vsel %vm2523_vm15, %v6312_v56, -inf  ;;  %v2602_v63 = vsel %vm2523_vm15, %v6322_v48, -inf }
 0x2da   : > { %2579 = vmax.xlane.f32.xlu2 %v2578_v5 }
 0x2dc   : > { %2591 = vmax.xlane.f32.xlu1 %v2590_v23 }
 0x2de   : > { %v6320_v54 = vpop.f32.mrf.mxu3 }
 0x2df   : > { %v2614_v52 = vsel %vm2523_vm15, %v6320_v54, -inf }
 0x2e0   : > { %2609 = vmax.xlane.f32.xlu0 %v2608_v57  ;;  %v6332_v61 = vpop.f32.mrf.mxu1 }
 0x2e1   : > { %v2605_v20 = vsel %vm2523_vm15, %v6332_v61, -inf }
 0x2e2   : > { %2600 = vmax.xlane.f32.xlu2 %v2599_v43 }
 0x2e4   : > { %2612 = vmax.xlane.f32.xlu1 %v2611_v50 }
 0x2e6   : > { %v6330_v39 = vpop.f32.mrf.mxu3 }
 0x2e7   : > { %v2617_v24 = vsel %vm2523_vm15, %v6330_v39, -inf }
 0x2e8   : > { %2582 = vmax.xlane.f32.xlu0 %v2581_v12 }
 0x2ea   : > { %2594 = vmax.xlane.f32.xlu2 %v2593_v53 }
 0x2ec   : > { %2615 = vmax.xlane.f32.xlu1 %v2614_v52 }
 0x2f0   : > { %2603 = vmax.xlane.f32.xlu0 %v2602_v63 }
 0x2f2   : > { %2618 = vmax.xlane.f32.xlu2 %v2617_v24 }
 0x2f4   : > { %2606 = vmax.xlane.f32.xlu1 %v2605_v20 }
 0x30d   : > { %v2526_v38 = vpop.xlane.xlu1 %2525 }
 0x30e   : > { %v2620_v2 = vsub.f32 %v6206_v22, %v2526_v38 }
 0x310   : > { %v2652_v45 = vmul.f32 1.442695, %v2620_v2 }
 0x312   : > { %5139 = vpow2.f32 %v2652_v45 }
 0x313   : > { %v2538_v30 = vpop.xlane.xlu2 %2537 }
 0x314   : > { %v2624_v5 = vsub.f32 %v6212_v26, %v2538_v30 }
 0x316   : > { %v2660_v23 = vmul.f32 1.442695, %v2624_v5 }
 0x318   : > { %v6342_v57 = vpop.eup %5139  ;;  %5141 = vpow2.f32 %v2660_v23 }
 0x319   : > { %v2716_v43 = vsel %vm2523_vm15, %v6342_v57, 0.0 }
 0x31a   : > { %2717 = vadd.xlane.f32.xlu2 %v2716_v43 }
 0x31b   : > { %v2541_v50 = vpop.xlane.xlu0 %2540  ;;  %v2529_v12 = vpop.xlane.xlu2 %2528 }
 0x31c   : > { %v2625_v53 = vsub.f32 %v6222_v34, %v2541_v50  ;;  %v2621_v52 = vsub.f32 %v6218_v33, %v2529_v12 }
 0x31d   : > { %v2532_v22 = vpop.xlane.xlu1 %2531 }
 0x31e   : > { %v6348_v63 = vpop.eup %5141  ;;  %v2662_v24 = vmul.f32 1.442695, %v2625_v53  ;;  %v2654_v20 = vmul.f32 1.442695, %v2621_v52  ;;  %v2622_v26 = vsub.f32 %v6228_v58, %v2532_v22 }
 0x31f   : > { %v2728_v38 = vsel %vm2523_vm15, %v6348_v63, 0.0 }
 0x320   : > { %5143 = vpow2.f32 %v2662_v24  ;;  %2729 = vadd.xlane.f32.xlu0 %v2728_v38  ;;  %v2656_v2 = vmul.f32 1.442695, %v2622_v26 }
 0x321   : > { %5145 = vpow2.f32 %v2654_v20 }
 0x322   : > { %5147 = vpow2.f32 %v2656_v2 }
 0x323   : > { %v2550_v45 = vpop.xlane.xlu0 %2549 }
 0x324   : > { %v2628_v34 = vsub.f32 %v6230_v27, %v2550_v45 }
 0x325   : > { %v2562_v30 = vpop.xlane.xlu2 %2561 }
 0x326   : > { %v2632_v33 = vsub.f32 %v6236_v59, %v2562_v30  ;;  %v6355_v5 = vpop.eup %5143  ;;  %v2668_v23 = vmul.f32 1.442695, %v2628_v34 }
 0x327   : > { %v2553_v43 = vpop.xlane.xlu1 %2552  ;;  %v6357_v50 = vpop.eup %5145  ;;  %v2731_v53 = vsel %vm2523_vm15, %v6355_v5, 0.0 }
 0x328   : > { %v2676_v58 = vmul.f32 1.442695, %v2632_v33  ;;  %v2629_v12 = vsub.f32 %v6242_v36, %v2553_v43  ;;  %5149 = vpow2.f32 %v2668_v23  ;;  %v2719_v52 = vsel %vm2523_vm15, %v6357_v50, 0.0  ;;  %2732 = vadd.xlane.f32.xlu1 %v2731_v53  ;;  %v6365_v20 = vpop.eup %5147 }
 0x329   : > { %2720 = vadd.xlane.f32.xlu0 %v2719_v52 }
 0x32a   : > { %5151 = vpow2.f32 %v2676_v58  ;;  %v2670_v27 = vmul.f32 1.442695, %v2629_v12 }
 0x32b   : > { %v2544_v59 = vpop.xlane.xlu0 %2543 }
 0x32c   : > { %v2626_v24 = vsub.f32 %v6234_v31, %v2544_v59  ;;  %5153 = vpow2.f32 %v2670_v27  ;;  %v2722_v31 = vsel %vm2523_vm15, %v6365_v20, 0.0 }
 0x32d   : > { %v2535_v22 = vpop.xlane.xlu2 %2534 }
 0x32e   : > { %v2623_v26 = vsub.f32 %v6246_v44, %v2535_v22  ;;  %v6368_v36 = vpop.eup %5149  ;;  %v2664_v38 = vmul.f32 1.442695, %v2626_v24 }
 0x32f   : > { %v2547_v2 = vpop.xlane.xlu1 %2546  ;;  %v2740_v33 = vsel %vm2523_vm15, %v6368_v36, 0.0 }
 0x330   : > { %v6370_v45 = vpop.eup %5151  ;;  %v2658_v30 = vmul.f32 1.442695, %v2623_v26  ;;  %v2627_v34 = vsub.f32 %v6248_v55, %v2547_v2  ;;  %5155 = vpow2.f32 %v2664_v38  ;;  %2741 = vadd.xlane.f32.xlu2 %v2740_v33 }
 0x331   : > { %v2752_v44 = vsel %vm2523_vm15, %v6370_v45, 0.0  ;;  %2723 = vadd.xlane.f32.xlu0 %v2722_v31 }
 0x332   : > { %5157 = vpow2.f32 %v2658_v30  ;;  %2753 = vadd.xlane.f32.xlu1 %v2752_v44  ;;  %v2666_v23 = vmul.f32 1.442695, %v2627_v34  ;;  %v6380_v55 = vpop.eup %5153 }
 0x333   : > { %v2565_v43 = vpop.xlane.xlu0 %2564 }
 0x334   : > { %v2633_v58 = vsub.f32 %v6250_v19, %v2565_v43  ;;  %5159 = vpow2.f32 %v2666_v23  ;;  %v2743_v19 = vsel %vm2523_vm15, %v6380_v55, 0.0 }
 0x335   : > { %v2574_v12 = vpop.xlane.xlu2 %2573 }
 0x336   : > { %v2636_v53 = vsub.f32 %v6258_v47, %v2574_v12  ;;  %v6383_v52 = vpop.eup %5155  ;;  %v2678_v27 = vmul.f32 1.442695, %v2633_v58 }
 0x337   : > { %v2586_v59 = vpop.xlane.xlu1 %2585  ;;  %v2734_v38 = vsel %vm2523_vm15, %v6383_v52, 0.0 }
 0x338   : > { %v6385_v22 = vpop.eup %5157  ;;  %v2684_v24 = vmul.f32 1.442695, %v2636_v53  ;;  %v2640_v26 = vsub.f32 %v6264_v60, %v2586_v59  ;;  %5161 = vpow2.f32 %v2678_v27  ;;  %2735 = vadd.xlane.f32.xlu2 %v2734_v38 }
 0x339   : > { %v2725_v47 = vsel %vm2523_vm15, %v6385_v22, 0.0  ;;  %2744 = vadd.xlane.f32.xlu0 %v2743_v19 }
 0x33a   : > { %5163 = vpow2.f32 %v2684_v24  ;;  %2726 = vadd.xlane.f32.xlu1 %v2725_v47  ;;  %v2692_v2 = vmul.f32 1.442695, %v2640_v26  ;;  %v6395_v60 = vpop.eup %5159 }
 0x33b   : > { %v2556_v30 = vpop.xlane.xlu0 %2555 }
 0x33c   : > { %v2630_v34 = vsub.f32 %v6260_v37, %v2556_v30  ;;  %5165 = vpow2.f32 %v2692_v2  ;;  %v2737_v37 = vsel %vm2523_vm15, %v6395_v60, 0.0 }
 0x33d   : > { %v2568_v33 = vpop.xlane.xlu2 %2567 }
 0x33e   : > { %v2634_v31 = vsub.f32 %v6262_v51, %v2568_v33  ;;  %v6398_v44 = vpop.eup %5161  ;;  %v2672_v23 = vmul.f32 1.442695, %v2630_v34 }
 0x33f   : > { %v2559_v43 = vpop.xlane.xlu1 %2558  ;;  %v2755_v27 = vsel %vm2523_vm15, %v6398_v44, 0.0 }
 0x340   : > { %v6400_v58 = vpop.eup %5163  ;;  %v2680_v12 = vmul.f32 1.442695, %v2634_v31  ;;  %v2631_v53 = vsub.f32 %v6276_v49, %v2559_v43  ;;  %5167 = vpow2.f32 %v2672_v23  ;;  %2756 = vadd.xlane.f32.xlu2 %v2755_v27 }
 0x341   : > { %v2764_v51 = vsel %vm2523_vm15, %v6400_v58, 0.0  ;;  %2738 = vadd.xlane.f32.xlu0 %v2737_v37 }
 0x342   : > { %5169 = vpow2.f32 %v2680_v12  ;;  %2765 = vadd.xlane.f32.xlu1 %v2764_v51  ;;  %v2674_v59 = vmul.f32 1.442695, %v2631_v53  ;;  %v6409_v38 = vpop.eup %5165 }
 0x343   : > { %v2577_v24 = vpop.xlane.xlu0 %2576  ;;  %v2776_v33 = vsel %vm2523_vm15, %v6409_v38, 0.0 }
 0x344   : > { %5171 = vpow2.f32 %v2674_v59  ;;  %v2637_v27 = vsub.f32 %v6272_v62, %v2577_v24 }
 0x345   : > { %v2589_v26 = vpop.xlane.xlu2 %2588 }
 0x346   : > { %v2641_v49 = vsub.f32 %v6284_v29, %v2589_v26  ;;  %v6412_v19 = vpop.eup %5167 }
 0x347   : > { %v2598_v47 = vpop.xlane.xlu1 %2597  ;;  %v2746_v34 = vsel %vm2523_vm15, %v6412_v19, 0.0 }
 0x348   : > { %v6414_v2 = vpop.eup %5169  ;;  %v2694_v30 = vmul.f32 1.442695, %v2641_v49  ;;  %2747 = vadd.xlane.f32.xlu2 %v2746_v34 }
 0x349   : > { %v2758_v31 = vsel %vm2523_vm15, %v6414_v2, 0.0  ;;  %2777 = vadd.xlane.f32.xlu0 %v2776_v33 }
 0x34a   : > { %5173 = vpow2.f32 %v2694_v30  ;;  %2759 = vadd.xlane.f32.xlu1 %v2758_v31  ;;  %v6423_v12 = vpop.eup %5171 }
 0x34b   : > { %v2571_v29 = vpop.xlane.xlu0 %2570  ;;  %v2749_v30 = vsel %vm2523_vm15, %v6423_v12, 0.0 }
 0x34c   : > { %v2635_v43 = vsub.f32 %v6274_v40, %v2571_v29 }
 0x34d   : > { %v2580_v23 = vpop.xlane.xlu2 %2579 }
 0x34e   : > { %v2638_v53 = vsub.f32 %v6294_v3, %v2580_v23  ;;  %v2682_v37 = vmul.f32 1.442695, %v2635_v43  ;;  %v2686_v3 = vmul.f32 1.442695, %v2637_v27 }
 0x34f   : > { %v2592_v51 = vpop.xlane.xlu1 %2591 }
 0x350   : > { %v6427_v59 = vpop.eup %5173  ;;  %v2688_v26 = vmul.f32 1.442695, %v2638_v53  ;;  %v2642_v49 = vsub.f32 %v6288_v1, %v2592_v51  ;;  %5175 = vpow2.f32 %v2682_v37  ;;  %v2644_v53 = vsub.f32 %v6286_v0, %v2598_v47 }
 0x351   : > { %v2779_v40 = vsel %vm2523_vm15, %v6427_v59, 0.0  ;;  %2750 = vadd.xlane.f32.xlu0 %v2749_v30 }
 0x352   : > { %5177 = vpow2.f32 %v2688_v26  ;;  %v2696_v34 = vmul.f32 1.442695, %v2642_v49  ;;  %2780 = vadd.xlane.f32.xlu1 %v2779_v40  ;;  %v2700_v30 = vmul.f32 1.442695, %v2644_v53 }
 0x353   : > { %v2610_v62 = vpop.xlane.xlu0 %2609 }
 0x354   : > { %5179 = vpow2.f32 %v2696_v34  ;;  %v2648_v1 = vsub.f32 %v6298_v4, %v2610_v62 }
 0x355   : > { %v2601_v24 = vpop.xlane.xlu2 %2600  ;;  %5181 = vpow2.f32 %v2686_v3 }
 0x356   : > { %v6434_v33 = vpop.eup %5175  ;;  %v2708_v26 = vmul.f32 1.442695, %v2648_v1  ;;  %v2645_v34 = vsub.f32 %v6310_v42, %v2601_v24 }
 0x357   : > { %v2613_v31 = vpop.xlane.xlu1 %2612  ;;  %v2761_v43 = vsel %vm2523_vm15, %v6434_v33, 0.0 }
 0x358   : > { %v6437_v29 = vpop.eup %5177  ;;  %v2649_v23 = vsub.f32 %v6312_v56, %v2613_v31  ;;  %2762 = vadd.xlane.f32.xlu2 %v2761_v43 }
 0x359   : > { %v2770_v27 = vsel %vm2523_vm15, %v6437_v29, 0.0 }
 0x35a   : > { %v6445_v37 = vpop.eup %5179  ;;  %v2710_v51 = vmul.f32 1.442695, %v2649_v23  ;;  %2771 = vadd.xlane.f32.xlu1 %v2770_v27 }
 0x35b   : > { %v2782_v4 = vsel %vm2523_vm15, %v6445_v37, 0.0  ;;  %v2583_v56 = vpop.xlane.xlu0 %2582  ;;  %v6449_v49 = vpop.eup %5181 }
 0x35c   : > { %5183 = vpow2.f32 %v2710_v51  ;;  %2783 = vadd.xlane.f32.xlu0 %v2782_v4  ;;  %v2639_v47 = vsub.f32 %v6308_v28, %v2583_v56  ;;  %v2767_v62 = vsel %vm2523_vm15, %v6449_v49, 0.0 }
 0x35d   : > { %v2595_v40 = vpop.xlane.xlu2 %2594  ;;  %5185 = vpow2.f32 %v2708_v26 }
 0x35e   : > { %v2643_v0 = vsub.f32 %v6304_v6, %v2595_v40  ;;  %5187 = vpow2.f32 %v2700_v30  ;;  %v2690_v23 = vmul.f32 1.442695, %v2639_v47  ;;  %v2702_v6 = vmul.f32 1.442695, %v2645_v34 }
 0x35f   : > { %v2616_v31 = vpop.xlane.xlu1 %2615 }
 0x360   : > { %v2698_v3 = vmul.f32 1.442695, %v2643_v0  ;;  %2768 = vadd.xlane.f32.xlu2 %v2767_v62  ;;  %v2650_v51 = vsub.f32 %v6320_v54, %v2616_v31 }
 0x362   : > { %v6456_v1 = vpop.eup %5183  ;;  %5189 = vpow2.f32 %v2698_v3 }
 0x363   : > { %v2803_v43 = vsel %vm2523_vm15, %v6456_v1, 0.0  ;;  %v6460_v53 = vpop.eup %5185  ;;  %v2604_v28 = vpop.xlane.xlu0 %2603  ;;  %5191 = vpow2.f32 %v2690_v23 }
 0x364   : > { %2804 = vadd.xlane.f32.xlu0 %v2803_v43  ;;  %v6463_v27 = vpop.eup %5187  ;;  %5193 = vpow2.f32 %v2702_v6  ;;  %v2646_v4 = vsub.f32 %v6322_v48, %v2604_v28  ;;  %v2800_v30 = vsel %vm2523_vm15, %v6460_v53, 0.0 }
 0x365   : > { %v2619_v42 = vpop.xlane.xlu2 %2618  ;;  %v2788_v0 = vsel %vm2523_vm15, %v6463_v27, 0.0 }
 0x366   : > { %v2651_v24 = vsub.f32 %v6330_v39, %v2619_v42  ;;  %v2712_v39 = vmul.f32 1.442695, %v2650_v51  ;;  %v2704_v54 = vmul.f32 1.442695, %v2646_v4 }
 0x367   : > { %v2607_v47 = vpop.xlane.xlu1 %2606 }
 0x368   : > { %v6466_v26 = vpop.eup %5189  ;;  %v2714_v56 = vmul.f32 1.442695, %v2651_v24  ;;  %2801 = vadd.xlane.f32.xlu2 %v2800_v30  ;;  %v2647_v3 = vsub.f32 %v6332_v61, %v2607_v47 }
 0x369   : > { %v2785_v40 = vsel %vm2523_vm15, %v6466_v26, 0.0  ;;  %v6475_v34 = vpop.eup %5191 }
 0x36a   : > { %5195 = vpow2.f32 %v2714_v56  ;;  %2786 = vadd.xlane.f32.xlu1 %v2785_v40  ;;  %v6477_v48 = vpop.eup %5193  ;;  %v2773_v31 = vsel %vm2523_vm15, %v6475_v34, 0.0  ;;  %v2706_v43 = vmul.f32 1.442695, %v2647_v3 }
 0x36b   : > { %5197 = vpow2.f32 %v2712_v39  ;;  %v2791_v23 = vsel %vm2523_vm15, %v6477_v48, 0.0 }
 0x36c   : > { %2789 = vadd.xlane.f32.xlu0 %v2788_v0  ;;  %5199 = vpow2.f32 %v2704_v54 }
 0x36d   : > { %5201 = vpow2.f32 %v2706_v43 }
 0x370   : > { %v6480_v62 = vpop.eup %5195  ;;  %2774 = vadd.xlane.f32.xlu2 %v2773_v31 }
 0x371   : > { %v2809_v6 = vsel %vm2523_vm15, %v6480_v62, 0.0  ;;  %v6488_v28 = vpop.eup %5197 }
 0x372   : > { %2792 = vadd.xlane.f32.xlu1 %v2791_v23  ;;  %6963 = vst [vmem:[#allocation13_spill] sm:$0xff] %v6488_v28  ;;  %v6490_v42 = vpop.eup %5199  ;;  %v2806_v61 = vsel %vm2523_vm15, %v6488_v28, 0.0  ;;  %v2031_v23 = vpack.c.bf16 %v6194_v13, %v6194_v13 }
 0x373   : > { %6964 = vst [vmem:[#allocation14_spill] sm:$0xff] %v6490_v42  ;;  %v2794_v24 = vsel %vm2523_vm15, %v6490_v42, 0.0  ;;  %v6496_v51 = vpop.eup %5201 }
 0x374   : > { %2810 = vadd.xlane.f32.xlu0 %v2809_v6  ;;  %6965 = vst [vmem:[#allocation15_spill] sm:$0xff] %v6496_v51  ;;  %v2797_v4 = vsel %vm2523_vm15, %v6496_v51, 0.0  ;;  %v2027_v6 = vpack.c.bf16 %v6184_v32, %v6184_v32 }
 0x376   : > { %v3140_v14 = vunpack.c.l.b16 %v2027_v6 }
 0x378   : > { %2807 = vadd.xlane.f32.xlu2 %v2806_v61 }
 0x37a   : > { %2795 = vadd.xlane.f32.xlu1 %v2794_v24 }
 0x380   : > { %2798 = vadd.xlane.f32.xlu2 %v2797_v4 }
 0x38d   : > { %v2718_v30 = vpop.xlane.xlu2 %2717 }
 0x393   : > { %v2730_v56 = vpop.xlane.xlu0 %2729 }
 0x394   : > { %5203 = vrcp.f32 %v2730_v56  ;;  %v2030_v56 = vpack.c.bf16 %v6186_v9, %v6186_v9 }
 0x395   : > { %5205 = vrcp.f32 %v2718_v30 }
 0x39a   : > { %v5204_v39 = vpop.eup %5203 }
 0x39b   : > { %v2733_v40 = vpop.xlane.xlu1 %2732  ;;  %v5206_v54 = vpop.eup %5205  ;;  %v2848_v47 = vmul.f32 %v5204_v39, %v6348_v63  ;;  %v2026_v39 = vpack.c.bf16 %v6180_v7, %v6180_v7 }
 0x39c   : > { %v2721_v0 = vpop.xlane.xlu0 %2720  ;;  %5207 = vrcp.f32 %v2733_v40  ;;  %v2844_v3 = vmul.f32 %v5206_v54, %v6342_v57 }
 0x39d   : > { %5209 = vrcp.f32 %v2721_v0  ;;  %v2880_v61 = vpack.c.bf16 %v2848_v47, %v2848_v47  ;;  %v3196_v0 = vunpack.c.l.b16 %v2031_v23  ;;  %v3139_v9 = vunpack.c.l.b16 %v2026_v39 }
 0x39e   : > { %v2876_v30 = vpack.c.bf16 %v2844_v3, %v2844_v3 }
 0x39f   : > { %v2966_v32 = vunpack.c.l.b16 %v2880_v61 }
 0x3a2   : > { %v5208_v31 = vpop.eup %5207 }
 0x3a3   : > { %v5210_v43 = vpop.eup %5209  ;;  %v2849_v24 = vmul.f32 %v5208_v31, %v6355_v5  ;;  %v2742_v4 = vpop.xlane.xlu2 %2741  ;;  %v3195_v5 = vunpack.c.l.b16 %v2030_v56  ;;  %v2910_v31 = vunpack.c.l.b16 %v2876_v30 }
 0x3a4   : > { %v2845_v63 = vmul.f32 %v5210_v43, %v6357_v50  ;;  %v2724_v40 = vpop.xlane.xlu0 %2723  ;;  %5211 = vrcp.f32 %v2742_v4  ;;  %v3141_v43 = vpack.c.b16 %v3140_v14, %v3139_v9  ;;  %v2035_v4 = vpack.c.bf16 %v6188_v10, %v6188_v10 }
 0x3a5   : > { %v2754_v57 = vpop.xlane.xlu1 %2753  ;;  %v2881_v13 = vpack.c.bf16 %v2849_v24, %v2849_v24  ;;  %5213 = vrcp.f32 %v2724_v40  ;;  %v3197_v42 = vpack.c.b16 %v3196_v0, %v3195_v5  ;;  %v2029_v40 = vpack.c.bf16 %v6198_v16, %v6198_v16 }
 0x3a6   : > { %v2877_v54 = vpack.c.bf16 %v2845_v63, %v2845_v63  ;;  %5215 = vrcp.f32 %v2754_v57  ;;  %v3252_v0 = vunpack.c.l.b16 %v2035_v4 }
 0x3a7   : > { %v2967_v47 = vunpack.c.l.b16 %v2881_v13  ;;  %v3168_v5 = vunpack.c.l.b16 %v2029_v40 }
 0x3a8   : > { %v2911_v51 = vunpack.c.l.b16 %v2877_v54 }
 0x3a9   : > { %v2968_v3 = vpack.c.b16 %v2967_v47, %v2966_v32 }
 0x3aa   : > { %v2912_v50 = vpack.c.b16 %v2911_v51, %v2910_v31  ;;  %v5212_v6 = vpop.eup %5211 }
 0x3ab   : > { %4809 = vmatmul.msk.bf16.vlgmr.msra.gmra.mxu2 %vm2523_vm15, %v2968_v3  ;;  %v2736_v28 = vpop.xlane.xlu2 %2735  ;;  %v5214_v61 = vpop.eup %5213  ;;  %v2852_v24 = vmul.f32 %v5212_v6, %v6368_v36 }
 0x3ac   : > { %v2745_v7 = vpop.xlane.xlu0 %2744  ;;  %3209 = vmatpush.bf16.msra.mxu2 %v3197_v42  ;;  %4807 = vmatmul.msk.bf16.vlgmr.msra.gmra.mxu0 %vm2523_vm15, %v2912_v50  ;;  %v2846_v51 = vmul.f32 %v5214_v61, %v6365_v20  ;;  %v5216_v14 = vpop.eup %5215  ;;  %v2034_v42 = vpack.c.bf16 %v6182_v8, %v6182_v8  ;;  %v2028_v8 = vpack.c.bf16 %v6190_v46, %v6190_v46 }
 0x3ad   : > { %v2727_v23 = vpop.xlane.xlu1 %2726  ;;  %5217 = vrcp.f32 %v2745_v7  ;;  %3153 = vmatpush.bf16.msra.mxu0 %v3141_v43  ;;  %v2884_v57 = vpack.c.bf16 %v2852_v24, %v2852_v24  ;;  %v2856_v16 = vmul.f32 %v5216_v14, %v6370_v45  ;;  %v2033_v61 = vpack.c.bf16 %v6216_v35, %v6216_v35 }
 0x3ae   : > { %5219 = vrcp.f32 %v2727_v23  ;;  %v2878_v13 = vpack.c.bf16 %v2846_v51, %v2846_v51  ;;  %v3251_v32 = vunpack.c.l.b16 %v2034_v42  ;;  %v3167_v23 = vunpack.c.l.b16 %v2028_v8 }
 0x3af   : > { %5221 = vrcp.f32 %v2736_v28  ;;  %v2888_v45 = vpack.c.bf16 %v2856_v16, %v2856_v16 }
 0x3b0   : > { %v2938_v3 = vunpack.c.l.b16 %v2878_v13  ;;  %v3253_v7 = vpack.c.b16 %v3252_v0, %v3251_v32  ;;  %v3169_v4 = vpack.c.b16 %v3168_v5, %v3167_v23  ;;  %v2036_v23 = vpack.c.bf16 %v6196_v15, %v6196_v15 }
 0x3b1   : > { %v2041_v15 = vpack.c.bf16 %v6220_v41, %v6220_v41 }
 0x3b3   : > { %v5218_v56 = vpop.eup %5217  ;;  %v2757_v30 = vpop.xlane.xlu2 %2756  ;;  %v3336_v41 = vunpack.c.l.b16 %v2041_v15 }
 0x3b4   : > { %v5220_v63 = vpop.eup %5219  ;;  %v2853_v28 = vmul.f32 %v5218_v56, %v6380_v55  ;;  %v2739_v39 = vpop.xlane.xlu0 %2738  ;;  %5223 = vrcp.f32 %v2757_v30  ;;  %v3022_v55 = vunpack.c.l.b16 %v2884_v57  ;;  %v3224_v57 = vunpack.c.l.b16 %v2033_v61 }
 0x3b5   : > { %v6523_v36 = vpop.xlane.xlu1 %2765  ;;  %v5222_v20 = vpop.eup %5221  ;;  %v2847_v10 = vmul.f32 %v5220_v63, %v6385_v22  ;;  %5225 = vrcp.f32 %v2739_v39  ;;  %v2039_v22 = vpack.c.bf16 %v6200_v17, %v6200_v17  ;;  %v2032_v63 = vpack.c.bf16 %v6202_v18, %v6202_v18 }
 0x3b6   : > { %v2885_v54 = vpack.c.bf16 %v2853_v28, %v2853_v28  ;;  %v2850_v9 = vmul.f32 %v5222_v20, %v6383_v52  ;;  %v2038_v52 = vpack.c.bf16 %v6192_v11, %v6192_v11  ;;  %v3078_v11 = vunpack.c.l.b16 %v2888_v45 }
 0x3b7   : > { %v2879_v47 = vpack.c.bf16 %v2847_v10, %v2847_v10  ;;  %v3223_v13 = vunpack.c.l.b16 %v2032_v63 }
 0x3b8   : > { %v3023_v31 = vunpack.c.l.b16 %v2885_v54  ;;  %v2882_v56 = vpack.c.bf16 %v2850_v9, %v2850_v9  ;;  %v3307_v39 = vunpack.c.l.b16 %v2038_v52 }
 0x3b9   : > { %v2939_v50 = vunpack.c.l.b16 %v2879_v47  ;;  %v3225_v18 = vpack.c.b16 %v3224_v57, %v3223_v13 }
 0x3ba   : > { %v5224_v43 = vpop.eup %5223  ;;  %v3024_v6 = vpack.c.b16 %v3023_v31, %v3022_v55 }
 0x3bb   : > { %v5226_v46 = vpop.eup %5225  ;;  %v2940_v24 = vpack.c.b16 %v2939_v50, %v2938_v3  ;;  %v2857_v51 = vmul.f32 %v5224_v43, %v6398_v44  ;;  %v2748_v14 = vpop.xlane.xlu2 %2747  ;;  %v3308_v44 = vunpack.c.l.b16 %v2039_v22  ;;  %v2037_v3 = vpack.c.bf16 %v6204_v21, %v6204_v21 }
 0x3bc   : > { %v2851_v42 = vmul.f32 %v5226_v46, %v6395_v60  ;;  %v2778_v30 = vpop.xlane.xlu0 %2777  ;;  %4811 = vmatmul.msk.bf16.vlgmr.msrb.gmra.mxu0 %vm2523_vm15, %v3024_v6  ;;  %5227 = vrcp.f32 %v2748_v14  ;;  %v2994_v60 = vunpack.c.l.b16 %v2882_v56  ;;  %v3279_v14 = vunpack.c.l.b16 %v2036_v23 }
 0x3bd   : > { %v2760_v17 = vpop.xlane.xlu1 %2759  ;;  %v2889_v35 = vpack.c.bf16 %v2857_v51, %v2857_v51  ;;  %4808 = vmatmul.msk.bf16.vlgmr.msra.gmra.mxu1 %vm2523_vm15, %v2940_v24  ;;  %3265 = vmatpush.bf16.msrb.mxu0 %v3253_v7  ;;  %5229 = vrcp.f32 %v2778_v30  ;;  %v3309_v0 = vpack.c.b16 %v3308_v44, %v3307_v39  ;;  %v3280_v61 = vunpack.c.l.b16 %v2037_v3 }
 0x3be   : > { %v2883_v40 = vpack.c.bf16 %v2851_v42, %v2851_v42  ;;  %3181 = vmatpush.bf16.msra.mxu1 %v3169_v4  ;;  %5231 = vrcp.f32 %v2760_v17 }
 0x3bf   : > { %v3079_v28 = vunpack.c.l.b16 %v2889_v35  ;;  %v3281_v42 = vpack.c.b16 %v3280_v61, %v3279_v14 }
 0x3c0   : > { %v2995_v20 = vunpack.c.l.b16 %v2883_v40 }
 0x3c1   : > { %v3080_v10 = vpack.c.b16 %v3079_v28, %v3078_v11 }
 0x3c2   : > { %v2996_v8 = vpack.c.b16 %v2995_v20, %v2994_v60  ;;  %v5228_v16 = vpop.eup %5227 }
 0x3c3   : > { %4813 = vmatmul.msk.bf16.vlgmr.msrb.gmra.mxu2 %vm2523_vm15, %v3080_v10  ;;  %v5230_v47 = vpop.eup %5229  ;;  %v2854_v5 = vmul.f32 %v5228_v16, %v6412_v19 }
 0x3c4   : > { %v2751_v54 = vpop.xlane.xlu0 %2750  ;;  %4810 = vmatmul.msk.bf16.vlgmr.msra.gmra.mxu3 %vm2523_vm15, %v2996_v8  ;;  %3321 = vmatpush.bf16.msrb.mxu2 %v3309_v0  ;;  %v2864_v55 = vmul.f32 %v5230_v47, %v6409_v38  ;;  %v5232_v31 = vpop.eup %5231 }
 0x3c5   : > { %v2781_v32 = vpop.xlane.xlu1 %2780  ;;  %5233 = vrcp.f32 %v2751_v54  ;;  %3237 = vmatpush.bf16.msra.mxu3 %v3225_v18  ;;  %v2886_v7 = vpack.c.bf16 %v2854_v5, %v2854_v5  ;;  %v2858_v45 = vmul.f32 %v5232_v31, %v6414_v2  ;;  %v2040_v2 = vpack.c.bf16 %v6210_v25, %v6210_v25 }
 0x3c6   : > { %5235 = vrcp.f32 %v2781_v32  ;;  %v2896_v6 = vpack.c.bf16 %v2864_v55, %v2864_v55 }
 0x3c7   : > { %v3050_v24 = vunpack.c.l.b16 %v2886_v7  ;;  %v3335_v28 = vunpack.c.l.b16 %v2040_v2 }
 0x3c8   : > { %v3190_v52 = vunpack.c.l.b16 %v2896_v6 }
 0x3c9   : > { %v3337_v25 = vpack.c.b16 %v3336_v41, %v3335_v28 }
 0x3cb   : > { %v5234_v9 = vpop.eup %5233  ;;  %v2763_v50 = vpop.xlane.xlu2 %2762 }
 0x3cc   : > { %v5236_v43 = vpop.eup %5235  ;;  %v2855_v22 = vmul.f32 %v5234_v9, %v6423_v12  ;;  %5237 = vrcp.f32 %v2763_v50 }
 0x3cd   : > { %v2865_v46 = vmul.f32 %v5236_v43, %v6427_v59  ;;  %5239 = vrcp.f32 %v6523_v36  ;;  %v2890_v59 = vpack.c.bf16 %v2858_v45, %v2858_v45  ;;  %v2772_v35 = vpop.xlane.xlu1 %2771 }
 0x3ce   : > { %v2887_v38 = vpack.c.bf16 %v2855_v22, %v2855_v22 }
 0x3cf   : > { %v2784_v19 = vpop.xlane.xlu0 %2783  ;;  %v2897_v21 = vpack.c.bf16 %v2865_v46, %v2865_v46  ;;  %v3106_v11 = vunpack.c.l.b16 %v2890_v59 }
 0x3d0   : > { %v3051_v51 = vunpack.c.l.b16 %v2887_v38 }
 0x3d1   : > { %v3191_v12 = vunpack.c.l.b16 %v2897_v21 }
 0x3d2   : > { %v5238_v4 = vpop.eup %5237  ;;  %v3052_v56 = vpack.c.b16 %v3051_v51, %v3050_v24 }
 0x3d3   : > { %v3192_v30 = vpack.c.b16 %v3191_v12, %v3190_v52  ;;  %v2859_v36 = vmul.f32 %v5238_v4, %v6434_v33  ;;  %v2769_v17 = vpop.xlane.xlu2 %2768  ;;  %v5240_v63 = vpop.eup %5239 }
 0x3d4   : > { %4812 = vmatmul.msk.bf16.vlgmr.msrb.gmra.mxu1 %vm2523_vm15, %v3052_v56  ;;  %5241 = vrcp.f32 %v2769_v17  ;;  %v2860_v57 = vmul.f32 %v5240_v63, %v6400_v58 }
 0x3d5   : > { %v2891_v44 = vpack.c.bf16 %v2859_v36, %v2859_v36  ;;  %4817 = vmatmul.msk.bf16.vlgmr.msra.gmra.mxu2 %vm2523_vm15, %v3192_v30  ;;  %3293 = vmatpush.bf16.msrb.mxu1 %v3281_v42  ;;  %5243 = vrcp.f32 %v2784_v19 }
 0x3d6   : > { %v2892_v20 = vpack.c.bf16 %v2860_v57, %v2860_v57 }
 0x3d7   : > { %v2805_v40 = vpop.xlane.xlu0 %2804  ;;  %v3107_v33 = vunpack.c.l.b16 %v2891_v44 }
 0x3d8   : > { %5245 = vrcp.f32 %v2805_v40  ;;  %v3134_v32 = vunpack.c.l.b16 %v2892_v20  ;;  %v6966_v40 = vld [vmem:[#allocation13_spill] sm:$0xff] }
 0x3d9   : > { %v3108_v39 = vpack.c.b16 %v3107_v33, %v3106_v11 }
 0x3da   : > { %v5242_v60 = vpop.eup %5241 }
 0x3db   : > { %v2861_v13 = vmul.f32 %v5242_v60, %v6449_v49  ;;  %4814 = vmatmul.msk.bf16.vlgmr.msrb.gmra.mxu3 %vm2523_vm15, %v3108_v39  ;;  %v2802_v10 = vpop.xlane.xlu2 %2801  ;;  %v5244_v0 = vpop.eup %5243  ;;  %v6967_v39 = vld [vmem:[#allocation14_spill] sm:$0xff] }
 0x3dc   : > { %3349 = vmatpush.bf16.msrb.mxu3 %v3337_v25  ;;  %5247 = vrcp.f32 %v2802_v10  ;;  %v2866_v5 = vmul.f32 %v5244_v0, %v6445_v37  ;;  %v6968_v10 = vld [vmem:[#allocation15_spill] sm:$0xff] }
 0x3dd   : > { %v2787_v8 = vpop.xlane.xlu1 %2786  ;;  %v2893_v54 = vpack.c.bf16 %v2861_v13, %v2861_v13 }
 0x3de   : > { %v5246_v18 = vpop.eup %5245  ;;  %5249 = vrcp.f32 %v2787_v8  ;;  %v2898_v7 = vpack.c.bf16 %v2866_v5, %v2866_v5 }
 0x3df   : > { %5251 = vrcp.f32 %v2772_v35  ;;  %v2790_v58 = vpop.xlane.xlu0 %2789  ;;  %v3135_v16 = vunpack.c.l.b16 %v2893_v54  ;;  %v2873_v47 = vmul.f32 %v5246_v18, %v6456_v1 }
 0x3e0   : > { %5253 = vrcp.f32 %v2790_v58 }
 0x3e1   : > { %v3136_v49 = vpack.c.b16 %v3135_v16, %v3134_v32  ;;  %v2905_v9 = vpack.c.bf16 %v2873_v47, %v2873_v47  ;;  %v3388_v32 = vld [vmem:[%s6928_s8] sm:$0xf]  ;;  %v3389_v47 = vld [vmem:[%s6928_s8 + $0x4] sm:$0xf] }
 0x3e2   : > { %v5248_v55 = vpop.eup %5247  ;;  %v3414_v16 = vsel %vm3412_vm1, %v3388_v32, 0  ;;  %v3452_v5 = vsel %vm3412_vm1, %v3389_v47, 0 }
 0x3e3   : > { %v2872_v3 = vmul.f32 %v5248_v55, %v6460_v53  ;;  %4815 = vmatmul.msk.bf16.vlgmr.msra.gmra.mxu0 %vm2523_vm15, %v3136_v49  ;;  %v2775_v50 = vpop.xlane.xlu2 %2774  ;;  %v3303_v19 = vunpack.c.l.b16 %v2905_v9  ;;  %v3218_v53 = vunpack.c.l.b16 %v2898_v7  ;;  %v3390_v49 = vld [vmem:[%s6928_s8 + $0x8] sm:$0xf]  ;;  %v3391_v7 = vld [vmem:[%s6928_s8 + $0xc] sm:$0xf] }
 0x3e4   : > { %v5250_v31 = vpop.eup %5249  ;;  %5255 = vrcp.f32 %v2775_v50  ;;  %3423 = vmatpush.bf16.msra.mxu0 %v3414_v16  ;;  %v3490_v55 = vsel %vm3412_vm1, %v3390_v49, 0 }
 0x3e5   : > { %v5252_v43 = vpop.eup %5251  ;;  %v2867_v22 = vmul.f32 %v5250_v31, %v6466_v26  ;;  %v2793_v23 = vpop.xlane.xlu1 %2792  ;;  %v2904_v1 = vpack.c.bf16 %v2872_v3, %v2872_v3  ;;  %3499 = vmatpush.bf16.msra.mxu2 %v3490_v55 }
 0x3e6   : > { %v5254_v6 = vpop.eup %5253  ;;  %5257 = vrcp.f32 %v2793_v23  ;;  %v2862_v38 = vmul.f32 %v5252_v43, %v6437_v29 }
 0x3e7   : > { %v2899_v46 = vpack.c.bf16 %v2867_v22, %v2867_v22  ;;  %v2811_v37 = vpop.xlane.xlu0 %2810  ;;  %v3302_v61 = vunpack.c.l.b16 %v2904_v1  ;;  %v2868_v21 = vmul.f32 %v5254_v6, %v6463_v27  ;;  %v3528_v6 = vsel %vm3412_vm1, %v3391_v7, 0 }
 0x3e8   : > { %5259 = vrcp.f32 %v2811_v37  ;;  %v2894_v52 = vpack.c.bf16 %v2862_v38, %v2862_v38 }
 0x3e9   : > { %v3219_v45 = vunpack.c.l.b16 %v2899_v46  ;;  %v3304_v24 = vpack.c.b16 %v3303_v19, %v3302_v61  ;;  %v2900_v15 = vpack.c.bf16 %v2868_v21, %v2868_v21 }
 0x3ea   : > { %v5256_v51 = vpop.eup %5255  ;;  %v3162_v30 = vunpack.c.l.b16 %v2894_v52 }
 0x3eb   : > { %v3220_v14 = vpack.c.b16 %v3219_v45, %v3218_v53  ;;  %v2863_v12 = vmul.f32 %v5256_v51, %v6475_v34  ;;  %4821 = vmatmul.msk.bf16.vlgmr.msrb.gmra.mxu2 %vm2523_vm15, %v3304_v24  ;;  %v2808_v4 = vpop.xlane.xlu2 %2807  ;;  %v3246_v63 = vunpack.c.l.b16 %v2900_v15 }
 0x3ec   : > { %v5258_v26 = vpop.eup %5257  ;;  %5261 = vrcp.f32 %v2808_v4  ;;  %v3393_v4 = vld [vmem:[%s6928_s8 + $0x14] sm:$0xf] }
 0x3ed   : > { %v2869_v29 = vmul.f32 %v5258_v26, %v6477_v48  ;;  %v2796_v56 = vpop.xlane.xlu1 %2795  ;;  %4818 = vmatmul.msk.bf16.vlgmr.msra.gmra.mxu3 %vm2523_vm15, %v3220_v14  ;;  %v2895_v59 = vpack.c.bf16 %v2863_v12, %v2863_v12 }
 0x3ee   : > { %v5260_v42 = vpop.eup %5259  ;;  %5263 = vrcp.f32 %v2796_v56  ;;  %3537 = vmatpush.bf16.msra.mxu3 %v3528_v6  ;;  %v3604_v56 = vsel %vm3412_vm1, %v3393_v4, 0 }
 0x3ef   : > { %v2901_v27 = vpack.c.bf16 %v2869_v29, %v2869_v29  ;;  %v3163_v36 = vunpack.c.l.b16 %v2895_v59  ;;  %v2875_v17 = vmul.f32 %v5260_v42, %v6480_v62 }
 0x3f1   : > { %v3247_v34 = vunpack.c.l.b16 %v2901_v27  ;;  %v3164_v2 = vpack.c.b16 %v3163_v36, %v3162_v30  ;;  %v2907_v41 = vpack.c.bf16 %v2875_v17, %v2875_v17 }
 0x3f2   : > { %v5262_v35 = vpop.eup %5261 }
 0x3f3   : > { %v3248_v44 = vpack.c.b16 %v3247_v34, %v3246_v63  ;;  %v2874_v48 = vmul.f32 %v5262_v35, %v6966_v40  ;;  %v2799_v57 = vpop.xlane.xlu2 %2798  ;;  %4816 = vmatmul.msk.bf16.vlgmr.msra.gmra.mxu1 %vm2523_vm15, %v3164_v2  ;;  %v3331_v28 = vunpack.c.l.b16 %v2907_v41  ;;  %v3392_v34 = vld [vmem:[%s6928_s8 + $0x10] sm:$0xf] }
 0x3f4   : > { %v5264_v11 = vpop.eup %5263  ;;  %5265 = vrcp.f32 %v2799_v57  ;;  %3461 = vmatpush.bf16.msra.mxu1 %v3452_v5 }
 0x3f5   : > { %4819 = vmatmul.msk.bf16.vlgmr.msrb.gmra.mxu0 %vm2523_vm15, %v3248_v44  ;;  %v2906_v33 = vpack.c.bf16 %v2874_v48, %v2874_v48  ;;  %v2870_v60 = vmul.f32 %v5264_v11, %v6967_v39  ;;  %v3566_v44 = vsel %vm3412_vm1, %v3392_v34, 0 }
 0x3f6   : > { %3575 = vmatpush.bf16.msrb.mxu0 %v3566_v44 }
 0x3f7   : > { %v3330_v62 = vunpack.c.l.b16 %v2906_v33  ;;  %v2902_v13 = vpack.c.bf16 %v2870_v60, %v2870_v60 }
 0x3f9   : > { %v3332_v25 = vpack.c.b16 %v3331_v28, %v3330_v62  ;;  %v3274_v18 = vunpack.c.l.b16 %v2902_v13 }
 0x3fa   : > { %v5266_v20 = vpop.eup %5265 }
 0x3fb   : > { %v2871_v0 = vmul.f32 %v5266_v20, %v6968_v10 }
 0x3fd   : > { %4822 = vmatmul.msk.bf16.vlgmr.msrb.gmra.mxu3 %vm2523_vm15, %v3332_v25  ;;  %v2903_v8 = vpack.c.bf16 %v2871_v0, %v2871_v0  ;;  %v3395_v0 = vld [vmem:[%s6928_s8 + $0x1c] sm:$0xf] }
 0x3ff   : > { %v3275_v54 = vunpack.c.l.b16 %v2903_v8 }
 0x401   : > { %v3276_v58 = vpack.c.b16 %v3275_v54, %v3274_v18  ;;  %v3680_v54 = vsel %vm3412_vm1, %v3395_v0, 0 }
 0x402   : > { %3689 = vmatpush.bf16.msrb.mxu3 %v3680_v54 }
 0x403   : > { %4820 = vmatmul.msk.bf16.vlgmr.msrb.gmra.mxu1 %vm2523_vm15, %v3276_v58  ;;  %v3394_v58 = vld [vmem:[%s6928_s8 + $0x18] sm:$0xf] }
 0x404   : > { %3613 = vmatpush.bf16.msrb.mxu1 %v3604_v56  ;;  %v3642_v47 = vsel %vm3412_vm1, %v3394_v58, 0 }
 0x405   : > { %3651 = vmatpush.bf16.msrb.mxu2 %v3642_v47 }
 0x429   : > { %v2931_v31 = vpop.f32.mrf.mxu0 }
 0x42a   : > { %v3356_v3 = vpack.c.bf16 %v2931_v31, %v2931_v31 }
 0x42c   : > { %v3400_v22 = vunpack.c.l.b16 %v3356_v3 }
 0x42e   : > { %v2987_v9 = vpop.f32.mrf.mxu2 }
 0x42f   : > { %v3360_v1 = vpack.c.bf16 %v2987_v9, %v2987_v9 }
 0x431   : > { %v2933_v50 = vpop.f32.mrf.mxu0  ;;  %v3439_v19 = vunpack.c.l.b16 %v3360_v1 }
 0x432   : > { %v3357_v43 = vpack.c.bf16 %v2933_v50, %v2933_v50 }
 0x434   : > { %v3401_v23 = vunpack.c.l.b16 %v3357_v43 }
 0x436   : > { %v3404_v46 = vpack.c.b16 %v3401_v23, %v3400_v22  ;;  %v2989_v37 = vpop.f32.mrf.mxu2 }
 0x437   : > { %v3361_v38 = vpack.c.bf16 %v2989_v37, %v2989_v37 }
 0x438   : > { %4823 = vmatmul.msk.bf16.vlgmr.msra.gmra.mxu0 %vm2052_vm14, %v3404_v46 }
 0x439   : > { %v3440_v61 = vunpack.c.l.b16 %v3361_v38  ;;  %v3043_v53 = vpop.f32.mrf.mxu0 }
 0x43a   : > { %v2959_v45 = vpop.f32.mrf.mxu1  ;;  %v3364_v24 = vpack.c.bf16 %v3043_v53, %v3043_v53 }
 0x43b   : > { %v3443_v21 = vpack.c.b16 %v3440_v61, %v3439_v19  ;;  %v3358_v51 = vpack.c.bf16 %v2959_v45, %v2959_v45 }
 0x43c   : > { %v3477_v15 = vunpack.c.l.b16 %v3364_v24 }
 0x43d   : > { %4825 = vmatmul.msk.bf16.vlgmr.msra.gmra.mxu1 %vm2052_vm14, %v3443_v21  ;;  %v3402_v42 = vunpack.c.l.b16 %v3358_v51 }
 0x441   : > { %v3045_v14 = vpop.f32.mrf.mxu0 }
 0x442   : > { %v2961_v26 = vpop.f32.mrf.mxu1  ;;  %v3365_v52 = vpack.c.bf16 %v3045_v14, %v3045_v14 }
 0x443   : > { %v3359_v12 = vpack.c.bf16 %v2961_v26, %v2961_v26 }
 0x444   : > { %v3478_v29 = vunpack.c.l.b16 %v3365_v52 }
 0x445   : > { %v3403_v59 = vunpack.c.l.b16 %v3359_v12 }
 0x446   : > { %v3481_v27 = vpack.c.b16 %v3478_v29, %v3477_v15  ;;  %v3099_v30 = vpop.f32.mrf.mxu2 }
 0x447   : > { %v3405_v36 = vpack.c.b16 %v3403_v59, %v3402_v42  ;;  %v3015_v17 = vpop.f32.mrf.mxu3  ;;  %v3368_v63 = vpack.c.bf16 %v3099_v30, %v3099_v30 }
 0x448   : > { %4827 = vmatmul.msk.bf16.vlgmr.msra.gmra.mxu2 %vm2052_vm14, %v3481_v27  ;;  %v3362_v2 = vpack.c.bf16 %v3015_v17, %v3015_v17 }
 0x449   : > { %4824 = vmatmul.msk.bf16.gmra.mxu0 %vm2052_vm14, %v3405_v36  ;;  %v3515_v57 = vunpack.c.l.b16 %v3368_v63 }
 0x44a   : > { %v3441_v28 = vunpack.c.l.b16 %v3362_v2 }
 0x44e   : > { %v3101_v35 = vpop.f32.mrf.mxu2 }
 0x44f   : > { %v3017_v41 = vpop.f32.mrf.mxu3  ;;  %v3369_v40 = vpack.c.bf16 %v3101_v35, %v3101_v35 }
 0x450   : > { %v3363_v48 = vpack.c.bf16 %v3017_v41, %v3017_v41 }
 0x451   : > { %v3516_v11 = vunpack.c.l.b16 %v3369_v40  ;;  %v3071_v33 = vpop.f32.mrf.mxu1 }
 0x452   : > { %v3442_v39 = vunpack.c.l.b16 %v3363_v48  ;;  %v3366_v25 = vpack.c.bf16 %v3071_v33, %v3071_v33 }
 0x453   : > { %v3519_v60 = vpack.c.b16 %v3516_v11, %v3515_v57 }
 0x454   : > { %v3444_v62 = vpack.c.b16 %v3442_v39, %v3441_v28  ;;  %v3479_v8 = vunpack.c.l.b16 %v3366_v25 }
 0x455   : > { %4829 = vmatmul.msk.bf16.vlgmr.msra.gmra.mxu3 %vm2052_vm14, %v3519_v60 }
 0x456   : > { %4826 = vmatmul.msk.bf16.gmra.mxu1 %vm2052_vm14, %v3444_v62 }
 0x458   : > { %v3211_v20 = vpop.f32.mrf.mxu2 }
 0x459   : > { %v3073_v13 = vpop.f32.mrf.mxu1  ;;  %v3376_v5 = vpack.c.bf16 %v3211_v20, %v3211_v20 }
 0x45a   : > { %v3367_v10 = vpack.c.bf16 %v3073_v13, %v3073_v13 }
 0x45b   : > { %v3591_v9 = vunpack.c.l.b16 %v3376_v5 }
 0x45c   : > { %v3480_v18 = vunpack.c.l.b16 %v3367_v10 }
 0x45e   : > { %v3482_v32 = vpack.c.b16 %v3480_v18, %v3479_v8  ;;  %v3127_v16 = vpop.f32.mrf.mxu3 }
 0x45f   : > { %v3370_v50 = vpack.c.bf16 %v3127_v16, %v3127_v16 }
 0x460   : > { %v3213_v49 = vpop.f32.mrf.mxu2  ;;  %4828 = vmatmul.msk.bf16.gmra.mxu2 %vm2052_vm14, %v3482_v32  ;;  %v3155_v55 = vpop.f32.mrf.mxu0 }
 0x461   : > { %v3377_v31 = vpack.c.bf16 %v3213_v49, %v3213_v49  ;;  %v3372_v22 = vpack.c.bf16 %v3155_v55, %v3155_v55  ;;  %v3517_v1 = vunpack.c.l.b16 %v3370_v50 }
 0x463   : > { %v3592_v3 = vunpack.c.l.b16 %v3377_v31  ;;  %v3553_v38 = vunpack.c.l.b16 %v3372_v22 }
 0x465   : > { %v3595_v43 = vpack.c.b16 %v3592_v3, %v3591_v9 }
 0x466   : > { %v3129_v7 = vpop.f32.mrf.mxu3 }
 0x467   : > { %4833 = vmatmul.msk.bf16.vlgmr.msrb.gmra.mxu1 %vm2052_vm14, %v3595_v43  ;;  %v3371_v23 = vpack.c.bf16 %v3129_v7, %v3129_v7 }
 0x468   : > { %v3157_v6 = vpop.f32.mrf.mxu0 }
 0x469   : > { %v3518_v46 = vunpack.c.l.b16 %v3371_v23  ;;  %v3373_v37 = vpack.c.bf16 %v3157_v6, %v3157_v6 }
 0x46b   : > { %v3520_v19 = vpack.c.b16 %v3518_v46, %v3517_v1  ;;  %v3554_v61 = vunpack.c.l.b16 %v3373_v37 }
 0x46d   : > { %v3557_v53 = vpack.c.b16 %v3554_v61, %v3553_v38  ;;  %4830 = vmatmul.msk.bf16.gmra.mxu3 %vm2052_vm14, %v3520_v19 }
 0x46e   : > { %v3323_v45 = vpop.f32.mrf.mxu2 }
 0x46f   : > { %4831 = vmatmul.msk.bf16.vlgmr.msrb.gmra.mxu0 %vm2052_vm14, %v3557_v53  ;;  %v3384_v14 = vpack.c.bf16 %v3323_v45, %v3323_v45 }
 0x470   : > { %v3239_v21 = vpop.f32.mrf.mxu3  ;;  %v3183_v24 = vpop.f32.mrf.mxu1 }
 0x471   : > { %v3378_v26 = vpack.c.bf16 %v3239_v21, %v3239_v21  ;;  %v3374_v12 = vpack.c.bf16 %v3183_v24, %v3183_v24  ;;  %v3667_v59 = vunpack.c.l.b16 %v3384_v14 }
 0x472   : > { %v3267_v51 = vpop.f32.mrf.mxu0 }
 0x473   : > { %v3380_v29 = vpack.c.bf16 %v3267_v51, %v3267_v51  ;;  %v3593_v17 = vunpack.c.l.b16 %v3378_v26  ;;  %v3555_v2 = vunpack.c.l.b16 %v3374_v12 }
 0x475   : > { %v3629_v41 = vunpack.c.l.b16 %v3380_v29 }
 0x476   : > { %v3325_v52 = vpop.f32.mrf.mxu2 }
 0x477   : > { %v3385_v15 = vpack.c.bf16 %v3325_v52, %v3325_v52 }
 0x478   : > { %v3241_v4 = vpop.f32.mrf.mxu3  ;;  %v3185_v42 = vpop.f32.mrf.mxu1 }
 0x479   : > { %v3379_v56 = vpack.c.bf16 %v3241_v4, %v3241_v4  ;;  %v3668_v27 = vunpack.c.l.b16 %v3385_v15  ;;  %v3375_v30 = vpack.c.bf16 %v3185_v42, %v3185_v42 }
 0x47a   : > { %v3269_v36 = vpop.f32.mrf.mxu0 }
 0x47b   : > { %v3594_v63 = vunpack.c.l.b16 %v3379_v56  ;;  %v3381_v34 = vpack.c.bf16 %v3269_v36, %v3269_v36  ;;  %v3671_v35 = vpack.c.b16 %v3668_v27, %v3667_v59  ;;  %v3556_v44 = vunpack.c.l.b16 %v3375_v30 }
 0x47d   : > { %v3596_v40 = vpack.c.b16 %v3594_v63, %v3593_v17  ;;  %v3630_v48 = vunpack.c.l.b16 %v3381_v34  ;;  %v3558_v57 = vpack.c.b16 %v3556_v44, %v3555_v2  ;;  %4837 = vmatmul.msk.bf16.vlgmr.msrb.gmra.mxu3 %vm2052_vm14, %v3671_v35  ;;  %v6646_v35 = vld [vmem:[%s6929_s9] ss:$0 sm:$0xff] }
 0x47f   : > { %v3633_v11 = vpack.c.b16 %v3630_v48, %v3629_v41  ;;  %4834 = vmatmul.msk.bf16.gmra.mxu1 %vm2052_vm14, %v3596_v40  ;;  %4832 = vmatmul.msk.bf16.gmra.mxu0 %vm2052_vm14, %v3558_v57 }
 0x480   : > { %v3351_v33 = vpop.f32.mrf.mxu3  ;;  %v3295_v28 = vpop.f32.mrf.mxu1 }
 0x481   : > { %4835 = vmatmul.msk.bf16.vlgmr.msrb.gmra.mxu2 %vm2052_vm14, %v3633_v11  ;;  %v3386_v39 = vpack.c.bf16 %v3351_v33, %v3351_v33  ;;  %v3382_v60 = vpack.c.bf16 %v3295_v28, %v3295_v28 }
 0x483   : > { %v3669_v10 = vunpack.c.l.b16 %v3386_v39  ;;  %v3631_v8 = vunpack.c.l.b16 %v3382_v60 }
 0x488   : > { %v3353_v62 = vpop.f32.mrf.mxu3  ;;  %v3297_v20 = vpop.f32.mrf.mxu1 }
 0x489   : > { %v3387_v25 = vpack.c.bf16 %v3353_v62, %v3353_v62  ;;  %v3383_v13 = vpack.c.bf16 %v3297_v20, %v3297_v20 }
 0x48b   : > { %v3670_v0 = vunpack.c.l.b16 %v3387_v25  ;;  %v3632_v18 = vunpack.c.l.b16 %v3383_v13 }
 0x48d   : > { %v3672_v54 = vpack.c.b16 %v3670_v0, %v3669_v10  ;;  %v3634_v58 = vpack.c.b16 %v3632_v18, %v3631_v8  ;;  %v5291_v0 = vld [vmem:[%s5530_s20] sm:$0xff] }
 0x48f   : > { %4838 = vmatmul.msk.bf16.gmra.mxu3 %vm2052_vm14, %v3672_v54 }
 0x491   : > { %4836 = vmatmul.msk.bf16.gmra.mxu2 %vm2052_vm14, %v3634_v58 }
 0x4b5   : > { %v3425_v32 = vpop.f32.mrf.mxu0 }
 0x4b6   : > { %v3701_v46 = vsel %vm581_vm0, %v3425_v32, 0.0 }
 0x4ba   : > { %v3463_v16 = vpop.f32.mrf.mxu1 }
 0x4bb   : > { %v3702_v1 = vsel %vm581_vm0, %v3463_v16, 0.0 }
 0x4bc   : > { %v3703_v19 = vadd.f32 %v3702_v1, %v3701_v46 }
 0x4bd   : > { %v3427_v47 = vpop.f32.mrf.mxu0 }
 0x4be   : > { %v3716_v12 = vsel %vm581_vm0, %v3427_v47, 0.0 }
 0x4c2   : > { %v3465_v49 = vpop.f32.mrf.mxu1 }
 0x4c3   : > { %v3717_v26 = vsel %vm581_vm0, %v3465_v49, 0.0 }
 0x4c4   : > { %v3718_v29 = vadd.f32 %v3717_v26, %v3716_v12 }
 0x4c6   : > { %v3430_v31 = vpop.f32.mrf.mxu0 }
 0x4c7   : > { %v3731_v11 = vsel %vm581_vm0, %v3430_v31, 0.0 }
 0x4cb   : > { %v3501_v55 = vpop.f32.mrf.mxu2 }
 0x4cc   : > { %v3704_v37 = vsel %vm581_vm0, %v3501_v55, 0.0 }
 0x4cd   : > { %v3705_v53 = vadd.f32 %v3704_v37, %v3703_v19 }
 0x4ce   : > { %v3432_v43 = vpop.f32.mrf.mxu0 }
 0x4d3   : > { %v3468_v9 = vpop.f32.mrf.mxu1  ;;  %v3503_v50 = vpop.f32.mrf.mxu2 }
 0x4d4   : > { %v3719_v4 = vsel %vm581_vm0, %v3503_v50, 0.0  ;;  %v3732_v44 = vsel %vm581_vm0, %v3468_v9, 0.0  ;;  %v3746_v9 = vsel %vm581_vm0, %v3432_v43, 0.0 }
 0x4d5   : > { %v3720_v59 = vadd.f32 %v3719_v4, %v3718_v29  ;;  %v3733_v39 = vadd.f32 %v3732_v44, %v3731_v11 }
 0x4d8   : > { %v3539_v5 = vpop.f32.mrf.mxu3 }
 0x4d9   : > { %v3706_v61 = vsel %vm581_vm0, %v3539_v5, 0.0 }
 0x4da   : > { %v3707_v51 = vadd.f32 %v3706_v61, %v3705_v53  ;;  %v5292_v61 = vld [vmem:[%s5530_s20 + $0x8] sm:$0xff] }
 0x4db   : > { %v3470_v22 = vpop.f32.mrf.mxu1 }
 0x4dc   : > { %v3747_v5 = vsel %vm581_vm0, %v3470_v22, 0.0 }
 0x4dd   : > { %v3748_v50 = vadd.f32 %v3747_v5, %v3746_v9  ;;  %v4865_v5 = vld [vmem:[%s6932_s12 + $0x30] sm:$0xf]  ;;  %v4867_v9 = vld [vmem:[%s6932_s12 + $0x38] sm:$0xf0] }
 0x4e0   : > { %v3541_v3 = vpop.f32.mrf.mxu3 }
 0x4e1   : > { %v3721_v56 = vsel %vm581_vm0, %v3541_v3, 0.0 }
 0x4e2   : > { %v3722_v63 = vadd.f32 %v3721_v56, %v3720_v59 }
 0x4e3   : > { %v3506_v23 = vpop.f32.mrf.mxu2 }
 0x4e4   : > { %v3615_v45 = vpop.f32.mrf.mxu1  ;;  %v3734_v33 = vsel %vm581_vm0, %v3506_v23, 0.0 }
 0x4e5   : > { %v3710_v42 = vsel %vm581_vm0, %v3615_v45, 0.0  ;;  %v3735_v20 = vadd.f32 %v3734_v33, %v3733_v39 }
 0x4eb   : > { %v3508_v21 = vpop.f32.mrf.mxu2 }
 0x4ec   : > { %v3577_v6 = vpop.f32.mrf.mxu0  ;;  %v3617_v34 = vpop.f32.mrf.mxu1  ;;  %v3749_v3 = vsel %vm581_vm0, %v3508_v21, 0.0 }
 0x4ed   : > { %v3708_v24 = vsel %vm581_vm0, %v3577_v6, 0.0  ;;  %v3725_v62 = vsel %vm581_vm0, %v3617_v34, 0.0  ;;  %v3750_v22 = vadd.f32 %v3749_v3, %v3748_v50  ;;  %v4857_v50 = vld [vmem:[%s6932_s12 + $0x20] sm:$0xf] }
 0x4ee   : > { %v3709_v52 = vadd.f32 %v3708_v24, %v3707_v51 }
 0x4f0   : > { %v3544_v7 = vpop.f32.mrf.mxu3  ;;  %v3711_v30 = vadd.f32 %v3710_v42, %v3709_v52  ;;  %v5293_v42 = vld [vmem:[%s5530_s20 + $0x10] sm:$0xff] }
 0x4f1   : > { %v3736_v25 = vsel %vm581_vm0, %v3544_v7, 0.0 }
 0x4f2   : > { %v3737_v58 = vadd.f32 %v3736_v25, %v3735_v20 }
 0x4f4   : > { %v3579_v14 = vpop.f32.mrf.mxu0 }
 0x4f5   : > { %v3723_v36 = vsel %vm581_vm0, %v3579_v14, 0.0 }
 0x4f6   : > { %v3724_v40 = vadd.f32 %v3723_v36, %v3722_v63 }
 0x4f8   : > { %v3546_v38 = vpop.f32.mrf.mxu3  ;;  %v3726_v10 = vadd.f32 %v3725_v62, %v3724_v40 }
 0x4f9   : > { %v3751_v1 = vsel %vm581_vm0, %v3546_v38, 0.0 }
 0x4fa   : > { %v3752_v21 = vadd.f32 %v3751_v1, %v3750_v22 }
 0x4fc   : > { %v3582_v48 = vpop.f32.mrf.mxu0  ;;  %v3620_v32 = vpop.f32.mrf.mxu1 }
 0x4fd   : > { %v3738_v18 = vsel %vm581_vm0, %v3582_v48, 0.0  ;;  %v3740_v46 = vsel %vm581_vm0, %v3620_v32, 0.0  ;;  %v6969_v48 = vld [vmem:[#allocation12_spill] sm:$0xff] }
 0x4fe   : > { %v3739_v55 = vadd.f32 %v3738_v18, %v3737_v58 }
 0x500   : > { %v3691_v15 = vpop.f32.mrf.mxu3  ;;  %v3741_v19 = vadd.f32 %v3740_v46, %v3739_v55  ;;  %v5048_v55 = vld [vmem:[%s6932_s12 + $0x34] sm:$0xf]  ;;  %v4859_v46 = vld [vmem:[%s6932_s12 + $0x28] sm:$0xf0] }
 0x501   : > { %v3714_v41 = vsel %vm581_vm0, %v3691_v15, 0.0  ;;  %v4870_v3 = vor.u32 %v5048_v55, %v4867_v9  ;;  %v5295_v55 = vld [vmem:[%s5525_s17] ss:$0 sm:$0xff] }
 0x503   : > { %3976 = vmatpush.bf16.msra.mxu1 %v4870_v3  ;;  %v3884_v3 = vstv %s6777_s28 }
 0x504   : > { %v3653_v27 = vpop.f32.mrf.mxu2  ;;  %v3584_v7 = vpop.f32.mrf.mxu0 }
 0x505   : > { %v3712_v17 = vsel %vm581_vm0, %v3653_v27, 0.0  ;;  %v3753_v43 = vsel %vm581_vm0, %v3584_v7, 0.0  ;;  %v3622_v14 = vpop.f32.mrf.mxu1  ;;  %v5047_v7 = vld [vmem:[%s6932_s12 + $0x24] sm:$0xf0] }
 0x506   : > { %v3713_v2 = vadd.f32 %v3712_v17, %v3711_v30  ;;  %v3754_v26 = vadd.f32 %v3753_v43, %v3752_v21  ;;  %v3755_v4 = vsel %vm581_vm0, %v3622_v14, 0.0  ;;  %v4858_v1 = vor.u32 %v5047_v7, %v4857_v50  ;;  %v5045_v43 = vld [vmem:[%s6932_s12 + $0x14] sm:$0xf0]  ;;  %v5044_v21 = vld [vmem:[%s6932_s12 + $0x14] sm:$0xf] }
 0x507   : > { %v5043_v14 = vld [vmem:[%s6932_s12 + $0x4] sm:$0xf0] }
 0x508   : > { %v3715_v57 = vadd.f32 %v3714_v41, %v3713_v2  ;;  %v3693_v28 = vpop.f32.mrf.mxu3  ;;  %v3756_v56 = vadd.f32 %v3755_v4, %v3754_v26  ;;  %v5294_v2 = vld [vmem:[%s5530_s20 + $0x18] sm:$0xff]  ;;  %v5042_v26 = vld [vmem:[%s6932_s12 + $0x4] sm:$0xf]  ;;  %v4843_v4 = vld [vmem:[%s6932_s12 + $0x8] sm:$0xf0]  ;;  %s4259_s20 = sshll.u32 %s545_s18, 4  ;;  %s4260_s20 = int_to_ptr.vmem [resolvable:$true] %s4259_s20 }
 0x509   : > { %v3729_v49 = vsel %vm581_vm0, %v3693_v28, 0.0 }
 0x50a   : > { %v3765_v60 = vadd.f32 %v6646_v35, %v3715_v57 }
 0x50c   : > { %v3655_v13 = vpop.f32.mrf.mxu2  ;;  %v6656_v8 = vadd.f32 %v5291_v0, %v3765_v60 }
 0x50d   : > { %v3727_v54 = vsel %vm581_vm0, %v3655_v13, 0.0 }
 0x50e   : > { %v3728_v16 = vadd.f32 %v3727_v54, %v3726_v10  ;;  %v3778_v47 = vsel %vm581_vm0, %v6656_v8, 0.0 }
 0x50f   : > { %3779 = vadd.xlane.f32.xlu0 %v3778_v47 }
 0x510   : > { %v3730_v31 = vadd.f32 %v3729_v49, %v3728_v16  ;;  %v5049_v49 = vld [vmem:[%s6932_s12 + $0x34] sm:$0xf0] }
 0x512   : > { %v3766_v23 = vadd.f32 %v6646_v35, %v3730_v31  ;;  %v3696_v6 = vpop.f32.mrf.mxu3  ;;  %v4866_v31 = vor.u32 %v5049_v49, %v4865_v5 }
 0x513   : > { %v3744_v38 = vsel %vm581_vm0, %v3696_v6, 0.0 }
 0x514   : > { %v3658_v37 = vpop.f32.mrf.mxu2  ;;  %v6670_v53 = vadd.f32 %v5292_v61, %v3766_v23  ;;  %3957 = vmatpush.bf16.msra.mxu0 %v4866_v31  ;;  %v5046_v23 = vld [vmem:[%s6932_s12 + $0x24] sm:$0xf]  ;;  %v4849_v61 = vld [vmem:[%s6932_s12 + $0x10] sm:$0xf] }
 0x515   : > { %v3742_v45 = vsel %vm581_vm0, %v3658_v37, 0.0  ;;  %v4862_v37 = vor.u32 %v5046_v23, %v4859_v46 }
 0x516   : > { %v3743_v24 = vadd.f32 %v3742_v45, %v3741_v19  ;;  %v3781_v51 = vsel %vm581_vm0, %v6670_v53, 0.0  ;;  %v4850_v45 = vor.u32 %v5045_v43, %v4849_v61 }
 0x517   : > { %3782 = vadd.xlane.f32.xlu1 %v3781_v51  ;;  %3977 = vmatpush.bf16.msra.mxu1 %v4862_v37 }
 0x518   : > { %v3745_v52 = vadd.f32 %v3744_v38, %v3743_v24  ;;  %3958 = vmatpush.bf16.msra.mxu0 %v4858_v1  ;;  %v4851_v24 = vld [vmem:[%s6932_s12 + $0x18] sm:$0xf0]  ;;  %v4841_v38 = vld [vmem:[%s6932_s12] sm:$0xf]  ;;  %v3885_v1 = vmul.f32 %v5295_v55, %v3884_v3 }
 0x519   : > { %v4854_v51 = vor.u32 %v5044_v21, %v4851_v24 }
 0x51a   : > { %v3767_v12 = vadd.f32 %v6646_v35, %v3745_v52  ;;  %v3698_v15 = vpop.f32.mrf.mxu3 }
 0x51b   : > { %v3759_v17 = vsel %vm581_vm0, %v3698_v15, 0.0  ;;  %3978 = vmatpush.bf16.msra.mxu1 %v4854_v51 }
 0x51c   : > { %v3660_v29 = vpop.f32.mrf.mxu2  ;;  %v6680_v59 = vadd.f32 %v5293_v42, %v3767_v12  ;;  %3959 = vmatpush.bf16.msra.mxu0 %v4850_v45  ;;  %v4842_v12 = vor.u32 %v5043_v14, %v4841_v38 }
 0x51d   : > { %v3757_v27 = vsel %vm581_vm0, %v3660_v29, 0.0  ;;  %v4846_v29 = vor.u32 %v5042_v26, %v4843_v4 }
 0x51e   : > { %v3758_v30 = vadd.f32 %v3757_v27, %v3756_v56  ;;  %v3784_v36 = vsel %vm581_vm0, %v6680_v59, 0.0 }
 0x51f   : > { %3785 = vadd.xlane.f32.xlu2 %v3784_v36  ;;  %3979 = vmatpush.bf16.msra.mxu1 %v4846_v29 }
 0x520   : > { %v3760_v63 = vadd.f32 %v3759_v17, %v3758_v30  ;;  %3960 = vmatpush.bf16.msra.mxu0 %v4842_v12 }
 0x522   : > { %v3768_v34 = vadd.f32 %v6646_v35, %v3760_v63 }
 0x524   : > { %v6688_v44 = vadd.f32 %v5294_v2, %v3768_v34 }
 0x526   : > { %v3787_v41 = vsel %vm581_vm0, %v6688_v44, 0.0 }
 0x527   : > { %3788 = vadd.xlane.f32.xlu0 %v3787_v41 }
 0x582   : > { %v3780_v40 = vpop.xlane.xlu0 %3779 }
 0x583   : > { %v3790_v57 = vmul.f32 %v3780_v40, %v6969_v48 }
 0x585   : > { %v6694_v11 = vsub.f32 %v6656_v8, %v3790_v57 }
 0x587   : > { %v3798_v33 = vmul.f32 %v6694_v11, %v6694_v11 }
 0x589   : > { %v3802_v28 = vsel %vm581_vm0, %v3798_v33, 0.0 }
 0x58a   : > { %3803 = vadd.xlane.f32.xlu1 %v3802_v28  ;;  %v3783_v35 = vpop.xlane.xlu1 %3782 }
 0x58b   : > { %v3791_v39 = vmul.f32 %v3783_v35, %v6969_v48  ;;  %v5126_v35 = vld [vmem:[%s6930_s10] ss:$0 sm:$0xff] }
 0x58d   : > { %v6701_v60 = vsub.f32 %v6670_v53, %v3791_v39 }
 0x58f   : > { %v3799_v62 = vmul.f32 %v6701_v60, %v6701_v60 }
 0x591   : > { %v3805_v25 = vsel %vm581_vm0, %v3799_v62, 0.0 }
 0x592   : > { %3806 = vadd.xlane.f32.xlu2 %v3805_v25  ;;  %v3786_v20 = vpop.xlane.xlu2 %3785 }
 0x593   : > { %v3792_v13 = vmul.f32 %v3786_v20, %v6969_v48 }
 0x595   : > { %v6708_v10 = vsub.f32 %v6680_v59, %v3792_v13 }
 0x597   : > { %v3800_v0 = vmul.f32 %v6708_v10, %v6708_v10 }
 0x599   : > { %v3808_v18 = vsel %vm581_vm0, %v3800_v0, 0.0 }
 0x59a   : > { %3809 = vadd.xlane.f32.xlu0 %v3808_v18  ;;  %v3789_v54 = vpop.xlane.xlu0 %3788  ;;  %v5127_v18 = vld [vmem:[%s6931_s11] ss:$0 sm:$0xff] }
 0x59b   : > { %v3793_v58 = vmul.f32 %v3789_v54, %v6969_v48 }
 0x59d   : > { %v6715_v32 = vsub.f32 %v6688_v44, %v3793_v58 }
 0x59f   : > { %v3801_v16 = vmul.f32 %v6715_v32, %v6715_v32 }
 0x5a1   : > { %v3811_v47 = vsel %vm581_vm0, %v3801_v16, 0.0  ;;  %v3773_v16 = vstv %s6771_s29 }
 0x5a2   : > { %3812 = vadd.xlane.f32.xlu1 %v3811_v47 }
 0x5fd   : > { %v3804_v6 = vpop.xlane.xlu1 %3803 }
 0x5fe   : > { %v3814_v22 = vmul.f32 %v3804_v6, %v6969_v48 }
 0x600   : > { %v3818_v19 = vadd.f32 1e-05, %v3814_v22 }
 0x602   : > { %5267 = vrsqrt.f32 %v3818_v19  ;;  %vm3828_vm3 = vweird.f32 %v3818_v19 }
 0x605   : > { %v3807_v52 = vpop.xlane.xlu2 %3806 }
 0x606   : > { %v3815_v15 = vmul.f32 %v3807_v52, %v6969_v48 }
 0x608   : > { %v5268_v56 = vpop.eup %5267  ;;  %v3819_v42 = vadd.f32 1e-05, %v3815_v15  ;;  %v5296_v15 = vld [vmem:[%s5525_s17 + $0x1] ss:$0 sm:$0xff]  ;;  %s5067_s17 = sshll.u32 %s5490_s25, 5  ;;  %s4246_s25 = scalar_lea.sflag [#allocation3], %s543_s23 }
 0x609   : > { %v3823_v27 = vmul.f32 %v5268_v56, %v3818_v19  ;;  %vm3829_vm2 = vweird.f32 %v5268_v56  ;;  %v3775_v29 = vmul.f32 %v5296_v15, %v3773_v16  ;;  %s4258_s29 = scalar_lea.hbm %s6936_s16, %s5067_s17  ;;  %s5332_s17 = scalar_lea.hbm %s6936_s16, 64 }
 0x60a   : > { %5269 = vrsqrt.f32 %v3819_v42  ;;  %vm3830_vm4 = vmor %vm3828_vm3, %vm3829_vm2  ;;  %vm3838_vm6 = vweird.f32 %v3819_v42  ;;  %s4261_s26 = sshll.u32 %s4258_s29, 4  ;;  %s4262_s26 = int_to_ptr.hbm [resolvable:$true] %s4261_s26 }
 0x60b   : > { %v3824_v30 = vmul.f32 %v5268_v56, %v3823_v27  ;;  %s5326_s28 = sshra.s32 %s4262_s26, 4  ;;  %s5327_s28 = int_to_ptr.hbm [resolvable:$true] %s5326_s28 }
 0x60c   : > { %s5328_s1 = scalar_lea.hbm %s5327_s28, 32  ;;  %p5333_p3 = scmp.lt.s32.totalorder %s5327_s28, %s6936_s16 }
 0x60d   : > { %v3825_v36 = vmul.f32 0.5, %v3824_v30  ;;  %v3810_v17 = vpop.xlane.xlu0 %3809  ;;  %v3886_v30 = vmul.f32 %v5296_v15, %v3884_v3  ;;  %p5329_p0 = scmp.ne.s32.totalorder %s5327_s28, %s5328_s1  ;;  %p5334_p4 = scmp.lt.s32.totalorder %s5332_s17, %s5328_s1 }
 0x60e   : > { %v3816_v63 = vmul.f32 %v3810_v17, %v6969_v48 }
 0x60f   : > { %v3826_v34 = vsub.f32 1.5, %v3825_v36  ;;  %p5330_p1 = pnand %p5329_p0, %p5507_p5  ;;  %p5335_p7 = por %p5334_p4, %p5333_p3 }
 0x610   : > { %v5270_v2 = vpop.eup %5269  ;;  %v3820_v41 = vadd.f32 1e-05, %v3816_v63 }
 0x611   : > { %v3827_v40 = vmul.f32 %v5268_v56, %v3826_v34  ;;  %v3833_v57 = vmul.f32 %v5270_v2, %v3819_v42  ;;  %vm3839_vm5 = vweird.f32 %v5270_v2  ;;  %p5331_p2 = pneg %p5330_p1 }
 0x612   : > { %5271 = vrsqrt.f32 %v3820_v41  ;;  %vm3840_vm7 = vmor %vm3838_vm6, %vm3839_vm5  ;;  %vm3848_vm9 = vweird.f32 %v3820_v41 }
 0x613   : > { %v3831_v33 = vsel %vm3830_vm4, %v5268_v56, %v3827_v40  ;;  %v3834_v28 = vmul.f32 %v5270_v2, %v3833_v57  ;;  %v5064_v40 = vld [vmem:[%s6934_s14 + $0x70] sm:$0xff]  ;;  %v5055_v57 = vld [vmem:[%s6934_s14 + $0x28] sm:$0xff]  ;;  %p5336_p8 = pnand %p5335_p7, %p5331_p2 }
 0x614   : > { %v3862_v39 = vmul.f32 %v3831_v33, %v6694_v11  ;;  %v5063_v33 = vld [vmem:[%s6934_s14 + $0x68] sm:$0xff] }
 0x615   : > { %v3835_v62 = vmul.f32 0.5, %v3834_v28  ;;  %v3813_v25 = vpop.xlane.xlu1 %3812  ;;  %v5054_v28 = vld [vmem:[%s6934_s14 + $0x20] sm:$0xff] }
 0x616   : > { %v3817_v20 = vmul.f32 %v3813_v25, %v6969_v48  ;;  %v3869_v54 = vmul.f32 %v5126_v35, %v3862_v39  ;;  %v3774_v48 = vmul.f32 %v5295_v55, %v3773_v16  ;;  %v5053_v39 = vld [vmem:[%s6934_s14 + $0x18] sm:$0xff]  ;;  %v5052_v25 = vld [vmem:[%s6934_s14 + $0x10] sm:$0xff]  ;;  %v5058_v55 = vld [vmem:[%s6934_s14 + $0x40] sm:$0xff] }
 0x617   : > { %v3836_v13 = vsub.f32 1.5, %v3835_v62  ;;  %v5061_v62 = vld [vmem:[%s6934_s14 + $0x58] sm:$0xff] }
 0x618   : > { %v5272_v0 = vpop.eup %5271  ;;  %v3821_v58 = vadd.f32 1e-05, %v3817_v20  ;;  %v3876_v31 = vadd.f32 %v5127_v18, %v3869_v54  ;;  %v5060_v20 = vld [vmem:[%s6934_s14 + $0x50] sm:$0xff]  ;;  %v5051_v54 = vld [vmem:[%s6934_s14 + $0x8] sm:$0xff] }
 0x619   : > { %v3837_v47 = vmul.f32 %v5270_v2, %v3836_v13  ;;  %v3843_v11 = vmul.f32 %v5272_v0, %v3820_v41  ;;  %vm3849_vm8 = vweird.f32 %v5272_v0  ;;  %v5056_v41 = vld [vmem:[%s6934_s14 + $0x30] sm:$0xff]  ;;  %v3901_v13 = vld [vmem:[%s6933_s13] sm:$0x3] }
 0x61a   : > { %5273 = vrsqrt.f32 %v3821_v58  ;;  %v3880_v46 = vmul.f32 %v3876_v31, %v3774_v48  ;;  %vm3850_vm10 = vmor %vm3848_vm9, %vm3849_vm8  ;;  %vm3858_vm12 = vweird.f32 %v3821_v58 }
 0x61b   : > { %v3841_v5 = vsel %vm3840_vm7, %v5270_v2, %v3837_v47  ;;  %v3844_v49 = vmul.f32 %v5272_v0, %v3843_v11  ;;  %v5057_v2 = vld [vmem:[%s6934_s14 + $0x38] sm:$0xff] }
 0x61c   : > { %v3863_v9 = vmul.f32 %v3841_v5, %v6701_v60  ;;  %v3887_v21 = vadd.f32 %v3885_v1, %v3880_v46  ;;  %4199 = vmatpush.bf16.msra.mxu2 %v5057_v2 }
 0x61d   : > { %v3845_v50 = vmul.f32 0.5, %v3844_v49  ;;  %v5050_v49 = vld [vmem:[%s6934_s14] sm:$0xff] }
 0x61e   : > { %v3870_v7 = vmul.f32 %v5126_v35, %v3863_v9 }
 0x61f   : > { %v3846_v23 = vsub.f32 1.5, %v3845_v50 }
 0x620   : > { %v5274_v6 = vpop.eup %5273  ;;  %v3877_v22 = vadd.f32 %v5127_v18, %v3870_v7  ;;  %4200 = vmatpush.bf16.msra.mxu2 %v5056_v41 }
 0x621   : > { %v3847_v37 = vmul.f32 %v5272_v0, %v3846_v23  ;;  %v3853_v19 = vmul.f32 %v5274_v6, %v3821_v58  ;;  %vm3859_vm11 = vweird.f32 %v5274_v6  ;;  %v5059_v58 = vld [vmem:[%s6934_s14 + $0x48] sm:$0xff] }
 0x622   : > { %v3881_v61 = vmul.f32 %v3877_v22, %v3774_v48  ;;  %vm3860_vm13 = vmor %vm3858_vm12, %vm3859_vm11 }
 0x623   : > { %v3851_v43 = vsel %vm3850_vm10, %v5272_v0, %v3847_v37  ;;  %v3854_v45 = vmul.f32 %v5274_v6, %v3853_v19  ;;  %v3903_v0 = vperm.slane %v3901_v13, 0 }
 0x624   : > { %v3888_v24 = vadd.f32 %v3885_v1, %v3881_v61  ;;  %v3864_v60 = vmul.f32 %v3851_v43, %v6708_v10  ;;  %4201 = vmatpush.bf16.msra.mxu2 %v5055_v57 }
 0x625   : > { %v3855_v51 = vmul.f32 0.5, %v3854_v45 }
 0x626   : > { %v3891_v38 = vpack.c.bf16 %v3888_v24, %v3887_v21  ;;  %v3871_v26 = vmul.f32 %v5126_v35, %v3864_v60 }
 0x627   : > { %v3856_v14 = vsub.f32 1.5, %v3855_v51 }
 0x628   : > { %4871 = vmatmul.msk.bf16.vlgmr.msra.gmra.mxu0 %vm581_vm0, %v3891_v38  ;;  %4873 = vmatmul.msk.bf16.vlgmr.msra.gmra.mxu1 %vm581_vm0, %v3891_v38  ;;  %v3878_v56 = vadd.f32 %v5127_v18, %v3871_v26 }
 0x629   : > { %v3857_v52 = vmul.f32 %v5274_v6, %v3856_v14  ;;  %4202 = vmatpush.bf16.msra.mxu2 %v5054_v28 }
 0x62a   : > { %v3882_v27 = vmul.f32 %v3878_v56, %v3775_v29 }
 0x62b   : > { %v3861_v12 = vsel %vm3860_vm13, %v5274_v6, %v3857_v52 }
 0x62c   : > { %v3865_v4 = vmul.f32 %v3861_v12, %v6715_v32  ;;  %v3889_v17 = vadd.f32 %v3886_v30, %v3882_v27  ;;  %v5065_v32 = vld [vmem:[%s6934_s14 + $0x78] sm:$0xff] }
 0x62d   : > { %4218 = vmatpush.bf16.msra.mxu3 %v5065_v32  ;;  %4203 = vmatpush.bf16.msra.mxu2 %v5053_v39 }
 0x62e   : > { %v3872_v42 = vmul.f32 %v5126_v35, %v3865_v4  ;;  %v5062_v35 = vld [vmem:[%s6934_s14 + $0x60] sm:$0xff] }
 0x630   : > { %v3879_v10 = vadd.f32 %v5127_v18, %v3872_v42  ;;  %v3904_v18 = vperm.slane %v3901_v13, 1 }
 0x631   : > { %4219 = vmatpush.bf16.msra.mxu3 %v5064_v40  ;;  %4204 = vmatpush.bf16.msra.mxu2 %v5052_v25 }
 0x632   : > { %v3883_v36 = vmul.f32 %v3879_v10, %v3775_v29 }
 0x634   : > { %v3890_v63 = vadd.f32 %v3886_v30, %v3883_v36 }
 0x635   : > { %4220 = vmatpush.bf16.msra.mxu3 %v5063_v33  ;;  %4205 = vmatpush.bf16.msra.mxu2 %v5051_v54 }
 0x636   : > { %v3892_v34 = vpack.c.bf16 %v3890_v63, %v3889_v17 }
 0x638   : > { %4872 = vmatmul.msk.bf16.gmra.mxu0 %vm581_vm0, %v3892_v34  ;;  %4874 = vmatmul.msk.bf16.gmra.mxu1 %vm581_vm0, %v3892_v34 }
 0x639   : > { %4221 = vmatpush.bf16.msra.mxu3 %v5062_v35  ;;  %4206 = vmatpush.bf16.msra.mxu2 %v5050_v49 }
 0x63d   : > { %4222 = vmatpush.bf16.msra.mxu3 %v5061_v62 }
 0x641   : > { %4223 = vmatpush.bf16.msra.mxu3 %v5060_v20 }
 0x645   : > { %4224 = vmatpush.bf16.msra.mxu3 %v5059_v58 }
 0x649   : > { %4225 = vmatpush.bf16.msra.mxu3 %v5058_v55 }
 0x6a5   : > { %v3962_v16 = vpop.f32.mrf.mxu0  ;;  %v3981_v47 = vpop.f32.mrf.mxu1 }
 0x6a6   : > { %v6839_v11 = vadd.f32 %v3962_v16, %v3903_v0  ;;  %v6841_v5 = vadd.f32 %v3981_v47, %v3904_v18 }
 0x6a8   : > { %v3991_v48 = vmul.f32 %v6839_v11, %v6839_v11  ;;  %v3992_v31 = vmul.f32 %v6841_v5, %v6841_v5 }
 0x6aa   : > { %v3999_v9 = vmul.f32 %v3991_v48, %v6839_v11  ;;  %v4000_v3 = vmul.f32 %v3992_v31, %v6841_v5 }
 0x6ac   : > { %v4007_v50 = vmul.f32 0.044715, %v3999_v9  ;;  %v4008_v7 = vmul.f32 0.044715, %v4000_v3 }
 0x6ad   : > { %v3964_v23 = vpop.f32.mrf.mxu0  ;;  %v3983_v6 = vpop.f32.mrf.mxu1 }
 0x6ae   : > { %v4015_v1 = vadd.f32 %v4007_v50, %v6839_v11  ;;  %v4016_v46 = vadd.f32 %v4008_v7, %v6841_v5  ;;  %v3965_v22 = vadd.f32 %v3964_v23, %v3903_v0  ;;  %v3984_v37 = vadd.f32 %v3983_v6, %v3904_v18 }
 0x6b0   : > { %v4023_v19 = vmul.f32 0.7978846, %v4015_v1  ;;  %v3993_v61 = vmul.f32 %v3965_v22, %v3965_v22  ;;  %v3994_v43 = vmul.f32 %v3984_v37, %v3984_v37  ;;  %v4024_v45 = vmul.f32 0.7978846, %v4016_v46 }
 0x6b2   : > { %v4001_v21 = vmul.f32 %v3993_v61, %v3965_v22  ;;  %v4002_v24 = vmul.f32 %v3994_v43, %v3984_v37  ;;  %5275 = vtanh.f32 %v4023_v19 }
 0x6b3   : > { %5277 = vtanh.f32 %v4024_v45 }
 0x6b4   : > { %v4009_v60 = vmul.f32 0.044715, %v4001_v21  ;;  %v4010_v51 = vmul.f32 0.044715, %v4002_v24 }
 0x6b5   : > { %v3967_v38 = vpop.f32.mrf.mxu0  ;;  %v3986_v14 = vpop.f32.mrf.mxu1 }
 0x6b6   : > { %v4017_v26 = vadd.f32 %v4009_v60, %v3965_v22  ;;  %v4018_v52 = vadd.f32 %v4010_v51, %v3984_v37  ;;  %v6857_v12 = vadd.f32 %v3967_v38, %v3903_v0  ;;  %v6859_v4 = vadd.f32 %v3986_v14, %v3904_v18 }
 0x6b8   : > { %v4025_v15 = vmul.f32 0.7978846, %v4017_v26  ;;  %v4026_v29 = vmul.f32 0.7978846, %v4018_v52  ;;  %v3995_v56 = vmul.f32 %v6857_v12, %v6857_v12  ;;  %v3996_v42 = vmul.f32 %v6859_v4, %v6859_v4  ;;  %v5276_v10 = vpop.eup %5275 }
 0x6b9   : > { %v5278_v36 = vpop.eup %5277  ;;  %v4039_v34 = vadd.f32 1.0, %v5276_v10  ;;  %v5128_v10 = vld [vmem:[%s6935_s15] ss:$0 sm:$0xff] }
 0x6ba   : > { %5279 = vtanh.f32 %v4025_v15  ;;  %v4003_v27 = vmul.f32 %v3995_v56, %v6857_v12  ;;  %v4004_v30 = vmul.f32 %v3996_v42, %v6859_v4  ;;  %v4040_v41 = vadd.f32 1.0, %v5278_v36 }
 0x6bb   : > { %5281 = vtanh.f32 %v4026_v29  ;;  %v4047_v20 = vmul.f32 0.5, %v4039_v34 }
 0x6bc   : > { %v4011_v17 = vmul.f32 0.044715, %v4003_v27  ;;  %v4012_v63 = vmul.f32 0.044715, %v4004_v30  ;;  %v4048_v16 = vmul.f32 0.5, %v4040_v41 }
 0x6bd   : > { %v3969_v2 = vpop.f32.mrf.mxu0  ;;  %v3988_v32 = vpop.f32.mrf.mxu1  ;;  %v4055_v3 = vmul.f32 %v4047_v20, %v6839_v11 }
 0x6be   : > { %v4019_v40 = vadd.f32 %v4011_v17, %v6857_v12  ;;  %v4020_v57 = vadd.f32 %v4012_v63, %v6859_v4  ;;  %v3970_v33 = vadd.f32 %v3969_v2, %v3903_v0  ;;  %v3989_v28 = vadd.f32 %v3988_v32, %v3904_v18 }
 0x6bf   : > { %v4056_v50 = vmul.f32 %v4048_v16, %v6841_v5 }
 0x6c0   : > { %v5280_v35 = vpop.eup %5279  ;;  %v4027_v39 = vmul.f32 0.7978846, %v4019_v40  ;;  %v3997_v62 = vmul.f32 %v3970_v33, %v3970_v33  ;;  %v4028_v54 = vmul.f32 0.7978846, %v4020_v57  ;;  %v3998_v58 = vmul.f32 %v3989_v28, %v3989_v28 }
 0x6c1   : > { %v5282_v25 = vpop.eup %5281  ;;  %v4041_v13 = vadd.f32 1.0, %v5280_v35 }
 0x6c2   : > { %v4042_v47 = vadd.f32 1.0, %v5282_v25  ;;  %v4005_v49 = vmul.f32 %v3997_v62, %v3970_v33  ;;  %v4006_v48 = vmul.f32 %v3998_v58, %v3989_v28  ;;  %5283 = vtanh.f32 %v4027_v39 }
 0x6c3   : > { %v4049_v55 = vmul.f32 0.5, %v4041_v13  ;;  %5285 = vtanh.f32 %v4028_v54 }
 0x6c4   : > { %v4050_v31 = vmul.f32 0.5, %v4042_v47  ;;  %v4013_v9 = vmul.f32 0.044715, %v4005_v49  ;;  %v4014_v18 = vmul.f32 0.044715, %v4006_v48 }
 0x6c5   : > { %v4057_v0 = vmul.f32 %v4049_v55, %v3965_v22 }
 0x6c6   : > { %v4058_v7 = vmul.f32 %v4050_v31, %v3984_v37  ;;  %v4021_v23 = vadd.f32 %v4013_v9, %v3970_v33  ;;  %v4022_v1 = vadd.f32 %v4014_v18, %v3989_v28 }
 0x6c7   : > { %v4063_v6 = vpack.c.bf16 %v4057_v0, %v4055_v3 }
 0x6c8   : > { %v4064_v46 = vpack.c.bf16 %v4058_v7, %v4056_v50  ;;  %v4029_v19 = vmul.f32 0.7978846, %v4021_v23  ;;  %v4030_v61 = vmul.f32 0.7978846, %v4022_v1  ;;  %v5284_v43 = vpop.eup %5283 }
 0x6c9   : > { %4207 = vmatmul.bf16.vlgmr.msra.gmra.mxu2 %v4063_v6  ;;  %v5286_v45 = vpop.eup %5285  ;;  %v4043_v21 = vadd.f32 1.0, %v5284_v43 }
 0x6ca   : > { %5287 = vtanh.f32 %v4029_v19  ;;  %4226 = vmatmul.bf16.vlgmr.msra.gmra.mxu3 %v4064_v46  ;;  %v4044_v11 = vadd.f32 1.0, %v5286_v45 }
 0x6cb   : > { %5289 = vtanh.f32 %v4030_v61  ;;  %v4051_v5 = vmul.f32 0.5, %v4043_v21 }
 0x6cc   : > { %v4052_v51 = vmul.f32 0.5, %v4044_v11 }
 0x6cd   : > { %v4059_v26 = vmul.f32 %v4051_v5, %v6857_v12 }
 0x6ce   : > { %v4060_v15 = vmul.f32 %v4052_v51, %v6859_v4 }
 0x6d0   : > { %v5288_v22 = vpop.eup %5287 }
 0x6d1   : > { %v5290_v24 = vpop.eup %5289  ;;  %v4045_v60 = vadd.f32 1.0, %v5288_v22 }
 0x6d2   : > { %v4046_v37 = vadd.f32 1.0, %v5290_v24 }
 0x6d3   : > { %v4053_v38 = vmul.f32 0.5, %v4045_v60 }
 0x6d4   : > { %v4054_v14 = vmul.f32 0.5, %v4046_v37 }
 0x6d5   : > { %v4061_v52 = vmul.f32 %v4053_v38, %v3970_v33 }
 0x6d6   : > { %v4062_v29 = vmul.f32 %v4054_v14, %v3989_v28 }
 0x6d7   : > { %v4065_v56 = vpack.c.bf16 %v4061_v52, %v4059_v26 }
 0x6d8   : > { %v4066_v42 = vpack.c.bf16 %v4062_v29, %v4060_v15 }
 0x6d9   : > { %4212 = vmatmul.bf16.gmra.mxu2 %v4065_v56 }
 0x6da   : > { %4231 = vmatmul.bf16.gmra.mxu3 %v4066_v42 }
 0x74c   : > { %v4208_v27 = vpop.f32.mrf.mxu2 }
 0x74d   : > { %v4209_v30 = vadd.f32 %v5128_v10, %v4208_v27  ;;  %v4227_v36 = vpop.f32.mrf.mxu3 }
 0x74f   : > { %v4228_v12 = vadd.f32 %v4227_v36, %v4209_v30 }
 0x751   : > { %v4237_v17 = vadd.f32 %v4228_v12, %v6656_v8 }
 0x753   : > { %4241 = vst.msk [vmem:[%s545_s18] sm:$0xff] %vm581_vm0, %v4237_v17 }
 0x754   : > { %v4210_v4 = vpop.f32.mrf.mxu2 }
 0x755   : > { %v4211_v63 = vadd.f32 %v5128_v10, %v4210_v4  ;;  %v4229_v34 = vpop.f32.mrf.mxu3 }
 0x757   : > { %v4230_v2 = vadd.f32 %v4229_v34, %v4211_v63 }
 0x759   : > { %v4238_v32 = vadd.f32 %v4230_v2, %v6670_v53 }
 0x75b   : > { %4242 = vst.msk [vmem:[%s545_s18 + $0x8] sm:$0xff] %vm581_vm0, %v4238_v32 }
 0x75c   : > { %v4213_v41 = vpop.f32.mrf.mxu2 }
 0x75d   : > { %v4214_v40 = vadd.f32 %v5128_v10, %v4213_v41  ;;  %v4232_v57 = vpop.f32.mrf.mxu3 }
 0x75f   : > { %v4233_v33 = vadd.f32 %v4232_v57, %v4214_v40 }
 0x761   : > { %v4239_v28 = vadd.f32 %v4233_v33, %v6680_v59 }
 0x763   : > { %4243 = vst.msk [vmem:[%s545_s18 + $0x10] sm:$0xff] %vm581_vm0, %v4239_v28 }
 0x764   : > { %v4215_v8 = vpop.f32.mrf.mxu2 }
 0x765   : > { %v4216_v53 = vadd.f32 %v5128_v10, %v4215_v8  ;;  %v4234_v35 = vpop.f32.mrf.mxu3 }
 0x767   : > { %v4235_v39 = vadd.f32 %v4234_v35, %v4216_v53 }
 0x769   : > { %v4240_v62 = vadd.f32 %v4235_v39, %v6688_v44 }
 0x76b   : > { %4244 = vst.msk [vmem:[%s545_s18 + $0x18] sm:$0xff] %vm581_vm0, %v4240_v62 }
 0x76c   : > { %5339 = shalt.err (!%p5336_p8)
}
 0x76d   : > { %s5382_s23 = smov 128   ;;  %s5383_s18 = smov 8  }
 0x76e   : > { %5072 = dma.vmem_to_hbm [thread:$0]  (%p5507_p5), %s4260_s20, 512, %s4262_s26, %s4246_s25, %s5382_s23, %s5382_s23, %s5383_s18  }
 0x76f PF: > { %p5084_p9 = scmp.ge.s32.totalorder %s5378_s24, 2  ;;  %s4276_s2 = sand.u32 1, %s5366_s21  }
 0x770   : > { %s4277_s27 = scalar_lea.sflag [#allocation3], %s4276_s2 }
 0x771   : > { %p5079_p10 = pnand %p5084_p9, %p5511_p6 }
 0x773   : > { %p5080_p11 = pneg %p5079_p10 }
 0x775   : > { %5361 = dma.done.wait (%p5080_p11), %s4277_s27, 512  }
 0x776   : > { %5363 = vsyncadd (%p5080_p11), %s4277_s27, 4294966784  ;;  %s6971_s24 = sld [smem:[#allocation9_spill]]  ;;  %s6974_s21 = smov %s5370_s22 }
 0x777   : > { %s6972_s28 = sld [smem:[#allocation8_spill]] }
 0x778   : > { %s6973_s23 = sld [smem:[#allocation10_spill]] }
 0x77c   : > { %p27_p12 = scmp.ge.s32.totalorder %s6971_s24, 4  }
 0x77d   : > { %s6975_s22 = smov %s6972_s28 }
 0x77e   :  { %29 = sbr.rel (!%p27_p12) target bundleno = 8 (0x8), region = 127 }
 0x783   :  { %4283 = vsyncpa [#allocation3], 1 }
 0x784   :  { %4285 = vsyncpa [#allocation3 + $0x1], 1 }
 0x785   :  { %4286 = vsyncpa [#allocation4], 1 }
 0x786   :  { %4288 = vsyncpa [#allocation4 + $0x1], 1 }

</bundles_post_ra>
